<compile_context>
chip_gen: v6e
topology: v6e:2x2x1
jax: 0.10.0
libtpu: 0.0.40
codegen_flags: <defaults>
</compile_context>

<pallas_src>
import jax
import jax.numpy as jnp
from jax import lax
from jax.experimental import pallas as pl
from jax.experimental.pallas import tpu as pltpu

NEG_SLOPE = 0.1
BN_EPS = 1e-5

C_IN = 64     # block input channels
C_MID = 32    # conv1 output channels
C_OUT = 128   # conv_extra output channels


# ---------------------------------------------------------------------------
# Fully fused kernel: conv1 + BN + LReLU + conv2 + BN + LReLU + residual
#                     + stride-2 conv + BN + LReLU
# ---------------------------------------------------------------------------
def _make_fused_kernel(H, W):
    Wo = W // 2
    Ho = H // 2
    HWp = H * Wo          # rows of the column-pair packed x / y1 / y2 / z
    HWo = Ho * Wo         # rows of the stride-2 output

    def kernel(x_ref, w1_ref, b1_ref, w2_ref, b2_ref, w3_ref, b3_ref,
               o_ref, q_ref, pe_ref, po_ref):
        # x_ref : (1, H*Wo, 128) f32   column-pair packed NHWC input
        # w1_ref: (128, 64)      bf16  block-diag 1x1 weights (BN1 folded)
        # b1_ref: (1, 64)        f32
        # w2_ref: (9, 64, 128)   bf16  packed 3x3 weights (BN2 folded)
        # b2_ref: (1, 128)       f32
        # w3_ref: (6, 128, 128)  bf16  packed stride-2 3x3 weights (BN3 folded)
        # b3_ref: (1, 128)       f32
        # o_ref : (1, Ho*Wo, 128) f32
        # q_ref : (H+2, Wo+2, 64)   bf16  zero-padded packed conv1 output
        # pe_ref: (Ho+1, Wo+1, 128) bf16  even padded-rows of the residual
        # po_ref: (Ho,   Wo+1, 128) bf16  odd  padded-rows of the residual

        # --- zero only the pad borders (interiors are fully overwritten below) ---
        q_ref[0:1, :, :] = jnp.zeros((1, Wo + 2, 2 * C_MID), jnp.bfloat16)
        q_ref[H + 1:H + 2, :, :] = jnp.zeros((1, Wo + 2, 2 * C_MID), jnp.bfloat16)
        q_ref[:, 0:1, :] = jnp.zeros((H + 2, 1, 2 * C_MID), jnp.bfloat16)
        q_ref[:, Wo + 1:Wo + 2, :] = jnp.zeros((H + 2, 1, 2 * C_MID), jnp.bfloat16)
        pe_ref[0:1, :, :] = jnp.zeros((1, Wo + 1, 2 * C_IN), jnp.bfloat16)
        pe_ref[:, 0:1, :] = jnp.zeros((Ho + 1, 1, 2 * C_IN), jnp.bfloat16)
        po_ref[:, 0:1, :] = jnp.zeros((Ho, 1, 2 * C_IN), jnp.bfloat16)

        # --- conv1 (1x1) + BN1 + LReLU on the packed layout (K=128 -> 2x32) ---
        xb = x_ref[0].astype(jnp.bfloat16)                           # (HWp, 128)
        y1 = jnp.dot(xb, w1_ref[...], preferred_element_type=jnp.float32)
        y1 = y1 + b1_ref[...]
        y1 = jnp.where(y1 >= 0, y1, NEG_SLOPE * y1)                  # (HWp, 64) f32
        q_ref[1:H + 1, 1:Wo + 1, :] = (
            y1.astype(jnp.bfloat16).reshape(H, Wo, 2 * C_MID))

        # --- conv2 (3x3, pad 1) + BN2 + LReLU: 9 dots, K=64, N=128 ---
        acc2 = jnp.zeros((HWp, 2 * C_IN), jnp.float32)
        for dy in range(3):
            for c in range(3):                                       # packed-col offset
                win = q_ref[dy:dy + H, c:c + Wo, :].reshape(HWp, 2 * C_MID)
                acc2 = acc2 + jnp.dot(win, w2_ref[3 * dy + c],
                                      preferred_element_type=jnp.float32)
        y2 = acc2 + b2_ref[...]
        y2 = jnp.where(y2 >= 0, y2, NEG_SLOPE * y2)                  # (HWp, 128) f32

        # --- residual in f32, stage into row-parity-split padded scratches ---
        z = (x_ref[0] + y2).astype(jnp.bfloat16).reshape(Ho, 2, Wo, 2 * C_IN)
        pe_ref[1:Ho + 1, 1:Wo + 1, :] = z[:, 1]      # odd z rows  = even padded rows
        po_ref[0:Ho, 1:Wo + 1, :] = z[:, 0]          # even z rows = odd  padded rows

        # --- conv_extra (3x3, stride 2, pad 1) + BN3 + LReLU: 6 dots, K=128 ---
        # TODO(synk): for large H*W, add spatial tiling with a 1-row halo and chunk
        # the M dimension (~256-512 rows per dot) so accumulators stay in vregs and
        # the scratches fit v7x's 64 MiB VMEM.
        acc3 = jnp.zeros((HWo, C_OUT), jnp.float32)
        for dy in range(3):
            src = po_ref if dy == 1 else pe_ref
            r0 = 1 if dy == 2 else 0
            wa = src[r0:r0 + Ho, 0:Wo, :].reshape(HWo, 2 * C_IN)
            wb = src[r0:r0 + Ho, 1:Wo + 1, :].reshape(HWo, 2 * C_IN)
            acc3 = acc3 + jnp.dot(wa, w3_ref[2 * dy],
                                  preferred_element_type=jnp.float32)
            acc3 = acc3 + jnp.dot(wb, w3_ref[2 * dy + 1],
                                  preferred_element_type=jnp.float32)
        y3 = acc3 + b3_ref[...]
        y3 = jnp.where(y3 >= 0, y3, NEG_SLOPE * y3)
        o_ref[0] = y3.astype(o_ref.dtype)

    return kernel


# ---------------------------------------------------------------------------
# Wrapper: BN folding, packed-weight construction, pallas_call plumbing
# ---------------------------------------------------------------------------
def _fold_bn(gamma, beta, mean, var):
    s = gamma / jnp.sqrt(var + BN_EPS)
    return s, beta - mean * s


def _pack_weights(p):
    s1, t1 = _fold_bn(p["g1"], p["b1"], p["m1"], p["v1"])
    s2, t2 = _fold_bn(p["g2"], p["b2"], p["m2"], p["v2"])
    s3, t3 = _fold_bn(p["g3"], p["b3"], p["m3"], p["v3"])

    # conv1: (32,64,1,1) -> (64,32); block-diag for the column-pair packed layout.
    w1 = jnp.transpose(p["w1"], (2, 3, 1, 0)).reshape(C_IN, C_MID) * s1
    z1 = jnp.zeros((C_IN, C_MID), jnp.float32)
    w1p = jnp.concatenate(
        [jnp.concatenate([w1, z1], axis=1),
         jnp.concatenate([z1, w1], axis=1)], axis=0).astype(jnp.bfloat16)  # (128,64)
    b1p = jnp.concatenate([t1, t1]).reshape(1, 2 * C_MID).astype(jnp.float32)

    # conv2: (64,32,3,3) -> (3,3,32,64); 9 packed (64,128) taps (3 dy x 3 col offsets).
    w2 = jnp.transpose(p["w2"], (2, 3, 1, 0)) * s2
    z2 = jnp.zeros((C_MID, C_IN), jnp.float32)

    def cat22(a, b, c, d):
        return jnp.concatenate([jnp.concatenate([a, b], axis=1),
                                jnp.concatenate([c, d], axis=1)], axis=0)

    taps2 = []
    for dy in range(3):
        taps2.append(cat22(z2, z2, w2[dy, 0], z2))                        # col offset 0
        taps2.append(cat22(w2[dy, 1], w2[dy, 0], w2[dy, 2], w2[dy, 1]))   # col offset 1
        taps2.append(cat22(z2, w2[dy, 2], z2, z2))                        # col offset 2
    w2p = jnp.stack(taps2, axis=0).astype(jnp.bfloat16)                   # (9,64,128)
    b2p = jnp.concatenate([t2, t2]).reshape(1, 2 * C_IN).astype(jnp.float32)

    # conv_extra: (128,64,3,3) -> (3,3,64,128); 2 packed (128,128) taps per kernel row.
    w3 = jnp.transpose(p["w3"], (2, 3, 1, 0)) * s3
    z3 = jnp.zeros((C_IN, C_OUT), jnp.float32)
    taps3 = []
    for dy in range(3):
        taps3.append(jnp.concatenate([z3, w3[dy, 0]], axis=0))            # window a
        taps3.append(jnp.concatenate([w3[dy, 1], w3[dy, 2]], axis=0))     # window b
    w3p = jnp.stack(taps3, axis=0).astype(jnp.bfloat16)                   # (6,128,128)
    b3p = t3.reshape(1, C_OUT).astype(jnp.float32)

    return w1p, b1p, w2p, b2p, w3p, b3p


def resblock1_forward(x_nchw, p):
    N, C, H, W = x_nchw.shape
    assert C == C_IN, "resblock1 expects 64 input channels"
    assert H % 2 == 0 and W % 2 == 0, "even spatial dims expected (stride-2 conv)"
    Ho, Wo = H // 2, W // 2
    HWp, HWo = H * Wo, Ho * Wo
    # TODO(synk): for very small N add a batch tile (>1 image per grid step) and for
    # very large H*W add halo'd spatial tiling; both keep this single-pallas_call
    # structure and only change the BlockSpecs.

    w1p, b1p, w2p, b2p, w3p, b3p = _pack_weights(p)

    # NCHW -> NHWC (f32) -> column-pair packed (N, H*Wo, 128).  f32 keeps the
    # in-kernel residual add exact; matmul operands are cast to bf16 in-kernel.
    x = jnp.transpose(x_nchw, (0, 2, 3, 1)).astype(jnp.float32).reshape(N, HWp, 2 * C_IN)

    out = pl.pallas_call(
        _make_fused_kernel(H, W),
        out_shape=jax.ShapeDtypeStruct((N, HWo, C_OUT), jnp.float32),
        grid_spec=pltpu.PrefetchScalarGridSpec(
            num_scalar_prefetch=0,
            grid=(N,),
            in_specs=[
                pl.BlockSpec((1, HWp, 2 * C_IN), lambda b: (b, 0, 0)),
                pl.BlockSpec((2 * C_IN, 2 * C_MID), lambda b: (0, 0)),
                pl.BlockSpec((1, 2 * C_MID), lambda b: (0, 0)),
                pl.BlockSpec((9, 2 * C_MID, 2 * C_IN), lambda b: (0, 0, 0)),
                pl.BlockSpec((1, 2 * C_IN), lambda b: (0, 0)),
                pl.BlockSpec((6, 2 * C_IN, C_OUT), lambda b: (0, 0, 0)),
                pl.BlockSpec((1, C_OUT), lambda b: (0, 0)),
            ],
            out_specs=pl.BlockSpec((1, HWo, C_OUT), lambda b: (b, 0, 0)),
            scratch_shapes=[
                pltpu.VMEM((H + 2, Wo + 2, 2 * C_MID), jnp.bfloat16),
                pltpu.VMEM((Ho + 1, Wo + 1, 2 * C_IN), jnp.bfloat16),
                pltpu.VMEM((Ho, Wo + 1, 2 * C_IN), jnp.bfloat16),
            ],
        ),
        compiler_params=pltpu.CompilerParams(
            dimension_semantics=("parallel",),
            vmem_limit_bytes=32 * 1024 * 1024,
        ),
    )(x, w1p, b1p, w2p, b2p, w3p, b3p)

    out = out.reshape(N, Ho, Wo, C_OUT)
    return jnp.transpose(out, (0, 3, 1, 2))                          # back to NCHW


# ---------------------------------------------------------------------------
# Deterministic parameter init + pure-JAX reference
# ---------------------------------------------------------------------------
def init_params(key):
    k1, k2, k3 = jax.random.split(key, 3)

    def bn(c, idx):
        r = jnp.arange(c, dtype=jnp.float32)
        return {
            f"g{idx}": 1.0 + 0.01 * r,
            f"b{idx}": 0.01 * r - 0.1,
            f"m{idx}": 0.02 * r - 0.3,
            f"v{idx}": 1.0 + 0.03 * r,
        }

    p = {
        "w1": jax.random.normal(k1, (C_MID, C_IN, 1, 1), jnp.float32) * 0.05,
        "w2": jax.random.normal(k2, (C_IN, C_MID, 3, 3), jnp.float32) * 0.05,
        "w3": jax.random.normal(k3, (C_OUT, C_IN, 3, 3), jnp.float32) * 0.05,
    }
    p.update(bn(C_MID, 1))
    p.update(bn(C_IN, 2))
    p.update(bn(C_OUT, 3))
    return p


def reference_forward(x_nchw, p):
    dn = ("NHWC", "HWIO", "NHWC")

    def bn(y, g, b, m, v):
        s = g / jnp.sqrt(v + BN_EPS)
        return y * s + (b - m * s)

    def lrelu(y):
        return jnp.where(y >= 0, y, NEG_SLOPE * y)

    x = jnp.transpose(x_nchw, (0, 2, 3, 1)).astype(jnp.float32)
    w1 = jnp.transpose(p["w1"], (2, 3, 1, 0))
    w2 = jnp.transpose(p["w2"], (2, 3, 1, 0))
    w3 = jnp.transpose(p["w3"], (2, 3, 1, 0))

    y = lax.conv_general_dilated(x, w1, (1, 1), "VALID", dimension_numbers=dn)
    y = lrelu(bn(y, p["g1"], p["b1"], p["m1"], p["v1"]))
    y = lax.conv_general_dilated(y, w2, (1, 1), ((1, 1), (1, 1)), dimension_numbers=dn)
    y = lrelu(bn(y, p["g2"], p["b2"], p["m2"], p["v2"]))
    y = x + y
    y = lax.conv_general_dilated(y, w3, (2, 2), ((1, 1), (1, 1)), dimension_numbers=dn)
    y = lrelu(bn(y, p["g3"], p["b3"], p["m3"], p["v3"]))
    return jnp.transpose(y, (0, 3, 1, 2))


if __name__ == "__main__":
    key = jax.random.PRNGKey(0)
    kx, kp = jax.random.split(key)
    params = init_params(kp)

    # small shapes consistent with the module: batch=2, 64 channels, 16x16 spatial
    x = jax.random.normal(kx, (2, C_IN, 16, 16), jnp.float32)

    out = jax.block_until_ready(jax.jit(resblock1_forward)(x, params))
    ref = jax.block_until_ready(reference_forward(x, params))

    assert out.shape == (2, C_OUT, 8, 8) and out.dtype == jnp.float32
    max_err = float(jnp.max(jnp.abs(out - ref)))
    # f32 input/residual/output; only matmul operands are bf16 (MXU fast path).
    assert max_err < 1e-1, f"mismatch vs reference: max abs err = {max_err}"
    print("KERNEL_OK")
</pallas_src>

<mosaic_0001>
module attributes {stable_mosaic.version = 11 : i64} {
  func.func @kernel(%arg0: i32, %arg1: memref<1x128x128xf32, #tpu.memory_space<vmem>>, %arg2: memref<128x64xbf16, #tpu.memory_space<vmem>>, %arg3: memref<1x64xf32, #tpu.memory_space<vmem>>, %arg4: memref<9x64x128xbf16, #tpu.memory_space<vmem>>, %arg5: memref<1x128xf32, #tpu.memory_space<vmem>>, %arg6: memref<6x128x128xbf16, #tpu.memory_space<vmem>>, %arg7: memref<1x128xf32, #tpu.memory_space<vmem>>, %arg8: memref<1x64x128xf32, #tpu.memory_space<vmem>>, %arg9: memref<18x10x64xbf16, #tpu.memory_space<vmem>>, %arg10: memref<9x9x128xbf16, #tpu.memory_space<vmem>>, %arg11: memref<8x9x128xbf16, #tpu.memory_space<vmem>>) attributes {dimension_semantics = [#tpu.dimension_semantics<parallel>], iteration_bounds = array<i64: 2>, scalar_prefetch = 0 : i64, scratch_operands = 3 : i64, tpu.core_type = #tpu.core_type<tc>, window_params = [{transform_indices = @transform_0, window_bounds = array<i64: 1, 128, 128>}, {pipeline_mode = #tpu.pipeline_mode<synchronous>, transform_indices = @transform_1, window_bounds = array<i64: 128, 64>}, {pipeline_mode = #tpu.pipeline_mode<synchronous>, transform_indices = @transform_2, window_bounds = array<i64: 1, 64>}, {pipeline_mode = #tpu.pipeline_mode<synchronous>, transform_indices = @transform_3, window_bounds = array<i64: 9, 64, 128>}, {pipeline_mode = #tpu.pipeline_mode<synchronous>, transform_indices = @transform_4, window_bounds = array<i64: 1, 128>}, {pipeline_mode = #tpu.pipeline_mode<synchronous>, transform_indices = @transform_5, window_bounds = array<i64: 6, 128, 128>}, {pipeline_mode = #tpu.pipeline_mode<synchronous>, transform_indices = @transform_6, window_bounds = array<i64: 1, 128>}, {transform_indices = @transform_7, window_bounds = array<i64: 1, 64, 128>}]} {
    %cst = arith.constant 0.000000e+00 : bf16
    %0 = vector.broadcast %cst : bf16 to vector<1x10x64xbf16>
    %c0 = arith.constant 0 : index
    %c0_0 = arith.constant 0 : index
    %c0_1 = arith.constant 0 : index
    %1 = vector.load %arg9[%c0, %c0_0, %c0_1] : memref<18x10x64xbf16, #tpu.memory_space<vmem>>, vector<1x10x64xbf16>
    tpu.vector_store %arg9[%c0, %c0_0, %c0_1], %0 {strides = array<i32>} : memref<18x10x64xbf16, #tpu.memory_space<vmem>>, vector<1x10x64xbf16>,
    %cst_2 = arith.constant 0.000000e+00 : bf16
    %2 = vector.broadcast %cst_2 : bf16 to vector<1x10x64xbf16>
    %c17 = arith.constant 17 : index
    %c0_3 = arith.constant 0 : index
    %c0_4 = arith.constant 0 : index
    %3 = vector.load %arg9[%c17, %c0_3, %c0_4] : memref<18x10x64xbf16, #tpu.memory_space<vmem>>, vector<1x10x64xbf16>
    tpu.vector_store %arg9[%c17, %c0_3, %c0_4], %2 {strides = array<i32>} : memref<18x10x64xbf16, #tpu.memory_space<vmem>>, vector<1x10x64xbf16>,
    %cst_5 = arith.constant 0.000000e+00 : bf16
    %4 = vector.broadcast %cst_5 : bf16 to vector<18x1x64xbf16>
    %c0_6 = arith.constant 0 : index
    %c0_7 = arith.constant 0 : index
    %c0_8 = arith.constant 0 : index
    %5 = vector.load %arg9[%c0_6, %c0_7, %c0_8] : memref<18x10x64xbf16, #tpu.memory_space<vmem>>, vector<18x1x64xbf16>
    tpu.vector_store %arg9[%c0_6, %c0_7, %c0_8], %4 {strides = array<i32>} : memref<18x10x64xbf16, #tpu.memory_space<vmem>>, vector<18x1x64xbf16>,
    %cst_9 = arith.constant 0.000000e+00 : bf16
    %6 = vector.broadcast %cst_9 : bf16 to vector<18x1x64xbf16>
    %c0_10 = arith.constant 0 : index
    %c9 = arith.constant 9 : index
    %c0_11 = arith.constant 0 : index
    %7 = vector.load %arg9[%c0_10, %c9, %c0_11] : memref<18x10x64xbf16, #tpu.memory_space<vmem>>, vector<18x1x64xbf16>
    tpu.vector_store %arg9[%c0_10, %c9, %c0_11], %6 {strides = array<i32>} : memref<18x10x64xbf16, #tpu.memory_space<vmem>>, vector<18x1x64xbf16>,
    %cst_12 = arith.constant 0.000000e+00 : bf16
    %8 = vector.broadcast %cst_12 : bf16 to vector<1x9x128xbf16>
    %c0_13 = arith.constant 0 : index
    %c0_14 = arith.constant 0 : index
    %c0_15 = arith.constant 0 : index
    %9 = vector.load %arg10[%c0_13, %c0_14, %c0_15] : memref<9x9x128xbf16, #tpu.memory_space<vmem>>, vector<1x9x128xbf16>
    tpu.vector_store %arg10[%c0_13, %c0_14, %c0_15], %8 {strides = array<i32>} : memref<9x9x128xbf16, #tpu.memory_space<vmem>>, vector<1x9x128xbf16>,
    %cst_16 = arith.constant 0.000000e+00 : bf16
    %10 = vector.broadcast %cst_16 : bf16 to vector<9x1x128xbf16>
    %c0_17 = arith.constant 0 : index
    %c0_18 = arith.constant 0 : index
    %c0_19 = arith.constant 0 : index
    %11 = vector.load %arg10[%c0_17, %c0_18, %c0_19] : memref<9x9x128xbf16, #tpu.memory_space<vmem>>, vector<9x1x128xbf16>
    tpu.vector_store %arg10[%c0_17, %c0_18, %c0_19], %10 {strides = array<i32>} : memref<9x9x128xbf16, #tpu.memory_space<vmem>>, vector<9x1x128xbf16>,
    %cst_20 = arith.constant 0.000000e+00 : bf16
    %12 = vector.broadcast %cst_20 : bf16 to vector<8x1x128xbf16>
    %c0_21 = arith.constant 0 : index
    %c0_22 = arith.constant 0 : index
    %c0_23 = arith.constant 0 : index
    %13 = vector.load %arg11[%c0_21, %c0_22, %c0_23] : memref<8x9x128xbf16, #tpu.memory_space<vmem>>, vector<8x1x128xbf16>
    tpu.vector_store %arg11[%c0_21, %c0_22, %c0_23], %12 {strides = array<i32>} : memref<8x9x128xbf16, #tpu.memory_space<vmem>>, vector<8x1x128xbf16>,
    %c0_24 = arith.constant 0 : index
    %c0_25 = arith.constant 0 : index
    %c0_26 = arith.constant 0 : index
    %14 = vector.load %arg1[%c0_24, %c0_25, %c0_26] : memref<1x128x128xf32, #tpu.memory_space<vmem>>, vector<1x128x128xf32>
    %15 = vector.shape_cast %14 : vector<1x128x128xf32> to vector<128x128xf32>
    %16 = arith.truncf %15 : vector<128x128xf32> to vector<128x128xbf16>
    %c0_27 = arith.constant 0 : index
    %c0_28 = arith.constant 0 : index
    %17 = vector.load %arg2[%c0_27, %c0_28] : memref<128x64xbf16, #tpu.memory_space<vmem>>, vector<128x64xbf16>
    %cst_29 = arith.constant dense<0.000000e+00> : vector<128x64xf32>
    %18 = tpu.matmul %16, %17, %cst_29 {dimension_numbers = #tpu.dot_dimension_numbers<[1], [0], [0], [1], [0, 0, 1, 1], [], []>} : vector<128x128xbf16>, vector<128x64xbf16>, vector<128x64xf32> -> vector<128x64xf32>
    %c0_30 = arith.constant 0 : index
    %c0_31 = arith.constant 0 : index
    %19 = vector.load %arg3[%c0_30, %c0_31] : memref<1x64xf32, #tpu.memory_space<vmem>>, vector<1x64xf32>
    %20 = vector.broadcast %19 : vector<1x64xf32> to vector<128x64xf32>
    %21 = arith.addf %18, %20 : vector<128x64xf32>
    %cst_32 = arith.constant 0.000000e+00 : f32
    %22 = vector.broadcast %cst_32 : f32 to vector<128x64xf32>
    %23 = arith.cmpf oge, %21, %22 : vector<128x64xf32>
    %cst_33 = arith.constant 1.000000e-01 : f32
    %24 = vector.broadcast %cst_33 : f32 to vector<128x64xf32>
    %25 = arith.mulf %24, %21 : vector<128x64xf32>
    %26 = arith.select %23, %21, %25 : vector<128x64xi1>, vector<128x64xf32>
    %27 = arith.truncf %26 : vector<128x64xf32> to vector<128x64xbf16>
    %28 = vector.shape_cast %27 : vector<128x64xbf16> to vector<16x8x64xbf16>
    %c1 = arith.constant 1 : index
    %c1_34 = arith.constant 1 : index
    %c0_35 = arith.constant 0 : index
    %29 = vector.load %arg9[%c1, %c1_34, %c0_35] : memref<18x10x64xbf16, #tpu.memory_space<vmem>>, vector<16x8x64xbf16>
    tpu.vector_store %arg9[%c1, %c1_34, %c0_35], %28 {strides = array<i32>} : memref<18x10x64xbf16, #tpu.memory_space<vmem>>, vector<16x8x64xbf16>,
    %cst_36 = arith.constant 0.000000e+00 : f32
    %30 = vector.broadcast %cst_36 : f32 to vector<128x128xf32>
    %c0_37 = arith.constant 0 : index
    %c0_38 = arith.constant 0 : index
    %c0_39 = arith.constant 0 : index
    %31 = vector.load %arg9[%c0_37, %c0_38, %c0_39] : memref<18x10x64xbf16, #tpu.memory_space<vmem>>, vector<16x8x64xbf16>
    %32 = vector.shape_cast %31 : vector<16x8x64xbf16> to vector<128x64xbf16>
    %c0_40 = arith.constant 0 : index
    %c0_41 = arith.constant 0 : index
    %c0_42 = arith.constant 0 : index
    %33 = vector.load %arg4[%c0_40, %c0_41, %c0_42] : memref<9x64x128xbf16, #tpu.memory_space<vmem>>, vector<1x64x128xbf16>
    %34 = vector.shape_cast %33 : vector<1x64x128xbf16> to vector<64x128xbf16>
    %cst_43 = arith.constant dense<0.000000e+00> : vector<128x128xf32>
    %35 = tpu.matmul %32, %34, %cst_43 {dimension_numbers = #tpu.dot_dimension_numbers<[1], [0], [0], [1], [0, 0, 1, 1], [], []>} : vector<128x64xbf16>, vector<64x128xbf16>, vector<128x128xf32> -> vector<128x128xf32>
    %36 = arith.addf %30, %35 : vector<128x128xf32>
    %c0_44 = arith.constant 0 : index
    %c1_45 = arith.constant 1 : index
    %c0_46 = arith.constant 0 : index
    %37 = vector.load %arg9[%c0_44, %c1_45, %c0_46] : memref<18x10x64xbf16, #tpu.memory_space<vmem>>, vector<16x8x64xbf16>
    %38 = vector.shape_cast %37 : vector<16x8x64xbf16> to vector<128x64xbf16>
    %c1_47 = arith.constant 1 : index
    %c0_48 = arith.constant 0 : index
    %c0_49 = arith.constant 0 : index
    %39 = vector.load %arg4[%c1_47, %c0_48, %c0_49] : memref<9x64x128xbf16, #tpu.memory_space<vmem>>, vector<1x64x128xbf16>
    %40 = vector.shape_cast %39 : vector<1x64x128xbf16> to vector<64x128xbf16>
    %cst_50 = arith.constant dense<0.000000e+00> : vector<128x128xf32>
    %41 = tpu.matmul %38, %40, %cst_50 {dimension_numbers = #tpu.dot_dimension_numbers<[1], [0], [0], [1], [0, 0, 1, 1], [], []>} : vector<128x64xbf16>, vector<64x128xbf16>, vector<128x128xf32> -> vector<128x128xf32>
    %42 = arith.addf %36, %41 : vector<128x128xf32>
    %c0_51 = arith.constant 0 : index
    %c2 = arith.constant 2 : index
    %c0_52 = arith.constant 0 : index
    %43 = vector.load %arg9[%c0_51, %c2, %c0_52] : memref<18x10x64xbf16, #tpu.memory_space<vmem>>, vector<16x8x64xbf16>
    %44 = vector.shape_cast %43 : vector<16x8x64xbf16> to vector<128x64xbf16>
    %c2_53 = arith.constant 2 : index
    %c0_54 = arith.constant 0 : index
    %c0_55 = arith.constant 0 : index
    %45 = vector.load %arg4[%c2_53, %c0_54, %c0_55] : memref<9x64x128xbf16, #tpu.memory_space<vmem>>, vector<1x64x128xbf16>
    %46 = vector.shape_cast %45 : vector<1x64x128xbf16> to vector<64x128xbf16>
    %cst_56 = arith.constant dense<0.000000e+00> : vector<128x128xf32>
    %47 = tpu.matmul %44, %46, %cst_56 {dimension_numbers = #tpu.dot_dimension_numbers<[1], [0], [0], [1], [0, 0, 1, 1], [], []>} : vector<128x64xbf16>, vector<64x128xbf16>, vector<128x128xf32> -> vector<128x128xf32>
    %48 = arith.addf %42, %47 : vector<128x128xf32>
    %c1_57 = arith.constant 1 : index
    %c0_58 = arith.constant 0 : index
    %c0_59 = arith.constant 0 : index
    %49 = vector.load %arg9[%c1_57, %c0_58, %c0_59] : memref<18x10x64xbf16, #tpu.memory_space<vmem>>, vector<16x8x64xbf16>
    %50 = vector.shape_cast %49 : vector<16x8x64xbf16> to vector<128x64xbf16>
    %c3 = arith.constant 3 : index
    %c0_60 = arith.constant 0 : index
    %c0_61 = arith.constant 0 : index
    %51 = vector.load %arg4[%c3, %c0_60, %c0_61] : memref<9x64x128xbf16, #tpu.memory_space<vmem>>, vector<1x64x128xbf16>
    %52 = vector.shape_cast %51 : vector<1x64x128xbf16> to vector<64x128xbf16>
    %cst_62 = arith.constant dense<0.000000e+00> : vector<128x128xf32>
    %53 = tpu.matmul %50, %52, %cst_62 {dimension_numbers = #tpu.dot_dimension_numbers<[1], [0], [0], [1], [0, 0, 1, 1], [], []>} : vector<128x64xbf16>, vector<64x128xbf16>, vector<128x128xf32> -> vector<128x128xf32>
    %54 = arith.addf %48, %53 : vector<128x128xf32>
    %c1_63 = arith.constant 1 : index
    %c1_64 = arith.constant 1 : index
    %c0_65 = arith.constant 0 : index
    %55 = vector.load %arg9[%c1_63, %c1_64, %c0_65] : memref<18x10x64xbf16, #tpu.memory_space<vmem>>, vector<16x8x64xbf16>
    %56 = vector.shape_cast %55 : vector<16x8x64xbf16> to vector<128x64xbf16>
    %c4 = arith.constant 4 : index
    %c0_66 = arith.constant 0 : index
    %c0_67 = arith.constant 0 : index
    %57 = vector.load %arg4[%c4, %c0_66, %c0_67] : memref<9x64x128xbf16, #tpu.memory_space<vmem>>, vector<1x64x128xbf16>
    %58 = vector.shape_cast %57 : vector<1x64x128xbf16> to vector<64x128xbf16>
    %cst_68 = arith.constant dense<0.000000e+00> : vector<128x128xf32>
    %59 = tpu.matmul %56, %58, %cst_68 {dimension_numbers = #tpu.dot_dimension_numbers<[1], [0], [0], [1], [0, 0, 1, 1], [], []>} : vector<128x64xbf16>, vector<64x128xbf16>, vector<128x128xf32> -> vector<128x128xf32>
    %60 = arith.addf %54, %59 : vector<128x128xf32>
    %c1_69 = arith.constant 1 : index
    %c2_70 = arith.constant 2 : index
    %c0_71 = arith.constant 0 : index
    %61 = vector.load %arg9[%c1_69, %c2_70, %c0_71] : memref<18x10x64xbf16, #tpu.memory_space<vmem>>, vector<16x8x64xbf16>
    %62 = vector.shape_cast %61 : vector<16x8x64xbf16> to vector<128x64xbf16>
    %c5 = arith.constant 5 : index
    %c0_72 = arith.constant 0 : index
    %c0_73 = arith.constant 0 : index
    %63 = vector.load %arg4[%c5, %c0_72, %c0_73] : memref<9x64x128xbf16, #tpu.memory_space<vmem>>, vector<1x64x128xbf16>
    %64 = vector.shape_cast %63 : vector<1x64x128xbf16> to vector<64x128xbf16>
    %cst_74 = arith.constant dense<0.000000e+00> : vector<128x128xf32>
    %65 = tpu.matmul %62, %64, %cst_74 {dimension_numbers = #tpu.dot_dimension_numbers<[1], [0], [0], [1], [0, 0, 1, 1], [], []>} : vector<128x64xbf16>, vector<64x128xbf16>, vector<128x128xf32> -> vector<128x128xf32>
    %66 = arith.addf %60, %65 : vector<128x128xf32>
    %c2_75 = arith.constant 2 : index
    %c0_76 = arith.constant 0 : index
    %c0_77 = arith.constant 0 : index
    %67 = vector.load %arg9[%c2_75, %c0_76, %c0_77] : memref<18x10x64xbf16, #tpu.memory_space<vmem>>, vector<16x8x64xbf16>
    %68 = vector.shape_cast %67 : vector<16x8x64xbf16> to vector<128x64xbf16>
    %c6 = arith.constant 6 : index
    %c0_78 = arith.constant 0 : index
    %c0_79 = arith.constant 0 : index
    %69 = vector.load %arg4[%c6, %c0_78, %c0_79] : memref<9x64x128xbf16, #tpu.memory_space<vmem>>, vector<1x64x128xbf16>
    %70 = vector.shape_cast %69 : vector<1x64x128xbf16> to vector<64x128xbf16>
    %cst_80 = arith.constant dense<0.000000e+00> : vector<128x128xf32>
    %71 = tpu.matmul %68, %70, %cst_80 {dimension_numbers = #tpu.dot_dimension_numbers<[1], [0], [0], [1], [0, 0, 1, 1], [], []>} : vector<128x64xbf16>, vector<64x128xbf16>, vector<128x128xf32> -> vector<128x128xf32>
    %72 = arith.addf %66, %71 : vector<128x128xf32>
    %c2_81 = arith.constant 2 : index
    %c1_82 = arith.constant 1 : index
    %c0_83 = arith.constant 0 : index
    %73 = vector.load %arg9[%c2_81, %c1_82, %c0_83] : memref<18x10x64xbf16, #tpu.memory_space<vmem>>, vector<16x8x64xbf16>
    %74 = vector.shape_cast %73 : vector<16x8x64xbf16> to vector<128x64xbf16>
    %c7 = arith.constant 7 : index
    %c0_84 = arith.constant 0 : index
    %c0_85 = arith.constant 0 : index
    %75 = vector.load %arg4[%c7, %c0_84, %c0_85] : memref<9x64x128xbf16, #tpu.memory_space<vmem>>, vector<1x64x128xbf16>
    %76 = vector.shape_cast %75 : vector<1x64x128xbf16> to vector<64x128xbf16>
    %cst_86 = arith.constant dense<0.000000e+00> : vector<128x128xf32>
    %77 = tpu.matmul %74, %76, %cst_86 {dimension_numbers = #tpu.dot_dimension_numbers<[1], [0], [0], [1], [0, 0, 1, 1], [], []>} : vector<128x64xbf16>, vector<64x128xbf16>, vector<128x128xf32> -> vector<128x128xf32>
    %78 = arith.addf %72, %77 : vector<128x128xf32>
    %c2_87 = arith.constant 2 : index
    %c2_88 = arith.constant 2 : index
    %c0_89 = arith.constant 0 : index
    %79 = vector.load %arg9[%c2_87, %c2_88, %c0_89] : memref<18x10x64xbf16, #tpu.memory_space<vmem>>, vector<16x8x64xbf16>
    %80 = vector.shape_cast %79 : vector<16x8x64xbf16> to vector<128x64xbf16>
    %c8 = arith.constant 8 : index
    %c0_90 = arith.constant 0 : index
    %c0_91 = arith.constant 0 : index
    %81 = vector.load %arg4[%c8, %c0_90, %c0_91] : memref<9x64x128xbf16, #tpu.memory_space<vmem>>, vector<1x64x128xbf16>
    %82 = vector.shape_cast %81 : vector<1x64x128xbf16> to vector<64x128xbf16>
    %cst_92 = arith.constant dense<0.000000e+00> : vector<128x128xf32>
    %83 = tpu.matmul %80, %82, %cst_92 {dimension_numbers = #tpu.dot_dimension_numbers<[1], [0], [0], [1], [0, 0, 1, 1], [], []>} : vector<128x64xbf16>, vector<64x128xbf16>, vector<128x128xf32> -> vector<128x128xf32>
    %84 = arith.addf %78, %83 : vector<128x128xf32>
    %c0_93 = arith.constant 0 : index
    %c0_94 = arith.constant 0 : index
    %85 = vector.load %arg5[%c0_93, %c0_94] : memref<1x128xf32, #tpu.memory_space<vmem>>, vector<1x128xf32>
    %86 = vector.broadcast %85 : vector<1x128xf32> to vector<128x128xf32>
    %87 = arith.addf %84, %86 : vector<128x128xf32>
    %cst_95 = arith.constant 0.000000e+00 : f32
    %88 = vector.broadcast %cst_95 : f32 to vector<128x128xf32>
    %89 = arith.cmpf oge, %87, %88 : vector<128x128xf32>
    %cst_96 = arith.constant 1.000000e-01 : f32
    %90 = vector.broadcast %cst_96 : f32 to vector<128x128xf32>
    %91 = arith.mulf %90, %87 : vector<128x128xf32>
    %92 = arith.select %89, %87, %91 : vector<128x128xi1>, vector<128x128xf32>
    %c0_97 = arith.constant 0 : index
    %c0_98 = arith.constant 0 : index
    %c0_99 = arith.constant 0 : index
    %93 = vector.load %arg1[%c0_97, %c0_98, %c0_99] : memref<1x128x128xf32, #tpu.memory_space<vmem>>, vector<1x128x128xf32>
    %94 = vector.shape_cast %93 : vector<1x128x128xf32> to vector<128x128xf32>
    %95 = arith.addf %94, %92 : vector<128x128xf32>
    %96 = arith.truncf %95 : vector<128x128xf32> to vector<128x128xbf16>
    %97 = vector.shape_cast %96 : vector<128x128xbf16> to vector<8x2x8x128xbf16>
    %98 = vector.extract_strided_slice %97 {offsets = [0, 1, 0, 0], sizes = [8, 1, 8, 128], strides = [1, 1, 1, 1]} : vector<8x2x8x128xbf16> to vector<8x1x8x128xbf16>
    %99 = vector.shape_cast %98 : vector<8x1x8x128xbf16> to vector<8x8x128xbf16>
    %c1_100 = arith.constant 1 : index
    %c1_101 = arith.constant 1 : index
    %c0_102 = arith.constant 0 : index
    %100 = vector.load %arg10[%c1_100, %c1_101, %c0_102] : memref<9x9x128xbf16, #tpu.memory_space<vmem>>, vector<8x8x128xbf16>
    tpu.vector_store %arg10[%c1_100, %c1_101, %c0_102], %99 {strides = array<i32>} : memref<9x9x128xbf16, #tpu.memory_space<vmem>>, vector<8x8x128xbf16>,
    %101 = vector.extract_strided_slice %97 {offsets = [0, 0, 0, 0], sizes = [8, 1, 8, 128], strides = [1, 1, 1, 1]} : vector<8x2x8x128xbf16> to vector<8x1x8x128xbf16>
    %102 = vector.shape_cast %101 : vector<8x1x8x128xbf16> to vector<8x8x128xbf16>
    %c0_103 = arith.constant 0 : index
    %c1_104 = arith.constant 1 : index
    %c0_105 = arith.constant 0 : index
    %103 = vector.load %arg11[%c0_103, %c1_104, %c0_105] : memref<8x9x128xbf16, #tpu.memory_space<vmem>>, vector<8x8x128xbf16>
    tpu.vector_store %arg11[%c0_103, %c1_104, %c0_105], %102 {strides = array<i32>} : memref<8x9x128xbf16, #tpu.memory_space<vmem>>, vector<8x8x128xbf16>,
    %cst_106 = arith.constant 0.000000e+00 : f32
    %104 = vector.broadcast %cst_106 : f32 to vector<64x128xf32>
    %c0_107 = arith.constant 0 : index
    %c0_108 = arith.constant 0 : index
    %c0_109 = arith.constant 0 : index
    %105 = vector.load %arg10[%c0_107, %c0_108, %c0_109] : memref<9x9x128xbf16, #tpu.memory_space<vmem>>, vector<8x8x128xbf16>
    %106 = vector.shape_cast %105 : vector<8x8x128xbf16> to vector<64x128xbf16>
    %c0_110 = arith.constant 0 : index
    %c1_111 = arith.constant 1 : index
    %c0_112 = arith.constant 0 : index
    %107 = vector.load %arg10[%c0_110, %c1_111, %c0_112] : memref<9x9x128xbf16, #tpu.memory_space<vmem>>, vector<8x8x128xbf16>
    %108 = vector.shape_cast %107 : vector<8x8x128xbf16> to vector<64x128xbf16>
    %c0_113 = arith.constant 0 : index
    %c0_114 = arith.constant 0 : index
    %c0_115 = arith.constant 0 : index
    %109 = vector.load %arg6[%c0_113, %c0_114, %c0_115] : memref<6x128x128xbf16, #tpu.memory_space<vmem>>, vector<1x128x128xbf16>
    %110 = vector.shape_cast %109 : vector<1x128x128xbf16> to vector<128x128xbf16>
    %cst_116 = arith.constant dense<0.000000e+00> : vector<64x128xf32>
    %111 = tpu.matmul %106, %110, %cst_116 {dimension_numbers = #tpu.dot_dimension_numbers<[1], [0], [0], [1], [0, 0, 1, 1], [], []>} : vector<64x128xbf16>, vector<128x128xbf16>, vector<64x128xf32> -> vector<64x128xf32>
    %112 = arith.addf %104, %111 : vector<64x128xf32>
    %c1_117 = arith.constant 1 : index
    %c0_118 = arith.constant 0 : index
    %c0_119 = arith.constant 0 : index
    %113 = vector.load %arg6[%c1_117, %c0_118, %c0_119] : memref<6x128x128xbf16, #tpu.memory_space<vmem>>, vector<1x128x128xbf16>
    %114 = vector.shape_cast %113 : vector<1x128x128xbf16> to vector<128x128xbf16>
    %cst_120 = arith.constant dense<0.000000e+00> : vector<64x128xf32>
    %115 = tpu.matmul %108, %114, %cst_120 {dimension_numbers = #tpu.dot_dimension_numbers<[1], [0], [0], [1], [0, 0, 1, 1], [], []>} : vector<64x128xbf16>, vector<128x128xbf16>, vector<64x128xf32> -> vector<64x128xf32>
    %116 = arith.addf %112, %115 : vector<64x128xf32>
    %c0_121 = arith.constant 0 : index
    %c0_122 = arith.constant 0 : index
    %c0_123 = arith.constant 0 : index
    %117 = vector.load %arg11[%c0_121, %c0_122, %c0_123] : memref<8x9x128xbf16, #tpu.memory_space<vmem>>, vector<8x8x128xbf16>
    %118 = vector.shape_cast %117 : vector<8x8x128xbf16> to vector<64x128xbf16>
    %c0_124 = arith.constant 0 : index
    %c1_125 = arith.constant 1 : index
    %c0_126 = arith.constant 0 : index
    %119 = vector.load %arg11[%c0_124, %c1_125, %c0_126] : memref<8x9x128xbf16, #tpu.memory_space<vmem>>, vector<8x8x128xbf16>
    %120 = vector.shape_cast %119 : vector<8x8x128xbf16> to vector<64x128xbf16>
    %c2_127 = arith.constant 2 : index
    %c0_128 = arith.constant 0 : index
    %c0_129 = arith.constant 0 : index
    %121 = vector.load %arg6[%c2_127, %c0_128, %c0_129] : memref<6x128x128xbf16, #tpu.memory_space<vmem>>, vector<1x128x128xbf16>
    %122 = vector.shape_cast %121 : vector<1x128x128xbf16> to vector<128x128xbf16>
    %cst_130 = arith.constant dense<0.000000e+00> : vector<64x128xf32>
    %123 = tpu.matmul %118, %122, %cst_130 {dimension_numbers = #tpu.dot_dimension_numbers<[1], [0], [0], [1], [0, 0, 1, 1], [], []>} : vector<64x128xbf16>, vector<128x128xbf16>, vector<64x128xf32> -> vector<64x128xf32>
    %124 = arith.addf %116, %123 : vector<64x128xf32>
    %c3_131 = arith.constant 3 : index
    %c0_132 = arith.constant 0 : index
    %c0_133 = arith.constant 0 : index
    %125 = vector.load %arg6[%c3_131, %c0_132, %c0_133] : memref<6x128x128xbf16, #tpu.memory_space<vmem>>, vector<1x128x128xbf16>
    %126 = vector.shape_cast %125 : vector<1x128x128xbf16> to vector<128x128xbf16>
    %cst_134 = arith.constant dense<0.000000e+00> : vector<64x128xf32>
    %127 = tpu.matmul %120, %126, %cst_134 {dimension_numbers = #tpu.dot_dimension_numbers<[1], [0], [0], [1], [0, 0, 1, 1], [], []>} : vector<64x128xbf16>, vector<128x128xbf16>, vector<64x128xf32> -> vector<64x128xf32>
    %128 = arith.addf %124, %127 : vector<64x128xf32>
    %c1_135 = arith.constant 1 : index
    %c0_136 = arith.constant 0 : index
    %c0_137 = arith.constant 0 : index
    %129 = vector.load %arg10[%c1_135, %c0_136, %c0_137] : memref<9x9x128xbf16, #tpu.memory_space<vmem>>, vector<8x8x128xbf16>
    %130 = vector.shape_cast %129 : vector<8x8x128xbf16> to vector<64x128xbf16>
    %c1_138 = arith.constant 1 : index
    %c1_139 = arith.constant 1 : index
    %c0_140 = arith.constant 0 : index
    %131 = vector.load %arg10[%c1_138, %c1_139, %c0_140] : memref<9x9x128xbf16, #tpu.memory_space<vmem>>, vector<8x8x128xbf16>
    %132 = vector.shape_cast %131 : vector<8x8x128xbf16> to vector<64x128xbf16>
    %c4_141 = arith.constant 4 : index
    %c0_142 = arith.constant 0 : index
    %c0_143 = arith.constant 0 : index
    %133 = vector.load %arg6[%c4_141, %c0_142, %c0_143] : memref<6x128x128xbf16, #tpu.memory_space<vmem>>, vector<1x128x128xbf16>
    %134 = vector.shape_cast %133 : vector<1x128x128xbf16> to vector<128x128xbf16>
    %cst_144 = arith.constant dense<0.000000e+00> : vector<64x128xf32>
    %135 = tpu.matmul %130, %134, %cst_144 {dimension_numbers = #tpu.dot_dimension_numbers<[1], [0], [0], [1], [0, 0, 1, 1], [], []>} : vector<64x128xbf16>, vector<128x128xbf16>, vector<64x128xf32> -> vector<64x128xf32>
    %136 = arith.addf %128, %135 : vector<64x128xf32>
    %c5_145 = arith.constant 5 : index
    %c0_146 = arith.constant 0 : index
    %c0_147 = arith.constant 0 : index
    %137 = vector.load %arg6[%c5_145, %c0_146, %c0_147] : memref<6x128x128xbf16, #tpu.memory_space<vmem>>, vector<1x128x128xbf16>
    %138 = vector.shape_cast %137 : vector<1x128x128xbf16> to vector<128x128xbf16>
    %cst_148 = arith.constant dense<0.000000e+00> : vector<64x128xf32>
    %139 = tpu.matmul %132, %138, %cst_148 {dimension_numbers = #tpu.dot_dimension_numbers<[1], [0], [0], [1], [0, 0, 1, 1], [], []>} : vector<64x128xbf16>, vector<128x128xbf16>, vector<64x128xf32> -> vector<64x128xf32>
    %140 = arith.addf %136, %139 : vector<64x128xf32>
    %c0_149 = arith.constant 0 : index
    %c0_150 = arith.constant 0 : index
    %141 = vector.load %arg7[%c0_149, %c0_150] : memref<1x128xf32, #tpu.memory_space<vmem>>, vector<1x128xf32>
    %142 = vector.broadcast %141 : vector<1x128xf32> to vector<64x128xf32>
    %143 = arith.addf %140, %142 : vector<64x128xf32>
    %cst_151 = arith.constant 0.000000e+00 : f32
    %144 = vector.broadcast %cst_151 : f32 to vector<64x128xf32>
    %145 = arith.cmpf oge, %143, %144 : vector<64x128xf32>
    %cst_152 = arith.constant 1.000000e-01 : f32
    %146 = vector.broadcast %cst_152 : f32 to vector<64x128xf32>
    %147 = arith.mulf %146, %143 : vector<64x128xf32>
    %148 = arith.select %145, %143, %147 : vector<64x128xi1>, vector<64x128xf32>
    %c0_153 = arith.constant 0 : index
    %c0_154 = arith.constant 0 : index
    %c0_155 = arith.constant 0 : index
    %149 = vector.load %arg8[%c0_153, %c0_154, %c0_155] : memref<1x64x128xf32, #tpu.memory_space<vmem>>, vector<1x64x128xf32>
    %150 = vector.shape_cast %149 : vector<1x64x128xf32> to vector<64x128xf32>
    %151 = vector.shape_cast %148 : vector<64x128xf32> to vector<1x64x128xf32>
    tpu.vector_store %arg8[%c0_153, %c0_154, %c0_155], %151 {strides = array<i32>} : memref<1x64x128xf32, #tpu.memory_space<vmem>>, vector<1x64x128xf32>,
    return
  }
  func.func @transform_0(%arg0: i32) -> (i32, i32, i32) {
    %c0_i32 = arith.constant 0 : i32
    %c0_i32_0 = arith.constant 0 : i32
    %c0_i32_1 = arith.constant 0 : i32
    return %arg0, %c0_i32, %c0_i32_0 : i32, i32, i32
  }
  func.func @transform_1(%arg0: i32) -> (i32, i32) {
    %c0_i32 = arith.constant 0 : i32
    %c0_i32_0 = arith.constant 0 : i32
    %c0_i32_1 = arith.constant 0 : i32
    return %c0_i32, %c0_i32_0 : i32, i32
  }
  func.func @transform_2(%arg0: i32) -> (i32, i32) {
    %c0_i32 = arith.constant 0 : i32
    %c0_i32_0 = arith.constant 0 : i32
    %c0_i32_1 = arith.constant 0 : i32
    return %c0_i32, %c0_i32_0 : i32, i32
  }
  func.func @transform_3(%arg0: i32) -> (i32, i32, i32) {
    %c0_i32 = arith.constant 0 : i32
    %c0_i32_0 = arith.constant 0 : i32
    %c0_i32_1 = arith.constant 0 : i32
    %c0_i32_2 = arith.constant 0 : i32
    return %c0_i32, %c0_i32_0, %c0_i32_1 : i32, i32, i32
  }
  func.func @transform_4(%arg0: i32) -> (i32, i32) {
    %c0_i32 = arith.constant 0 : i32
    %c0_i32_0 = arith.constant 0 : i32
    %c0_i32_1 = arith.constant 0 : i32
    return %c0_i32, %c0_i32_0 : i32, i32
  }
  func.func @transform_5(%arg0: i32) -> (i32, i32, i32) {
    %c0_i32 = arith.constant 0 : i32
    %c0_i32_0 = arith.constant 0 : i32
    %c0_i32_1 = arith.constant 0 : i32
    %c0_i32_2 = arith.constant 0 : i32
    return %c0_i32, %c0_i32_0, %c0_i32_1 : i32, i32, i32
  }
  func.func @transform_6(%arg0: i32) -> (i32, i32) {
    %c0_i32 = arith.constant 0 : i32
    %c0_i32_0 = arith.constant 0 : i32
    %c0_i32_1 = arith.constant 0 : i32
    return %c0_i32, %c0_i32_0 : i32, i32
  }
  func.func @transform_7(%arg0: i32) -> (i32, i32, i32) {
    %c0_i32 = arith.constant 0 : i32
    %c0_i32_0 = arith.constant 0 : i32
    %c0_i32_1 = arith.constant 0 : i32
    return %arg0, %c0_i32, %c0_i32_0 : i32, i32, i32
  }
}

</mosaic_0001>

<bundles_post_ra>
// kernel: resblock1_forward.1
= control target key start
LH: loop header
LB: loop body
LE: loop exit
PB: predicated region body
PF: predicated region fallthrough
CT: control target
= control target key end

     0   :  { %12 = vsyncpa [#allocation6], 0  ;;  %s9058_s0 = inlined_call_operand.vmem [shape: f32[2,128,128], index: 0, kind: input, shape index: {}]   ;;  %s9059_s1 = inlined_call_operand.vmem [shape: bf16[128,64], index: 1, kind: input, shape index: {}]   ;;  %s9060_s2 = inlined_call_operand.vmem [shape: f32[1,64], index: 2, kind: input, shape index: {}]   ;;  %s9061_s3 = inlined_call_operand.vmem [shape: bf16[9,64,128], index: 3, kind: input, shape index: {}]   ;;  %s9062_s4 = inlined_call_operand.vmem [shape: f32[1,128], index: 4, kind: input, shape index: {}]   ;;  %s9063_s5 = inlined_call_operand.vmem [shape: bf16[6,128,128], index: 5, kind: input, shape index: {}]   ;;  %s9064_s6 = inlined_call_operand.vmem [shape: f32[1,128], index: 6, kind: input, shape index: {}]   ;;  %s9065_s7 = inlined_call_operand.hbm [shape: f32[2,64,128], index: 7, kind: output, shape index: {}]  }
   0x1   :  { %14 = vsyncpa [#allocation6 + $0x1], 0  ;;  %s7154_s24 = smov 0   ;;  %s7156_s25 = smov 0  }
   0x2   :  { %s7158_s26 = smov 0   ;;  %s7160_s27 = smov 0  }
   0x3 LB: > { %s7175_s28 = sadd.s32 4294967295, %s7108_s27   ;;  %s5755_s29 = sadd.s32 4294967294, %s7108_s27   ;;  %s7108_s27 = sphi %s7160_s27, %s9111_s27   ;;  %s7104_s26 = sphi %s7158_s26, %s9110_s26   ;;  %s7100_s25 = sphi %s7156_s25, %s9109_s25   ;;  %s7096_s24 = sphi %s7154_s24, %s9108_s24  }
   0x4   : > { %s7179_s30 = sadd.s32 1, %s7108_s27   ;;  %s179_s8 = sadd.s32 1, %s7104_s26 }
   0x5   : > { %s176_s9 = ssub.s32 %s7108_s27, %s7179_s30  ;;  %p189_p0 = scmp.ne.s32.totalorder %s7104_s26, %s7100_s25 }
   0x6   : > { %p177_p1 = scmp.eq.s32.totalorder %s176_s9, 0  ;;  %p190_p2 = scmp.eq.s32.totalorder %s7175_s28, 1 }
   0x7   : > { %p195_p3 = scmp.ne.s32.totalorder %s7100_s25, %s7096_s24  ;;  %p196_p4 = scmp.eq.s32.totalorder %s5755_s29, 1 }
   0x8   : > { %s7190_s10 = scalar_select %p177_p1, %s7104_s26, %s179_s8  }
   0x9   : > { %p7192_p5 = por %p190_p2, %p189_p0  ;;  %p7196_p6 = por %p196_p4, %p195_p3 }
   0xa   : > { %p5758_p7 = scmp.ge.s32.totalorder %s7108_s27, 1  ;;  %p240_p8 = scmp.lt.s32.totalorder %s7108_s27, 3 }
   0xc   : > { %p241_p9 = pnand %p5758_p7, %p240_p8 }
   0xe   : > { %244 = sbr.rel (%p241_p9) target bundleno = 1031 (0x407), region = 48 }
  0x13   : > { %v6918_v0 = vld [vmem:[%s9059_s1 + $0x38] sm:$0xff]   ;;  %p272_p10 = scmp.lt.s32.totalorder %s7175_s28, 1  ;;  %v6919_v1 = vld [vmem:[%s9059_s1 + $0x30] sm:$0xff]   ;;  %v6920_v2 = vld [vmem:[%s9059_s1 + $0x28] sm:$0xff]   ;;  %vm280_vm0 = vcmask 516096   ;;  %vm278_vm5 = vcmask 519168  }
  0x14   : > { %6484 = vmatprep.subr.bf16.mxu0 %v6918_v0  ;;  %v6921_v3 = vld [vmem:[%s9059_s1 + $0x20] sm:$0xff]   ;;  %vm286_vm1 = vsmask.f32 256  ;;  %vm342_vm2 = vsmask.f32 7938  ;;  %v6922_v7 = vld [vmem:[%s9059_s1 + $0x18] sm:$0xff]  }
  0x15   : > { %s273_s17 = scalar_select %p272_p10, %s7175_s28, 1  ;;  %6485 = vmatpush3.bf16.msra.mxu0 %v6918_v0  ;;  %vm7228_vm3 = vmand %vm280_vm0, %vm286_vm1  ;;  %v297_v9 = vld [vmem:[#allocation2 + $0x18] sm:$0x1]  ;;  %v353_v12 = vld [vmem:[#allocation2 + $0x1c] sm:$0x1]  ;;  %v7110_v63 = vmov 0  }
  0x16   : > { %6486 = vmatprep.subr.bf16.mxu0 %v6919_v1  ;;  %v298_v10 = vsel %vm7228_vm3, 0, %v297_v9  ;;  %vm7236_vm4 = vmand %vm280_vm0, %vm342_vm2  ;;  %v6923_v13 = vld [vmem:[%s9059_s1 + $0x10] sm:$0xff]   ;;  %v6924_v15 = vld [vmem:[%s9059_s1 + $0x8] sm:$0xff]   ;;  %279 = vst.msk [vmem:[#allocation2] sm:$0xf] %vm278_vm5, %v7110_v63  ;;  %vm1681_vm6 = vcmask 1042432  }
  0x17   : > { %s6254_s20 = sshll.u32 %s273_s17, 7  ;;  %299 = vst [vmem:[#allocation2 + $0x18] sm:$0x1] %v298_v10  ;;  %v354_v14 = vsel %vm7236_vm4, 0, %v353_v12  ;;  %v6925_v16 = vld [vmem:[%s9059_s1] sm:$0xff]   ;;  %vm1682_vm7 = vcmask 1046532  }
  0x18   : > { %s7216_s23 = scalar_lea.vmem %s9058_s0, %s6254_s20  ;;  %355 = vst [vmem:[#allocation2 + $0x1c] sm:$0x1] %v354_v14  ;;  %v291_v38 = vld [vmem:[#allocation2 + $0x8] sm:$0x1]  ;;  %v347_v39 = vld [vmem:[#allocation2 + $0xc] sm:$0x1]  ;;  %vm7385_vm12 = vmor %vm1681_vm6, %vm1682_vm7 }
  0x19   : > { %6487 = vmatpush3.bf16.msra.mxu0 %v6919_v1  ;;  %v455_v4 = vld [vmem:[%s7216_s23] sm:$0xff]  ;;  %v456_v5 = vld [vmem:[%s7216_s23 + $0x8] sm:$0xff]  ;;  %v457_v17 = vld [vmem:[%s7216_s23 + $0x10] sm:$0xff]  ;;  %v292_v40 = vsel %vm7228_vm3, 0, %v291_v38  ;;  %v348_v41 = vsel %vm7236_vm4, 0, %v347_v39  ;;  %s269_s20 = sand.u32 1, %s7100_s25  }
  0x1a   : > { %6488 = vmatprep.subr.bf16.mxu0 %v6920_v2  ;;  %v471_v6 = vpack.c.bf16 %v456_v5, %v455_v4  ;;  %v458_v18 = vld [vmem:[%s7216_s23 + $0x18] sm:$0xff]  ;;  %v459_v19 = vld [vmem:[%s7216_s23 + $0x20] sm:$0xff]  ;;  %v460_v20 = vld [vmem:[%s7216_s23 + $0x28] sm:$0xff]  ;;  %293 = vst [vmem:[#allocation2 + $0x8] sm:$0x1] %v292_v40  ;;  %s5759_s29 = sshll.u32 %s269_s20, 6 }
  0x1b   : > { %v472_v21 = vpack.c.bf16 %v458_v18, %v457_v17  ;;  %v473_v22 = vpack.c.bf16 %v460_v20, %v459_v19  ;;  %v461_v23 = vld [vmem:[%s7216_s23 + $0x30] sm:$0xff]  ;;  %v462_v24 = vld [vmem:[%s7216_s23 + $0x38] sm:$0xff]  ;;  %v463_v25 = vld [vmem:[%s7216_s23 + $0x40] sm:$0xff]  ;;  %349 = vst [vmem:[#allocation2 + $0xc] sm:$0x1] %v348_v41  ;;  %s8991_s8 = scalar_lea.vmem [#allocation5], %s5759_s29 }
  0x1c   : > { %6500 = vmatprep.mubr.bf16.mxu0 %v471_v6  ;;  %v464_v26 = vld [vmem:[%s7216_s23 + $0x48] sm:$0xff]  ;;  %v474_v27 = vpack.c.bf16 %v462_v24, %v461_v23  ;;  %v465_v29 = vld [vmem:[%s7216_s23 + $0x50] sm:$0xff]  ;;  %v466_v30 = vld [vmem:[%s7216_s23 + $0x58] sm:$0xff]  ;;  %281 = vst.msk [vmem:[#allocation2 + $0x4] sm:$0x1] %vm280_vm0, %v7110_v63  ;;  %s6287_s9 = sshll.u32 %s7175_s28, 10 }
  0x1d   : > { %6489 = vmatpush3.bf16.msra.mxu0 %v6920_v2  ;;  %v475_v28 = vpack.c.bf16 %v464_v26, %v463_v25  ;;  %v467_v31 = vld [vmem:[%s7216_s23 + $0x60] sm:$0xff]  ;;  %v468_v32 = vld [vmem:[%s7216_s23 + $0x68] sm:$0xff]  ;;  %v476_v33 = vpack.c.bf16 %v466_v30, %v465_v29  ;;  %v469_v35 = vld [vmem:[%s7216_s23 + $0x70] sm:$0xff]  ;;  %283 = vst.msk [vmem:[#allocation2 + $0x88] sm:$0xf] %vm278_vm5, %v7110_v63  ;;  %s5693_s13 = sshll.u32 %s8991_s8, 4  ;;  %s9010_s15 = scalar_lea.hbm %s9065_s7, %s6287_s9  ;;  %s9012_s13 = int_to_ptr.vmem [resolvable:$true] %s5693_s13 }
  0x1e   : > { %6490 = vmatprep.subr.bf16.mxu0 %v6921_v3  ;;  %v477_v34 = vpack.c.bf16 %v468_v32, %v467_v31  ;;  %v470_v36 = vld [vmem:[%s7216_s23 + $0x78] sm:$0xff]  ;;  %v300_v42 = vld [vmem:[#allocation2 + $0x20] sm:$0x1]  ;;  %v356_v43 = vld [vmem:[#allocation2 + $0x24] sm:$0x1]  ;;  %s9018_s28 = scalar_lea.sflag [#allocation6], %s269_s20 }
  0x1f   : > { %v478_v37 = vpack.c.bf16 %v470_v36, %v469_v35  ;;  %v301_v44 = vsel %vm7228_vm3, 0, %v300_v42  ;;  %v357_v45 = vsel %vm7236_vm4, 0, %v356_v43  ;;  %v294_v46 = vld [vmem:[#allocation2 + $0x10] sm:$0x1]  ;;  %v350_v47 = vld [vmem:[#allocation2 + $0x14] sm:$0x1] }
  0x20   : > { %302 = vst [vmem:[#allocation2 + $0x20] sm:$0x1] %v301_v44  ;;  %358 = vst [vmem:[#allocation2 + $0x24] sm:$0x1] %v357_v45  ;;  %v295_v48 = vsel %vm7228_vm3, 0, %v294_v46  ;;  %v351_v49 = vsel %vm7236_vm4, 0, %v350_v47 }
  0x21   : > { %6491 = vmatpush3.bf16.msra.mxu0 %v6921_v3  ;;  %296 = vst [vmem:[#allocation2 + $0x10] sm:$0x1] %v295_v48  ;;  %352 = vst [vmem:[#allocation2 + $0x14] sm:$0x1] %v351_v49  ;;  %v309_v50 = vld [vmem:[#allocation2 + $0x38] sm:$0x1] }
  0x22   : > { %6492 = vmatprep.subr.bf16.mxu0 %v6922_v7  ;;  %v365_v51 = vld [vmem:[#allocation2 + $0x3c] sm:$0x1]  ;;  %v310_v52 = vsel %vm7228_vm3, 0, %v309_v50  ;;  %v303_v54 = vld [vmem:[#allocation2 + $0x28] sm:$0x1]  ;;  %v6927_v14 = vld [vmem:[%s9061_s3 + $0x50] sm:$0xff]  }
  0x23   : > { %v366_v53 = vsel %vm7236_vm4, 0, %v365_v51  ;;  %311 = vst [vmem:[#allocation2 + $0x38] sm:$0x1] %v310_v52  ;;  %v359_v55 = vld [vmem:[#allocation2 + $0x2c] sm:$0x1]  ;;  %v304_v56 = vsel %vm7228_vm3, 0, %v303_v54 }
  0x24   : > { %367 = vst [vmem:[#allocation2 + $0x3c] sm:$0x1] %v366_v53  ;;  %v360_v57 = vsel %vm7236_vm4, 0, %v359_v55  ;;  %305 = vst [vmem:[#allocation2 + $0x28] sm:$0x1] %v304_v56  ;;  %v6926_v3 = vld [vmem:[%s9061_s3 + $0x58] sm:$0xff]  }
  0x25   : > { %6493 = vmatpush3.bf16.msra.mxu0 %v6922_v7  ;;  %361 = vst [vmem:[#allocation2 + $0x2c] sm:$0x1] %v360_v57  ;;  %v312_v58 = vld [vmem:[#allocation2 + $0x40] sm:$0x1]  ;;  %v368_v60 = vld [vmem:[#allocation2 + $0x44] sm:$0x1] }
  0x26   : > { %6494 = vmatprep.subr.bf16.mxu0 %v6923_v13  ;;  %v313_v59 = vsel %vm7228_vm3, 0, %v312_v58  ;;  %v369_v61 = vsel %vm7236_vm4, 0, %v368_v60  ;;  %v306_v62 = vld [vmem:[#allocation2 + $0x30] sm:$0x1]  ;;  %284 = vst.msk [vmem:[#allocation2 + $0x8c] sm:$0x1] %vm280_vm0, %v7110_v63  ;;  %vm7407_vm0 = vmand %vm278_vm5, %vm342_vm2 }
  0x27   : > { %314 = vst [vmem:[#allocation2 + $0x40] sm:$0x1] %v313_v59  ;;  %398 = vst [vmem:[#allocation3] sm:$0xf] %v7110_v63  ;;  %v307_v0 = vsel %vm7228_vm3, 0, %v306_v62  ;;  %v6929_v26 = vld [vmem:[%s9061_s3 + $0x48] sm:$0xff]  }
  0x28   : > { %370 = vst [vmem:[#allocation2 + $0x44] sm:$0x1] %v369_v61  ;;  %v362_v1 = vld [vmem:[#allocation2 + $0x34] sm:$0x1]  ;;  %308 = vst [vmem:[#allocation2 + $0x30] sm:$0x1] %v307_v0 }
  0x29   : > { %6495 = vmatpush3.bf16.msra.mxu0 %v6923_v13  ;;  %v363_v2 = vsel %vm7236_vm4, 0, %v362_v1  ;;  %v321_v4 = vld [vmem:[#allocation2 + $0x58] sm:$0x1]  ;;  %v377_v5 = vld [vmem:[#allocation2 + $0x5c] sm:$0x1]  ;;  %v6930_v31 = vld [vmem:[%s9061_s3 + $0x30] sm:$0xff]  }
  0x2a   : > { %6496 = vmatprep.subr.bf16.mxu0 %v6924_v15  ;;  %364 = vst [vmem:[#allocation2 + $0x34] sm:$0x1] %v363_v2  ;;  %v322_v6 = vsel %vm7228_vm3, 0, %v321_v4  ;;  %v378_v7 = vsel %vm7236_vm4, 0, %v377_v5  ;;  %v315_v9 = vld [vmem:[#allocation2 + $0x48] sm:$0x1] }
  0x2b   : > { %323 = vst [vmem:[#allocation2 + $0x58] sm:$0x1] %v322_v6  ;;  %379 = vst [vmem:[#allocation2 + $0x5c] sm:$0x1] %v378_v7  ;;  %v371_v10 = vld [vmem:[#allocation2 + $0x4c] sm:$0x1] }
  0x2c   : > { %v316_v12 = vsel %vm7228_vm3, 0, %v315_v9  ;;  %v372_v13 = vsel %vm7236_vm4, 0, %v371_v10  ;;  %v324_v17 = vld [vmem:[#allocation2 + $0x60] sm:$0x1]  ;;  %v380_v18 = vld [vmem:[#allocation2 + $0x64] sm:$0x1] }
  0x2d   : > { %6497 = vmatpush3.bf16.msra.mxu0 %v6924_v15  ;;  %317 = vst [vmem:[#allocation2 + $0x48] sm:$0x1] %v316_v12  ;;  %373 = vst [vmem:[#allocation2 + $0x4c] sm:$0x1] %v372_v13  ;;  %v6928_v15 = vld [vmem:[%s9061_s3 + $0x38] sm:$0xff]   ;;  %v325_v19 = vsel %vm7228_vm3, 0, %v324_v17 }
  0x2e   : > { %6498 = vmatprep.subr.bf16.mxu0 %v6925_v16  ;;  %v381_v20 = vsel %vm7236_vm4, 0, %v380_v18  ;;  %6516 = vmatprep.subr.bf16.mxu1 %v6928_v15  ;;  %326 = vst [vmem:[#allocation2 + $0x60] sm:$0x1] %v325_v19  ;;  %v374_v23 = vld [vmem:[#allocation2 + $0x54] sm:$0x1]  ;;  %v6931_v36 = vld [vmem:[%s9061_s3 + $0x40] sm:$0xff]  }
  0x2f   : > { %382 = vst [vmem:[#allocation2 + $0x64] sm:$0x1] %v381_v20  ;;  %6517 = vmatpush3.bf16.msra.mxu1 %v6928_v15  ;;  %v375_v25 = vsel %vm7236_vm4, 0, %v374_v23  ;;  %v327_v32 = vld [vmem:[#allocation2 + $0x68] sm:$0x1]  ;;  %v6933_v48 = vld [vmem:[%s9061_s3 + $0x20] sm:$0xff]  }
  0x30   : > { %376 = vst [vmem:[#allocation2 + $0x54] sm:$0x1] %v375_v25  ;;  %6518 = vmatprep.subr.bf16.mxu1 %v6930_v31  ;;  %v392_v38 = vld [vmem:[#allocation2 + $0x84] sm:$0x1]  ;;  %v288_v41 = vld [vmem:[#allocation2] sm:$0x1] }
  0x31   : > { %6499 = vmatpush3.bf16.msra.mxu0 %v6925_v16  ;;  %v344_v16 = vld [vmem:[#allocation2 + $0x4] sm:$0x1]  ;;  %v393_v40 = vsel %vm7236_vm4, 0, %v392_v38  ;;  %v289_v42 = vsel %vm7228_vm3, 0, %v288_v41  ;;  %v330_v43 = vld [vmem:[#allocation2 + $0x70] sm:$0x1] }
  0x32   : > { %6564 = vmatprep.subr.bf16.mxu0 %v6926_v3  ;;  %394 = vst [vmem:[#allocation2 + $0x84] sm:$0x1] %v393_v40  ;;  %290 = vst [vmem:[#allocation2] sm:$0x1] %v289_v42  ;;  %v386_v44 = vld [vmem:[#allocation2 + $0x74] sm:$0x1] }
  0x33   : > { %6519 = vmatpush3.bf16.msra.mxu1 %v6930_v31  ;;  %v331_v45 = vsel %vm7228_vm3, 0, %v330_v43  ;;  %v387_v46 = vsel %vm7236_vm4, 0, %v386_v44  ;;  %v6932_v47 = vld [vmem:[%s9061_s3 + $0x28] sm:$0xff]   ;;  %v7360_v49 = vld [vmem:[%s9061_s3 + $0x18] sm:$0xff]   ;;  %v7372_v56 = vld [vmem:[%s9060_s2] ss:$0 sm:$0xff] }
  0x34   : > { %6501 = vmatmul.mubr.bf16.vlgmr.msra.gmra.mxu0 %v472_v21  ;;  %v345_v21 = vsel %vm7236_vm4, 0, %v344_v16  ;;  %332 = vst [vmem:[#allocation2 + $0x70] sm:$0x1] %v331_v45  ;;  %388 = vst [vmem:[#allocation2 + $0x74] sm:$0x1] %v387_v46  ;;  %6520 = vmatprep.subr.bf16.mxu1 %v6932_v47  ;;  %v7366_v50 = vld [vmem:[%s9061_s3 + $0x98] sm:$0xff]  }
  0x35   : > { %6504 = vmatprep.mubr.bf16.mxu0 %v473_v22  ;;  %6565 = vmatpush3.bf16.msra.mxu0 %v6926_v3  ;;  %v318_v22 = vld [vmem:[#allocation2 + $0x50] sm:$0x1]  ;;  %346 = vst [vmem:[#allocation2 + $0x4] sm:$0x1] %v345_v21  ;;  %v1633_v58 = vld [vmem:[#allocation2] sm:$0xe] }
  0x36   : > { %6566 = vmatprep.subr.bf16.mxu0 %v6927_v14  ;;  %v319_v24 = vsel %vm7228_vm3, 0, %v318_v22  ;;  %v339_v63 = vld [vmem:[#allocation2 + $0x88] sm:$0x1]  ;;  %v5835_v1 = vrot.slane %v1633_v58, 9  ;;  %vm1042_vm9 = vsmask.f32 3328 }
  0x37   : > { %320 = vst [vmem:[#allocation2 + $0x50] sm:$0x1] %v319_v24  ;;  %6521 = vmatpush3.bf16.msra.mxu1 %v6932_v47  ;;  %v340_v3 = vsel %vm7228_vm3, 0, %v339_v63  ;;  %vm1043_vm10 = vsmask.f32 7440  ;;  %s7048_s16 = scalar_lea.vmem %s9012_s13, 1024 }
  0x38   : > { %6522 = vmatprep.subr.bf16.mxu1 %v6933_v48  ;;  %341 = vst [vmem:[#allocation2 + $0x88] sm:$0x1] %v340_v3  ;;  %vm7396_vm14 = vmor %vm1042_vm9, %vm1043_vm10  ;;  %v906_v46 = vld [vmem:[#allocation2 + $0x8] sm:$0xf]  ;;  %v909_v47 = vld [vmem:[#allocation2 + $0xc] sm:$0x1]  ;;  %p7049_p11 = scmp.ne.s32.totalorder %s9012_s13, %s7048_s16 }
  0x39   : > { %6567 = vmatpush3.bf16.msra.mxu0 %v6927_v14  ;;  %v1002_v51 = vld [vmem:[#allocation2] sm:$0xf]  ;;  %s7111_s17 = smov [#allocation5]  }
  0x3a   : > { %6568 = vmatprep.subr.bf16.mxu0 %v6929_v26  ;;  %v1046_v52 = vshrl.u32 %v1002_v51, 16  ;;  %v1049_v53 = vshll.u32 %v1002_v51, 16  ;;  %p7050_p12 = pnand %p7049_p11, %p7192_p5  ;;  %s7052_s18 = sshll.u32 %s7111_s17, 4  ;;  %s7053_s18 = int_to_ptr.vmem [resolvable:$false] %s7052_s18 }
  0x3b   : > { %6523 = vmatpush3.bf16.msra.mxu1 %v6933_v48  ;;  %s7054_s19 = scalar_lea.vmem %s7053_s18, 2048  ;;  %p7055_p0 = scmp.lt.s32.totalorder %s9012_s13, %s7053_s18 }
  0x3c   : > { %6505 = vmatmul.mubr.bf16.gmra.mxu0 %v474_v27  ;;  %v333_v27 = vld [vmem:[#allocation2 + $0x78] sm:$0x1]  ;;  %6540 = vmatprep.subr.bf16.mxu1 %v7360_v49  ;;  %v1048_v54 = vrot.slane %v1046_v52, 4  ;;  %v1051_v55 = vrot.slane %v1049_v53, 5  ;;  %v1026_v57 = vld [vmem:[#allocation2 + $0x4] sm:$0x1]  ;;  %p7051_p13 = pneg %p7050_p12  ;;  %p7056_p1 = scmp.lt.s32.totalorder %s7054_s19, %s7048_s16 }
  0x3d   : > { %6508 = vmatprep.mubr.bf16.mxu0 %v475_v28  ;;  %v389_v28 = vld [vmem:[#allocation2 + $0x7c] sm:$0x1]  ;;  %v334_v29 = vsel %vm7228_vm3, 0, %v333_v27  ;;  %6569 = vmatpush3.bf16.msra.mxu0 %v6929_v26  ;;  %v1055_v61 = vshll.u32 %v1026_v57, 16  ;;  %v1686_v2 = vrot.slane %v1026_v57, 5 }
  0x3e   : > { %v390_v30 = vsel %vm7236_vm4, 0, %v389_v28  ;;  %335 = vst [vmem:[#allocation2 + $0x78] sm:$0x1] %v334_v29  ;;  %6570 = vmatprep.subr.bf16.mxu0 %v6931_v36  ;;  %v1052_v60 = vor.u32 %v1051_v55, %v1048_v54  ;;  %v918_v27 = vld [vmem:[#allocation2 + $0x18] sm:$0xf]  ;;  %p7057_p2 = por %p7056_p1, %p7055_p0 }
  0x3f   : > { %391 = vst [vmem:[#allocation2 + $0x7c] sm:$0x1] %v390_v30  ;;  %v7380_v9 = vrot.slane %v1055_v61, 5  ;;  %v7391_v17 = vsel %vm7385_vm12, %v5835_v1, %v1686_v2  ;;  %v924_v1 = vld [vmem:[#allocation2 + $0x20] sm:$0xf] }
  0x40   : > { %v7378_v7 = vrot.slane %v1052_v60, 4  ;;  %v927_v2 = vld [vmem:[#allocation2 + $0x24] sm:$0x1]  ;;  %p7058_p3 = pnand %p7057_p2, %p7051_p13 }
  0x41   : > { %6571 = vmatpush3.bf16.msra.mxu0 %v6931_v36 }
  0x42   : > { %6612 = vmatprep.subr.bf16.mxu0 %v7366_v50  ;;  %v1058_v26 = vsel %vm7396_vm14, %v7378_v7, %v7380_v9 }
  0x44   : > { %6509 = vmatmul.mubr.bf16.gmra.mxu0 %v476_v33  ;;  %v383_v33 = vld [vmem:[#allocation2 + $0x6c] sm:$0x1] }
  0x45   : > { %6512 = vmatprep.mubr.bf16.mxu0 %v477_v34  ;;  %v328_v34 = vsel %vm7228_vm3, 0, %v327_v32  ;;  %v384_v35 = vsel %vm7236_vm4, 0, %v383_v33 }
  0x46   : > { %329 = vst [vmem:[#allocation2 + $0x68] sm:$0x1] %v328_v34  ;;  %385 = vst [vmem:[#allocation2 + $0x6c] sm:$0x1] %v384_v35 }
  0x4c   : > { %6513 = vmatmul.mubr.bf16.gmra.mxu0 %v478_v37  ;;  %v336_v37 = vld [vmem:[#allocation2 + $0x80] sm:$0x1] }
  0x4d   : > { %v337_v39 = vsel %vm7228_vm3, 0, %v336_v37  ;;  %v921_v37 = vld [vmem:[#allocation2 + $0x1c] sm:$0x1] }
  0x4e   : > { %338 = vst [vmem:[#allocation2 + $0x80] sm:$0x1] %v337_v39 }
  0xf4   : > { %v6502_v59 = vpop.f32.mrf.mxu0 }
  0xf5   : > { %v593_v62 = vadd.f32 %v6502_v59, %v7372_v56 }
  0xf6   : > { %v584_v0 = vpop.f32.mrf.mxu0 }
  0xf7   : > { %vm649_vm8 = vcmp.ge.f32.partialorder %v593_v62, 0.0  ;;  %v665_v4 = vmul.f32 0.1, %v593_v62  ;;  %v585_v5 = vadd.f32 %v7372_v56, %v584_v0 }
  0xf8   : > { %v6503_v6 = vpop.f32.mrf.mxu0 }
  0xf9   : > { %v681_v10 = vsel %vm649_vm8, %v593_v62, %v665_v4  ;;  %vm647_vm11 = vcmp.ge.f32.partialorder %v585_v5, 0.0  ;;  %v663_v12 = vmul.f32 0.1, %v585_v5  ;;  %v596_v13 = vadd.f32 %v6503_v6, %v7372_v56 }
  0xfa   : > { %v6257_v15 = vpack.c.bf16 %v681_v10, %v681_v10  ;;  %v587_v16 = vpop.f32.mrf.mxu0 }
  0xfb   : > { %v679_v18 = vsel %vm647_vm11, %v585_v5, %v663_v12  ;;  %vm650_vm13 = vcmp.ge.f32.partialorder %v596_v13, 0.0  ;;  %v666_v19 = vmul.f32 0.1, %v596_v13  ;;  %v588_v20 = vadd.f32 %v7372_v56, %v587_v16  ;;  %v915_v16 = vld [vmem:[#allocation2 + $0x14] sm:$0x1] }
  0xfc   : > { %v760_v22 = vshrl.u32 %v6257_v15, 16  ;;  %v763_v23 = vshll.u32 %v6257_v15, 16  ;;  %v6255_v24 = vpack.c.bf16 %v679_v18, %v679_v18  ;;  %v6506_v25 = vpop.f32.mrf.mxu0 }
  0xfd   : > { %v682_v28 = vsel %vm650_vm13, %v596_v13, %v666_v19  ;;  %vm648_vm15 = vcmp.ge.f32.partialorder %v588_v20, 0.0  ;;  %v664_v29 = vmul.f32 0.1, %v588_v20  ;;  %v609_v30 = vadd.f32 %v6506_v25, %v7372_v56  ;;  %v912_v13 = vld [vmem:[#allocation2 + $0x10] sm:$0xf] }
  0xfe   : > { %v762_v31 = vrot.slane %v760_v22, 7  ;;  %v744_v32 = vshrl.u32 %v6255_v24, 16  ;;  %v747_v33 = vshll.u32 %v6255_v24, 16  ;;  %v6258_v34 = vpack.c.bf16 %v682_v28, %v682_v28  ;;  %v600_v35 = vpop.f32.mrf.mxu0 }
  0xff   : > { %v680_v38 = vsel %vm648_vm15, %v588_v20, %v664_v29  ;;  %vm653_vm6 = vcmp.ge.f32.partialorder %v609_v30, 0.0  ;;  %v669_v39 = vmul.f32 0.1, %v609_v30  ;;  %v601_v40 = vadd.f32 %v7372_v56, %v600_v35  ;;  %v942_v35 = vld [vmem:[#allocation2 + $0x38] sm:$0xf] }
 0x100   : > { %v765_v41 = vor.u32 %v763_v23, %v762_v31  ;;  %v766_v42 = vrot.slane %v762_v31, 4  ;;  %v746_v43 = vrot.slane %v744_v32, 7  ;;  %v768_v44 = vshrl.u32 %v6258_v34, 16  ;;  %v6507_v45 = vpop.f32.mrf.mxu0 }
 0x101   : > { %v771_v48 = vshll.u32 %v6258_v34, 16  ;;  %v6256_v51 = vpack.c.bf16 %v680_v38, %v680_v38  ;;  %v685_v52 = vsel %vm653_vm6, %v609_v30, %v669_v39  ;;  %vm651_vm5 = vcmp.ge.f32.partialorder %v601_v40, 0.0 }
 0x102   : > { %v919_v53 = vsel %vm7407_vm0, %v765_v41, %v918_v27  ;;  %v922_v54 = vsel %vm7228_vm3, %v766_v42, %v921_v37  ;;  %v749_v55 = vor.u32 %v747_v33, %v746_v43  ;;  %v750_v57 = vrot.slane %v746_v43, 4  ;;  %v603_v58 = vpop.f32.mrf.mxu0  ;;  %v945_v37 = vld [vmem:[#allocation2 + $0x3c] sm:$0x1] }
 0x103   : > { %920 = vst [vmem:[#allocation2 + $0x18] sm:$0xf] %v919_v53  ;;  %923 = vst [vmem:[#allocation2 + $0x1c] sm:$0x1] %v922_v54  ;;  %v770_v59 = vrot.slane %v768_v44, 7  ;;  %v752_v60 = vshrl.u32 %v6256_v51, 16  ;;  %v6261_v62 = vpack.c.bf16 %v685_v52, %v685_v52  ;;  %v612_v4 = vadd.f32 %v6507_v45, %v7372_v56 }
 0x104   : > { %v755_v61 = vshll.u32 %v6256_v51, 16  ;;  %v907_v63 = vsel %vm7407_vm0, %v749_v55, %v906_v46  ;;  %v910_v0 = vsel %vm7228_vm3, %v750_v57, %v909_v47  ;;  %v667_v3 = vmul.f32 0.1, %v601_v40  ;;  %v6510_v5 = vpop.f32.mrf.mxu0  ;;  %v930_v53 = vld [vmem:[#allocation2 + $0x28] sm:$0xf] }
 0x105   : > { %908 = vst [vmem:[#allocation2 + $0x8] sm:$0xf] %v907_v63  ;;  %911 = vst [vmem:[#allocation2 + $0xc] sm:$0x1] %v910_v0  ;;  %v773_v6 = vor.u32 %v771_v48, %v770_v59  ;;  %v774_v10 = vrot.slane %v770_v59, 4  ;;  %v754_v12 = vrot.slane %v752_v60, 7  ;;  %v604_v31 = vadd.f32 %v7372_v56, %v603_v58 }
 0x106   : > { %v792_v15 = vshrl.u32 %v6261_v62, 16  ;;  %v795_v18 = vshll.u32 %v6261_v62, 16  ;;  %v683_v19 = vsel %vm651_vm5, %v601_v40, %v667_v3  ;;  %vm654_vm7 = vcmp.ge.f32.partialorder %v612_v4, 0.0  ;;  %v616_v22 = vpop.f32.mrf.mxu0  ;;  %v933_v54 = vld [vmem:[#allocation2 + $0x2c] sm:$0x1] }
 0x107   : > { %v670_v20 = vmul.f32 0.1, %v612_v4  ;;  %v925_v23 = vsel %vm7407_vm0, %v773_v6, %v924_v1  ;;  %v928_v24 = vsel %vm7228_vm3, %v774_v10, %v927_v2  ;;  %v757_v25 = vor.u32 %v755_v61, %v754_v12  ;;  %v948_v62 = vld [vmem:[#allocation2 + $0x40] sm:$0xf]  ;;  %v951_v63 = vld [vmem:[#allocation2 + $0x44] sm:$0x1] }
 0x108   : > { %v758_v27 = vrot.slane %v754_v12, 4  ;;  %926 = vst [vmem:[#allocation2 + $0x20] sm:$0xf] %v925_v23  ;;  %929 = vst [vmem:[#allocation2 + $0x24] sm:$0x1] %v928_v24  ;;  %v794_v28 = vrot.slane %v792_v15, 7  ;;  %v6259_v29 = vpack.c.bf16 %v683_v19, %v683_v19  ;;  %v6511_v32 = vpop.f32.mrf.mxu0  ;;  %v625_v39 = vadd.f32 %v6510_v5, %v7372_v56 }
 0x109   : > { %v686_v30 = vsel %vm654_vm7, %v612_v4, %v670_v20  ;;  %v913_v33 = vsel %vm7407_vm0, %v757_v25, %v912_v13  ;;  %vm652_vm8 = vcmp.ge.f32.partialorder %v604_v31, 0.0  ;;  %v668_v46 = vmul.f32 0.1, %v604_v31  ;;  %v936_v24 = vld [vmem:[#allocation2 + $0x30] sm:$0xf] }
 0x10a   : > { %v916_v34 = vsel %vm7228_vm3, %v758_v27, %v915_v16  ;;  %v6262_v38 = vpack.c.bf16 %v686_v30, %v686_v30  ;;  %914 = vst [vmem:[#allocation2 + $0x10] sm:$0xf] %v913_v33  ;;  %v797_v40 = vor.u32 %v795_v18, %v794_v28  ;;  %v798_v41 = vrot.slane %v794_v28, 4  ;;  %v619_v47 = vpop.f32.mrf.mxu0  ;;  %v939_v25 = vld [vmem:[#allocation2 + $0x34] sm:$0x1] }
 0x10b   : > { %917 = vst [vmem:[#allocation2 + $0x14] sm:$0x1] %v916_v34  ;;  %v776_v42 = vshrl.u32 %v6259_v29, 16  ;;  %v779_v43 = vshll.u32 %v6259_v29, 16  ;;  %vm657_vm9 = vcmp.ge.f32.partialorder %v625_v39, 0.0  ;;  %v684_v57 = vsel %vm652_vm8, %v604_v31, %v668_v46 }
 0x10c   : > { %v800_v44 = vshrl.u32 %v6262_v38, 16  ;;  %v803_v45 = vshll.u32 %v6262_v38, 16  ;;  %v943_v48 = vsel %vm7407_vm0, %v797_v40, %v942_v35  ;;  %v946_v51 = vsel %vm7228_vm3, %v798_v41, %v945_v37  ;;  %v6514_v5 = vpop.f32.mrf.mxu0 }
 0x10d   : > { %v778_v52 = vrot.slane %v776_v42, 7  ;;  %944 = vst [vmem:[#allocation2 + $0x38] sm:$0xf] %v943_v48  ;;  %947 = vst [vmem:[#allocation2 + $0x3c] sm:$0x1] %v946_v51  ;;  %v617_v59 = vadd.f32 %v7372_v56, %v616_v22  ;;  %v6260_v0 = vpack.c.bf16 %v684_v57, %v684_v57  ;;  %v628_v1 = vadd.f32 %v6511_v32, %v7372_v56 }
 0x10e   : > { %v802_v55 = vrot.slane %v800_v44, 7  ;;  %v673_v58 = vmul.f32 0.1, %v625_v39  ;;  %v620_v23 = vadd.f32 %v7372_v56, %v619_v47  ;;  %v641_v30 = vadd.f32 %v6514_v5, %v7372_v56  ;;  %v632_v31 = vpop.f32.mrf.mxu0  ;;  %v966_v42 = vld [vmem:[#allocation2 + $0x58] sm:$0xf] }
 0x10f   : > { %v781_v60 = vor.u32 %v779_v43, %v778_v52  ;;  %v782_v61 = vrot.slane %v778_v52, 4  ;;  %vm655_vm10 = vcmp.ge.f32.partialorder %v617_v59, 0.0  ;;  %v784_v12 = vshrl.u32 %v6260_v0, 16  ;;  %v969_v43 = vld [vmem:[#allocation2 + $0x5c] sm:$0x1] }
 0x110   : > { %v805_v2 = vor.u32 %v803_v45, %v802_v55  ;;  %v806_v3 = vrot.slane %v802_v55, 4  ;;  %v689_v4 = vsel %vm657_vm9, %v625_v39, %v673_v58  ;;  %v787_v13 = vshll.u32 %v6260_v0, 16  ;;  %v6515_v52 = vpop.f32.mrf.mxu0 }
 0x111   : > { %v931_v6 = vsel %vm7407_vm0, %v781_v60, %v930_v53  ;;  %v934_v10 = vsel %vm7228_vm3, %v782_v61, %v933_v54  ;;  %v6265_v18 = vpack.c.bf16 %v689_v4, %v689_v4  ;;  %v671_v19 = vmul.f32 0.1, %v617_v59  ;;  %v957_v60 = vld [vmem:[#allocation2 + $0x4c] sm:$0x1] }
 0x112   : > { %932 = vst [vmem:[#allocation2 + $0x28] sm:$0xf] %v931_v6  ;;  %935 = vst [vmem:[#allocation2 + $0x2c] sm:$0x1] %v934_v10  ;;  %v949_v15 = vsel %vm7407_vm0, %v805_v2, %v948_v62  ;;  %v952_v16 = vsel %vm7228_vm3, %v806_v3, %v951_v63  ;;  %v786_v20 = vrot.slane %v784_v12, 7  ;;  %vm658_vm11 = vcmp.ge.f32.partialorder %v628_v1, 0.0 }
 0x113   : > { %950 = vst [vmem:[#allocation2 + $0x40] sm:$0xf] %v949_v15  ;;  %953 = vst [vmem:[#allocation2 + $0x44] sm:$0x1] %v952_v16  ;;  %v674_v22 = vmul.f32 0.1, %v628_v1  ;;  %v687_v29 = vsel %vm655_vm10, %v617_v59, %v671_v19  ;;  %v633_v4 = vadd.f32 %v7372_v56, %v632_v31 }
 0x114   : > { %v824_v27 = vshrl.u32 %v6265_v18, 16  ;;  %v827_v28 = vshll.u32 %v6265_v18, 16  ;;  %v789_v32 = vor.u32 %v787_v13, %v786_v20  ;;  %v790_v33 = vrot.slane %v786_v20, 4  ;;  %v954_v59 = vld [vmem:[#allocation2 + $0x48] sm:$0xf]  ;;  %v635_v13 = vpop.f32.mrf.mxu0 }
 0x115   : > { %v6263_v34 = vpack.c.bf16 %v687_v29, %v687_v29  ;;  %v690_v35 = vsel %vm658_vm11, %v628_v1, %v674_v22  ;;  %vm656_vm13 = vcmp.ge.f32.partialorder %v620_v23, 0.0  ;;  %v672_v39 = vmul.f32 0.1, %v620_v23  ;;  %v972_v1 = vld [vmem:[#allocation2 + $0x60] sm:$0xf] }
 0x116   : > { %v826_v37 = vrot.slane %v824_v27, 7  ;;  %v6266_v38 = vpack.c.bf16 %v690_v35, %v690_v35  ;;  %v937_v40 = vsel %vm7407_vm0, %v789_v32, %v936_v24  ;;  %v940_v41 = vsel %vm7228_vm3, %v790_v33, %v939_v25  ;;  %v975_v2 = vld [vmem:[#allocation2 + $0x64] sm:$0x1]  ;;  %v1634_v19 = vld [vmem:[#allocation2 + $0x8] sm:$0xe] }
 0x117   : > { %v808_v44 = vshrl.u32 %v6263_v34, 16  ;;  %v811_v45 = vshll.u32 %v6263_v34, 16  ;;  %938 = vst [vmem:[#allocation2 + $0x30] sm:$0xf] %v937_v40  ;;  %941 = vst [vmem:[#allocation2 + $0x34] sm:$0x1] %v940_v41  ;;  %v688_v54 = vsel %vm656_vm13, %v620_v23, %v672_v39  ;;  %v636_v31 = vadd.f32 %v7372_v56, %v635_v13 }
 0x118   : > { %v829_v46 = vor.u32 %v827_v28, %v826_v37  ;;  %v830_v47 = vrot.slane %v826_v37, 4  ;;  %v832_v48 = vshrl.u32 %v6266_v38, 16  ;;  %v835_v51 = vshll.u32 %v6266_v38, 16  ;;  %v960_v25 = vld [vmem:[#allocation2 + $0x50] sm:$0xf] }
 0x119   : > { %v810_v53 = vrot.slane %v808_v44, 7  ;;  %vm661_vm15 = vcmp.ge.f32.partialorder %v641_v30, 0.0  ;;  %v677_v55 = vmul.f32 0.1, %v641_v30  ;;  %v6264_v62 = vpack.c.bf16 %v688_v54, %v688_v54  ;;  %v963_v27 = vld [vmem:[#allocation2 + $0x54] sm:$0x1] }
 0x11a   : > { %v967_v57 = vsel %vm7407_vm0, %v829_v46, %v966_v42  ;;  %v970_v58 = vsel %vm7228_vm3, %v830_v47, %v969_v43  ;;  %v834_v61 = vrot.slane %v832_v48, 7  ;;  %vm659_vm6 = vcmp.ge.f32.partialorder %v633_v4, 0.0  ;;  %v990_v34 = vld [vmem:[#allocation2 + $0x78] sm:$0xf]  ;;  %v993_v35 = vld [vmem:[#allocation2 + $0x7c] sm:$0x1] }
 0x11b   : > { %968 = vst [vmem:[#allocation2 + $0x58] sm:$0xf] %v967_v57  ;;  %971 = vst [vmem:[#allocation2 + $0x5c] sm:$0x1] %v970_v58  ;;  %v813_v63 = vor.u32 %v811_v45, %v810_v53  ;;  %v814_v0 = vrot.slane %v810_v53, 4  ;;  %v693_v3 = vsel %vm661_vm15, %v641_v30, %v677_v55  ;;  %v816_v10 = vshrl.u32 %v6264_v62, 16 }
 0x11c   : > { %v837_v5 = vor.u32 %v835_v51, %v834_v61  ;;  %v838_v6 = vrot.slane %v834_v61, 4  ;;  %v819_v12 = vshll.u32 %v6264_v62, 16  ;;  %v6269_v18 = vpack.c.bf16 %v693_v3, %v693_v3  ;;  %v7471_v38 = vld [vmem:[#allocation2 + $0xc] sm:$0x1]  ;;  %v1635_v43 = vld [vmem:[#allocation2 + $0x10] sm:$0xe] }
 0x11d   : > { %v955_v15 = vsel %vm7407_vm0, %v813_v63, %v954_v59  ;;  %v958_v16 = vsel %vm7228_vm3, %v814_v0, %v957_v60  ;;  %v818_v23 = vrot.slane %v816_v10, 7  ;;  %v675_v24 = vmul.f32 0.1, %v633_v4  ;;  %v1636_v46 = vld [vmem:[#allocation2 + $0x18] sm:$0xe] }
 0x11e   : > { %956 = vst [vmem:[#allocation2 + $0x48] sm:$0xf] %v955_v15  ;;  %959 = vst [vmem:[#allocation2 + $0x4c] sm:$0x1] %v958_v16  ;;  %v973_v20 = vsel %vm7407_vm0, %v837_v5, %v972_v1  ;;  %v976_v22 = vsel %vm7228_vm3, %v838_v6, %v975_v2  ;;  %v856_v28 = vshrl.u32 %v6269_v18, 16  ;;  %v859_v29 = vshll.u32 %v6269_v18, 16 }
 0x11f   : > { %974 = vst [vmem:[#allocation2 + $0x60] sm:$0xf] %v973_v20  ;;  %977 = vst [vmem:[#allocation2 + $0x64] sm:$0x1] %v976_v22  ;;  %v644_v30 = vadd.f32 %v6515_v52, %v7372_v56  ;;  %vm1326_vm5 = vcmask 523264   ;;  %v821_v32 = vor.u32 %v819_v12, %v818_v23  ;;  %v822_v33 = vrot.slane %v818_v23, 4 }
 0x120   : > { %v691_v37 = vsel %vm659_vm6, %v633_v4, %v675_v24  ;;  %v5836_v39 = vrot.slane %v1634_v19, 9  ;;  %v858_v40 = vrot.slane %v856_v28, 7  ;;  %vm660_vm8 = vcmp.ge.f32.partialorder %v636_v31, 0.0  ;;  %v7477_v53 = vld [vmem:[#allocation2 + $0x14] sm:$0x1] }
 0x121   : > { %v6267_v41 = vpack.c.bf16 %v691_v37, %v691_v37  ;;  %vm662_vm7 = vcmp.ge.f32.partialorder %v644_v30, 0.0  ;;  %v678_v42 = vmul.f32 0.1, %v644_v30  ;;  %v961_v44 = vsel %vm7407_vm0, %v821_v32, %v960_v25  ;;  %v978_v62 = vld [vmem:[#allocation2 + $0x68] sm:$0xf] }
 0x122   : > { %v964_v56 = vsel %vm7228_vm3, %v822_v33, %v963_v27  ;;  %v676_v45 = vmul.f32 0.1, %v636_v31  ;;  %962 = vst [vmem:[#allocation2 + $0x50] sm:$0xf] %v961_v44  ;;  %v861_v47 = vor.u32 %v859_v29, %v858_v40  ;;  %v862_v48 = vrot.slane %v858_v40, 4 }
 0x123   : > { %965 = vst [vmem:[#allocation2 + $0x54] sm:$0x1] %v964_v56  ;;  %v840_v51 = vshrl.u32 %v6267_v41, 16  ;;  %v843_v52 = vshll.u32 %v6267_v41, 16  ;;  %v694_v54 = vsel %vm662_vm7, %v644_v30, %v678_v42  ;;  %v1690_v57 = vrot.slane %v7471_v38, 5 }
 0x124   : > { %v692_v55 = vsel %vm660_vm8, %v636_v31, %v676_v45  ;;  %v5837_v58 = vrot.slane %v1635_v43, 9  ;;  %v991_v59 = vsel %vm7407_vm0, %v861_v47, %v990_v34  ;;  %v994_v60 = vsel %vm7228_vm3, %v862_v48, %v993_v35  ;;  %v981_v0 = vld [vmem:[#allocation2 + $0x6c] sm:$0x1]  ;;  %v7486_v3 = vld [vmem:[#allocation2 + $0x1c] sm:$0x1]  ;;  %v6937_v35 = vld [vmem:[%s9061_s3 + $0x90] sm:$0xff]  }
 0x125   : > { %v842_v61 = vrot.slane %v840_v51, 7  ;;  %v6270_v63 = vpack.c.bf16 %v694_v54, %v694_v54  ;;  %992 = vst [vmem:[#allocation2 + $0x78] sm:$0xf] %v991_v59  ;;  %995 = vst [vmem:[#allocation2 + $0x7c] sm:$0x1] %v994_v60  ;;  %v6268_v1 = vpack.c.bf16 %v692_v55, %v692_v55  ;;  %v1691_v2 = vsel %vm7385_vm12, %v5836_v39, %v1690_v57 }
 0x126   : > { %v1694_v4 = vrot.slane %v7477_v53, 5  ;;  %v5838_v5 = vrot.slane %v1636_v46, 9  ;;  %v7489_v15 = vld [vmem:[#allocation2 + $0x8] sm:$0xf]  ;;  %v996_v16 = vld [vmem:[#allocation2 + $0x80] sm:$0xf]  ;;  %v5859_v22 = vcombine.low %v7391_v17, %v1691_v2 }
 0x127   : > { %v845_v6 = vor.u32 %v843_v52, %v842_v61  ;;  %v846_v10 = vrot.slane %v842_v61, 4  ;;  %v864_v12 = vshrl.u32 %v6270_v63, 16  ;;  %v867_v13 = vshll.u32 %v6270_v63, 16  ;;  %v999_v18 = vld [vmem:[#allocation2 + $0x84] sm:$0x1] }
 0x128   : > { %v848_v19 = vshrl.u32 %v6268_v1, 16  ;;  %v851_v20 = vshll.u32 %v6268_v1, 16  ;;  %v1695_v23 = vsel %vm7385_vm12, %v5837_v58, %v1694_v4  ;;  %v1637_v24 = vld [vmem:[#allocation2 + $0x20] sm:$0xe]  ;;  %v984_v29 = vld [vmem:[#allocation2 + $0x70] sm:$0xf]  ;;  %6572 = vmatprep.mubr.msk.bf16.mxu0 %vm1326_vm5, %v5859_v22 }
 0x129   : > { %v979_v25 = vsel %vm7407_vm0, %v845_v6, %v978_v62  ;;  %v982_v27 = vsel %vm7228_vm3, %v846_v10, %v981_v0  ;;  %v866_v28 = vrot.slane %v864_v12, 7  ;;  %v987_v30 = vld [vmem:[#allocation2 + $0x74] sm:$0x1]  ;;  %v1698_v31 = vrot.slane %v7486_v3, 5  ;;  %v7508_v41 = vld [vmem:[#allocation2 + $0x24] sm:$0x1] }
 0x12a   : > { %980 = vst [vmem:[#allocation2 + $0x68] sm:$0xf] %v979_v25  ;;  %983 = vst [vmem:[#allocation2 + $0x6c] sm:$0x1] %v982_v27  ;;  %v850_v32 = vrot.slane %v848_v19, 7  ;;  %v1060_v17 = vshrl.u32 %v7489_v15, 16 }
 0x12b   : > { %v1063_v33 = vshll.u32 %v7489_v15, 16  ;;  %v1069_v34 = vshll.u32 %v7471_v38, 16  ;;  %v869_v37 = vor.u32 %v867_v13, %v866_v28  ;;  %v870_v39 = vrot.slane %v866_v28, 4  ;;  %v1638_v42 = vld [vmem:[#allocation2 + $0x28] sm:$0xe] }
 0x12c   : > { %v1699_v40 = vsel %vm7385_vm12, %v5838_v5, %v1698_v31  ;;  %v5839_v43 = vrot.slane %v1637_v24, 9  ;;  %v853_v44 = vor.u32 %v851_v20, %v850_v32  ;;  %v854_v56 = vrot.slane %v850_v32, 4  ;;  %v7510_v47 = vld [vmem:[#allocation2 + $0x2c] sm:$0x1]  ;;  %v7512_v38 = vld [vmem:[#allocation2 + $0x10] sm:$0xf] }
 0x12d   : > { %v5860_v45 = vcombine.low %v1695_v23, %v1699_v40  ;;  %v1062_v46 = vrot.slane %v1060_v17, 4  ;;  %v997_v48 = vsel %vm7407_vm0, %v869_v37, %v996_v16  ;;  %v1000_v51 = vsel %vm7228_vm3, %v870_v39, %v999_v18  ;;  %v7518_v55 = vld [vmem:[#allocation2 + $0x18] sm:$0xf]  ;;  %v1639_v5 = vld [vmem:[#allocation2 + $0x30] sm:$0xe]  ;;  %v6939_v10 = vld [vmem:[%s9061_s3 + $0x88] sm:$0xff]  }
 0x12e   : > { %v1065_v52 = vrot.slane %v1063_v33, 5  ;;  %v1071_v54 = vrot.slane %v1069_v34, 5  ;;  %998 = vst [vmem:[#allocation2 + $0x80] sm:$0xf] %v997_v48  ;;  %1001 = vst [vmem:[#allocation2 + $0x84] sm:$0x1] %v1000_v51  ;;  %v985_v57 = vsel %vm7407_vm0, %v853_v44, %v984_v29  ;;  %v988_v58 = vsel %vm7228_vm3, %v854_v56, %v987_v30 }
 0x12f   : > { %6573 = vmatmul.mubr.msk.bf16.vlgmr.msra.gmra.mxu0 %vm1326_vm5, %v5860_v45  ;;  %v1702_v59 = vrot.slane %v7508_v41, 5  ;;  %v5840_v60 = vrot.slane %v1638_v42, 9  ;;  %986 = vst [vmem:[#allocation2 + $0x70] sm:$0xf] %v985_v57  ;;  %989 = vst [vmem:[#allocation2 + $0x74] sm:$0x1] %v988_v58 }
 0x130   : > { %v1066_v61 = vor.u32 %v1065_v52, %v1062_v46  ;;  %v1706_v62 = vrot.slane %v7510_v47, 5  ;;  %v1074_v63 = vshrl.u32 %v7512_v38, 16  ;;  %v1077_v0 = vshll.u32 %v7512_v38, 16  ;;  %v1640_v1 = vld [vmem:[#allocation2 + $0x38] sm:$0xe]  ;;  %6613 = vmatpush3.bf16.msra.mxu0 %v7366_v50 }
 0x131   : > { %v1703_v8 = vsel %vm7385_vm12, %v5839_v43, %v1702_v59  ;;  %v1083_v36 = vshll.u32 %v7477_v53, 16  ;;  %v1088_v2 = vshrl.u32 %v7518_v55, 16  ;;  %v1091_v4 = vshll.u32 %v7518_v55, 16  ;;  %v7535_v6 = vld [vmem:[#allocation2 + $0x20] sm:$0xf]  ;;  %6614 = vmatprep.subr.bf16.mxu0 %v6937_v35  ;;  %v7573_v42 = vld [vmem:[%s9061_s3 + $0xd8] sm:$0xff]  }
 0x132   : > { %v1067_v12 = vrot.slane %v1066_v61, 4  ;;  %v1707_v50 = vsel %vm7385_vm12, %v5840_v60, %v1706_v62  ;;  %v1076_v13 = vrot.slane %v1074_v63, 4  ;;  %v1079_v16 = vrot.slane %v1077_v0, 5  ;;  %v7542_v18 = vld [vmem:[#allocation2 + $0x34] sm:$0x1] }
 0x133   : > { %v5861_v53 = vcombine.low %v1703_v8, %v1707_v50  ;;  %v1085_v19 = vrot.slane %v1083_v36, 5  ;;  %v1090_v20 = vrot.slane %v1088_v2, 4  ;;  %v1093_v22 = vrot.slane %v1091_v4, 5  ;;  %v7544_v23 = vld [vmem:[#allocation2 + $0x3c] sm:$0x1]  ;;  %v6935_v63 = vld [vmem:[%s9061_s3 + $0x10] sm:$0xff]  }
 0x134   : > { %v1072_v24 = vsel %vm7396_vm14, %v1067_v12, %v1071_v54  ;;  %v1080_v25 = vor.u32 %v1079_v16, %v1076_v13  ;;  %v1097_v27 = vshll.u32 %v7486_v3, 16  ;;  %v5841_v28 = vrot.slane %v1639_v5, 9  ;;  %6615 = vmatpush3.bf16.msra.mxu0 %v6937_v35  ;;  %v7556_v17 = vld [vmem:[#allocation2 + $0x28] sm:$0xf]  ;;  %v6940_v3 = vld [vmem:[%s9061_s3 + $0x80] sm:$0xff]  }
 0x135   : > { %v5795_v29 = vcombine.low %v1058_v26, %v1072_v24  ;;  %6576 = vmatprep.mubr.msk.bf16.mxu0 %vm1326_vm5, %v5861_v53  ;;  %v1094_v30 = vor.u32 %v1093_v22, %v1090_v20  ;;  %v1710_v31 = vrot.slane %v7542_v18, 5  ;;  %v5842_v32 = vrot.slane %v1640_v1, 9  ;;  %6616 = vmatprep.subr.bf16.mxu0 %v6939_v10  ;;  %v7568_v40 = vld [vmem:[#allocation2 + $0x44] sm:$0x1]  ;;  %v1641_v46 = vld [vmem:[#allocation2 + $0x40] sm:$0xe] }
 0x136   : > { %v1081_v33 = vrot.slane %v1080_v25, 4  ;;  %v1099_v34 = vrot.slane %v1097_v27, 5  ;;  %v1714_v35 = vrot.slane %v7544_v23, 5  ;;  %v1102_v7 = vshrl.u32 %v7535_v6, 16  ;;  %v1642_v48 = vld [vmem:[#allocation2 + $0x48] sm:$0xe] }
 0x137   : > { %6524 = vmatprep.mubr.msk.bf16.mxu1 %vm1326_vm5, %v5795_v29  ;;  %v1095_v9 = vrot.slane %v1094_v30, 4  ;;  %v1711_v26 = vsel %vm7385_vm12, %v5841_v28, %v1710_v31  ;;  %v1105_v37 = vshll.u32 %v7535_v6, 16  ;;  %v1111_v39 = vshll.u32 %v7508_v41, 16  ;;  %v7582_v57 = vld [vmem:[#allocation2 + $0x4c] sm:$0x1] }
 0x138   : > { %v1086_v43 = vsel %vm7396_vm14, %v1081_v33, %v1085_v19  ;;  %v1715_v44 = vsel %vm7385_vm12, %v5842_v32, %v1714_v35  ;;  %v1104_v56 = vrot.slane %v1102_v7, 4  ;;  %v1116_v45 = vshrl.u32 %v7556_v17, 16  ;;  %6617 = vmatpush3.bf16.msra.mxu0 %v6939_v10  ;;  %v7584_v58 = vld [vmem:[#allocation2 + $0x30] sm:$0xf]  ;;  %v7593_v2 = vld [vmem:[#allocation2 + $0x38] sm:$0xf] }
 0x139   : > { %v1100_v41 = vsel %vm7396_vm14, %v1095_v9, %v1099_v34  ;;  %v5862_v51 = vcombine.low %v1711_v26, %v1715_v44  ;;  %v1107_v52 = vrot.slane %v1105_v37, 5  ;;  %v1113_v54 = vrot.slane %v1111_v39, 5  ;;  %6618 = vmatprep.subr.bf16.mxu0 %v6940_v3  ;;  %v7603_v53 = vld [vmem:[#allocation2 + $0x5c] sm:$0x1]  ;;  %v1644_v19 = vld [vmem:[#allocation2 + $0x58] sm:$0xe] }
 0x13a   : > { %v5796_v59 = vcombine.low %v1086_v43, %v1100_v41  ;;  %v1118_v60 = vrot.slane %v1116_v45, 4  ;;  %v1119_v61 = vshll.u32 %v7556_v17, 16  ;;  %v1125_v62 = vshll.u32 %v7510_v47, 16  ;;  %v6938_v20 = vld [vmem:[%s9061_s3 + $0x8] sm:$0xff]   ;;  %v7612_v27 = vld [vmem:[#allocation2 + $0x54] sm:$0x1] }
 0x13b   : > { %6577 = vmatmul.mubr.msk.bf16.gmra.mxu0 %vm1326_vm5, %v5862_v51  ;;  %v1108_v0 = vor.u32 %v1107_v52, %v1104_v56  ;;  %v5843_v1 = vrot.slane %v1641_v46, 9  ;;  %v1718_v8 = vrot.slane %v7568_v40, 5  ;;  %v5844_v36 = vrot.slane %v1642_v48, 9  ;;  %v7614_v28 = vld [vmem:[#allocation2 + $0x40] sm:$0xf] }
 0x13c   : > { %6525 = vmatmul.mubr.msk.bf16.vlgmr.msra.gmra.mxu1 %vm1326_vm5, %v5796_v59  ;;  %v1121_v4 = vrot.slane %v1119_v61, 5  ;;  %v1127_v5 = vrot.slane %v1125_v62, 5  ;;  %v1722_v10 = vrot.slane %v7582_v57, 5  ;;  %v1130_v47 = vshrl.u32 %v7584_v58, 16  ;;  %6619 = vmatpush3.bf16.msra.mxu0 %v6940_v3  ;;  %v7620_v7 = vld [vmem:[#allocation2 + $0x48] sm:$0xf] }
 0x13d   : > { %6541 = vmatpush3.bf16.msra.mxu1 %v7360_v49  ;;  %v1109_v12 = vrot.slane %v1108_v0, 4  ;;  %v1719_v50 = vsel %vm7385_vm12, %v5843_v1, %v1718_v8  ;;  %v1133_v13 = vshll.u32 %v7584_v58, 16  ;;  %v1139_v16 = vshll.u32 %v7542_v18, 16  ;;  %6660 = vmatprep.subr.bf16.mxu0 %v7573_v42  ;;  %v1643_v18 = vld [vmem:[#allocation2 + $0x50] sm:$0xe]  ;;  %v7642_v0 = vld [vmem:[%s9061_s3 + $0x78] sm:$0xff]  }
 0x13e   : > { %v1122_v22 = vor.u32 %v1121_v4, %v1118_v60  ;;  %v1723_v49 = vsel %vm7385_vm12, %v5844_v36, %v1722_v10  ;;  %6542 = vmatprep.subr.bf16.mxu1 %v6935_v63  ;;  %v1132_v24 = vrot.slane %v1130_v47, 4  ;;  %v1144_v25 = vshrl.u32 %v7593_v2, 16  ;;  %v7627_v46 = vld [vmem:[#allocation2 + $0x64] sm:$0x1]  ;;  %v6976_v11 = vld [vmem:[#allocation2 + $0x68] ss:$8 sps:$4 sm:$0xff]  }
 0x13f   : > { %v1114_v29 = vsel %vm7396_vm14, %v1109_v12, %v1113_v54  ;;  %v5863_v30 = vcombine.low %v1719_v50, %v1723_v49  ;;  %v1135_v31 = vrot.slane %v1133_v13, 5  ;;  %v1141_v32 = vrot.slane %v1139_v16, 5  ;;  %v1645_v54 = vld [vmem:[#allocation2 + $0x60] sm:$0xe]  ;;  %v7651_v50 = vld [vmem:[#allocation2 + $0x6c] sm:$0x1] }
 0x140   : > { %v1123_v3 = vrot.slane %v1122_v22, 4  ;;  %v1146_v33 = vrot.slane %v1144_v25, 4  ;;  %v1147_v34 = vshll.u32 %v7593_v2, 16  ;;  %v1153_v35 = vshll.u32 %v7544_v23, 16  ;;  %v6941_v23 = vld [vmem:[%s9061_s3] sm:$0xff]  }
 0x141   : > { %6580 = vmatprep.mubr.msk.bf16.mxu0 %vm1326_vm5, %v5863_v30  ;;  %v1136_v9 = vor.u32 %v1135_v31, %v1132_v24  ;;  %6543 = vmatpush3.bf16.msra.mxu1 %v6935_v63  ;;  %v5845_v26 = vrot.slane %v1643_v18, 9  ;;  %v1726_v37 = vrot.slane %v7612_v27, 5  ;;  %v5846_v39 = vrot.slane %v1644_v19, 9  ;;  %v1646_v63 = vld [vmem:[#allocation2 + $0x68] sm:$0xe] }
 0x142   : > { %v1128_v43 = vsel %vm7396_vm14, %v1123_v3, %v1127_v5  ;;  %v1149_v44 = vrot.slane %v1147_v34, 5  ;;  %v1155_v56 = vrot.slane %v1153_v35, 5  ;;  %v1730_v45 = vrot.slane %v7603_v53, 5  ;;  %6544 = vmatprep.subr.bf16.mxu1 %v6938_v20  ;;  %v7648_v5 = vld [vmem:[#allocation2 + $0x50] sm:$0xf] }
 0x143   : > { %v5797_v48 = vcombine.low %v1114_v29, %v1128_v43  ;;  %v1137_v41 = vrot.slane %v1136_v9, 4  ;;  %v1727_v51 = vsel %vm7385_vm12, %v5845_v26, %v1726_v37  ;;  %v1158_v52 = vshrl.u32 %v7614_v28, 16  ;;  %v7658_v18 = vld [vmem:[#allocation2 + $0x58] sm:$0xf]  ;;  %v7663_v3 = vld [vmem:[#allocation2 + $0x74] sm:$0x1] }
 0x144   : > { %v1150_v59 = vor.u32 %v1149_v44, %v1146_v33  ;;  %v1731_v60 = vsel %vm7385_vm12, %v5846_v39, %v1730_v45  ;;  %v1161_v61 = vshll.u32 %v7614_v28, 16  ;;  %v1167_v62 = vshll.u32 %v7568_v40, 16  ;;  %v1647_v9 = vld [vmem:[#allocation2 + $0x70] sm:$0xe]  ;;  %v7674_v44 = vld [vmem:[#allocation2 + $0x7c] sm:$0x1] }
 0x145   : > { %6528 = vmatprep.mubr.msk.bf16.mxu1 %vm1326_vm5, %v5797_v48  ;;  %v1142_v1 = vsel %vm7396_vm14, %v1137_v41, %v1141_v32  ;;  %v5864_v8 = vcombine.low %v1727_v51, %v1731_v60  ;;  %v1160_v36 = vrot.slane %v1158_v52, 4  ;;  %v1172_v4 = vshrl.u32 %v7620_v7, 16  ;;  %6545 = vmatpush3.bf16.msra.mxu1 %v6938_v20  ;;  %v1648_v51 = vld [vmem:[#allocation2 + $0x78] sm:$0xe]  ;;  %v7678_v52 = vld [vmem:[#allocation2 + $0xc] sm:$0x1] }
 0x146   : > { %v1151_v10 = vrot.slane %v1150_v59, 4  ;;  %v1163_v40 = vrot.slane %v1161_v61, 5  ;;  %v1169_v47 = vrot.slane %v1167_v62, 5  ;;  %v1175_v12 = vshll.u32 %v7620_v7, 16  ;;  %6546 = vmatprep.subr.bf16.mxu1 %v6941_v23 }
 0x147   : > { %6581 = vmatmul.mubr.msk.bf16.gmra.mxu0 %vm1326_vm5, %v5864_v8  ;;  %v1174_v13 = vrot.slane %v1172_v4, 4  ;;  %v1181_v16 = vshll.u32 %v7582_v57, 16  ;;  %v5847_v19 = vrot.slane %v1645_v54, 9  ;;  %v1734_v22 = vrot.slane %v7627_v46, 5 }
 0x148   : > { %v1156_v49 = vsel %vm7396_vm14, %v1151_v10, %v1155_v56  ;;  %v1164_v20 = vor.u32 %v1163_v40, %v1160_v36  ;;  %v1177_v24 = vrot.slane %v1175_v12, 5  ;;  %v5848_v25 = vrot.slane %v1646_v63, 9  ;;  %v2168_v56 = vld [vmem:[#allocation2 + $0x8] sm:$0xf]  ;;  %v2170_v40 = vld [vmem:[#allocation2 + $0x10] sm:$0xf] }
 0x149   : > { %v5798_v29 = vcombine.low %v1142_v1, %v1156_v49  ;;  %v1183_v30 = vrot.slane %v1181_v16, 5  ;;  %v1735_v31 = vsel %vm7385_vm12, %v5847_v19, %v1734_v22  ;;  %v1738_v32 = vrot.slane %v7651_v50, 5  ;;  %6547 = vmatpush3.bf16.msra.mxu1 %v6941_v23  ;;  %v7688_v16 = vld [vmem:[#allocation2 + $0x14] sm:$0x1] }
 0x14a   : > { %v1165_v57 = vrot.slane %v1164_v20, 4  ;;  %v1178_v33 = vor.u32 %v1177_v24, %v1174_v13  ;;  %v1186_v34 = vshrl.u32 %v7648_v5, 16  ;;  %v1189_v35 = vshll.u32 %v7648_v5, 16  ;;  %6588 = vmatprep.subr.bf16.mxu1 %v7642_v0  ;;  %v7692_v24 = vld [vmem:[#allocation2 + $0x60] sm:$0xf] }
 0x14b   : > { %6529 = vmatmul.mubr.msk.bf16.gmra.mxu1 %vm1326_vm5, %v5798_v29  ;;  %v1739_v26 = vsel %vm7385_vm12, %v5848_v25, %v1738_v32  ;;  %v1195_v37 = vshll.u32 %v7612_v27, 16  ;;  %v1200_v39 = vshrl.u32 %v7658_v18, 16  ;;  %v1203_v43 = vshll.u32 %v7658_v18, 16 }
 0x14c   : > { %v1170_v45 = vsel %vm7396_vm14, %v1165_v57, %v1169_v47  ;;  %v1179_v23 = vrot.slane %v1178_v33, 4  ;;  %v5865_v48 = vcombine.low %v1735_v31, %v1739_v26  ;;  %v1188_v41 = vrot.slane %v1186_v34, 4 }
 0x14d   : > { %v1191_v54 = vrot.slane %v1189_v35, 5  ;;  %v1197_v59 = vrot.slane %v1195_v37, 5  ;;  %v1202_v60 = vrot.slane %v1200_v39, 4  ;;  %v1205_v27 = vrot.slane %v1203_v43, 5  ;;  %v7700_v35 = vld [vmem:[#allocation2 + $0x68] sm:$0xf] }
 0x14e   : > { %v1184_v61 = vsel %vm7396_vm14, %v1179_v23, %v1183_v30  ;;  %6584 = vmatprep.mubr.msk.bf16.mxu0 %vm1326_vm5, %v5865_v48  ;;  %v1209_v62 = vshll.u32 %v7603_v53, 16  ;;  %v5849_v63 = vrot.slane %v1647_v9, 9  ;;  %v1742_v1 = vrot.slane %v7663_v3, 5 }
 0x14f   : > { %v5799_v8 = vcombine.low %v1170_v45, %v1184_v61  ;;  %v1192_v36 = vor.u32 %v1191_v54, %v1188_v41  ;;  %v1206_v4 = vor.u32 %v1205_v27, %v1202_v60  ;;  %v5850_v10 = vrot.slane %v1648_v51, 9  ;;  %v7710_v54 = vld [vmem:[#allocation2 + $0x70] sm:$0xf] }
 0x150   : > { %v1211_v47 = vrot.slane %v1209_v62, 5  ;;  %v1743_v12 = vsel %vm7385_vm12, %v5849_v63, %v1742_v1  ;;  %v1746_v13 = vrot.slane %v7674_v44, 5  ;;  %v2201_v19 = vshrl.u32 %v2168_v56, 16  ;;  %v7712_v62 = vld [vmem:[#allocation2 + $0x78] sm:$0xf] }
 0x151   : > { %6532 = vmatprep.mubr.msk.bf16.mxu1 %vm1326_vm5, %v5799_v8  ;;  %v1193_v53 = vrot.slane %v1192_v36, 4  ;;  %v1207_v22 = vrot.slane %v1206_v4, 4  ;;  %v2204_v49 = vshll.u32 %v2168_v56, 16  ;;  %v2210_v20 = vshll.u32 %v7678_v52, 16 }
 0x152   : > { %v1747_v25 = vsel %vm7385_vm12, %v5850_v10, %v1746_v13  ;;  %v2203_v29 = vrot.slane %v2201_v19, 4  ;;  %v2215_v30 = vshrl.u32 %v2170_v40, 16  ;;  %v2218_v31 = vshll.u32 %v2170_v40, 16 }
 0x153   : > { %v1198_v32 = vsel %vm7396_vm14, %v1193_v53, %v1197_v59  ;;  %v1212_v57 = vsel %vm7396_vm14, %v1207_v22, %v1211_v47  ;;  %v5866_v33 = vcombine.low %v1743_v12, %v1747_v25  ;;  %v2206_v34 = vrot.slane %v2204_v49, 5  ;;  %v2172_v53 = vld [vmem:[#allocation2 + $0x18] sm:$0xf] }
 0x154   : > { %v5800_v9 = vcombine.low %v1198_v32, %v1212_v57  ;;  %v2217_v26 = vrot.slane %v2215_v30, 4  ;;  %v2220_v37 = vrot.slane %v2218_v31, 5  ;;  %v2224_v43 = vshll.u32 %v7688_v16, 16 }
 0x155   : > { %6585 = vmatmul.mubr.msk.bf16.gmra.mxu0 %vm1326_vm5, %v5866_v33  ;;  %v2207_v39 = vor.u32 %v2206_v34, %v2203_v29  ;;  %v1214_v56 = vshrl.u32 %v7692_v24, 16  ;;  %v1217_v45 = vshll.u32 %v7692_v24, 16  ;;  %v1223_v48 = vshll.u32 %v7627_v46, 16  ;;  %v2174_v34 = vld [vmem:[#allocation2 + $0x20] sm:$0xf] }
 0x156   : > { %6533 = vmatmul.mubr.msk.bf16.gmra.mxu1 %vm1326_vm5, %v5800_v9  ;;  %v2221_v23 = vor.u32 %v2220_v37, %v2217_v26  ;;  %v1228_v41 = vshrl.u32 %v7700_v35, 16  ;;  %v1231_v51 = vshll.u32 %v7700_v35, 16  ;;  %v2212_v60 = vrot.slane %v2210_v20, 5  ;;  %v7730_v37 = vld [vmem:[#allocation2 + $0x1c] sm:$0x1] }
 0x157   : > { %v2208_v59 = vrot.slane %v2207_v39, 4  ;;  %v1216_v27 = vrot.slane %v1214_v56, 4  ;;  %v1219_v61 = vrot.slane %v1217_v45, 5  ;;  %v2226_v1 = vrot.slane %v2224_v43, 5  ;;  %v7732_v39 = vld [vmem:[#allocation2 + $0x24] sm:$0x1] }
 0x158   : > { %v2222_v63 = vrot.slane %v2221_v23, 4  ;;  %v1230_v8 = vrot.slane %v1228_v41, 4  ;;  %v1233_v36 = vrot.slane %v1231_v51, 5  ;;  %v1225_v10 = vrot.slane %v1223_v48, 5  ;;  %v2176_v41 = vld [vmem:[#allocation2 + $0x28] sm:$0xf] }
 0x159   : > { %v1220_v4 = vor.u32 %v1219_v61, %v1216_v27  ;;  %v1237_v46 = vshll.u32 %v7651_v50, 16  ;;  %v1242_v40 = vshrl.u32 %v7710_v54, 16  ;;  %v2213_v47 = vsel %vm7396_vm14, %v2208_v59, %v2212_v60  ;;  %v7046_v59 = vld [vmem:[#allocation2] sm:$0xf]  ;;  %v7735_v61 = vld [vmem:[#allocation2 + $0x2c] sm:$0x1] }
 0x15a   : > { %v2227_v12 = vsel %vm7396_vm14, %v2222_v63, %v2226_v1  ;;  %v1234_v13 = vor.u32 %v1233_v36, %v1230_v8  ;;  %v1245_v19 = vshll.u32 %v7710_v54, 16  ;;  %v1251_v25 = vshll.u32 %v7663_v3, 16 }
 0x15b   : > { %v5915_v22 = vcombine.low %v2213_v47, %v2227_v12  ;;  %v1221_v49 = vrot.slane %v1220_v4, 4  ;;  %v1244_v20 = vrot.slane %v1242_v40, 4  ;;  %v1239_v30 = vrot.slane %v1237_v46, 5  ;;  %v2178_v4 = vld [vmem:[#allocation2 + $0x30] sm:$0xf] }
 0x15c   : > { %v1235_v29 = vrot.slane %v1234_v13, 4  ;;  %v1247_v50 = vrot.slane %v1245_v19, 5  ;;  %v1256_v31 = vshrl.u32 %v7712_v62, 16  ;;  %v1259_v57 = vshll.u32 %v7712_v62, 16 }
 0x15d   : > { %6620 = vmatprep.mubr.msk.bf16.mxu0 %vm1326_vm5, %v5915_v22  ;;  %v1226_v32 = vsel %vm7396_vm14, %v1221_v49, %v1225_v10  ;;  %v1265_v33 = vshll.u32 %v7674_v44, 16  ;;  %v2229_v43 = vshrl.u32 %v2172_v53, 16  ;;  %v1253_v45 = vrot.slane %v1251_v25, 5 }
 0x15e   : > { %v1240_v9 = vsel %vm7396_vm14, %v1235_v29, %v1239_v30  ;;  %v1248_v26 = vor.u32 %v1247_v50, %v1244_v20  ;;  %v1258_v3 = vrot.slane %v1256_v31, 4  ;;  %v1261_v23 = vrot.slane %v1259_v57, 5 }
 0x15f   : > { %v5801_v56 = vcombine.low %v1226_v32, %v1240_v9  ;;  %v2232_v48 = vshll.u32 %v2172_v53, 16  ;;  %v5815_v44 = vcombine.low %v7046_v59, %v7489_v15  ;;  %v2231_v60 = vrot.slane %v2229_v43, 4  ;;  %v7742_v53 = vld [vmem:[#allocation2 + $0x34] sm:$0x1]  ;;  %v2180_v32 = vld [vmem:[#allocation2 + $0x38] sm:$0xf] }
 0x160   : > { %v1249_v51 = vrot.slane %v1248_v26, 4  ;;  %v2243_v27 = vshrl.u32 %v2174_v34, 16  ;;  %v1262_v63 = vor.u32 %v1261_v23, %v1258_v3  ;;  %v1267_v1 = vrot.slane %v1265_v33, 5 }
 0x161   : > { %6536 = vmatprep.mubr.msk.bf16.mxu1 %vm1326_vm5, %v5801_v56  ;;  %v2234_v8 = vrot.slane %v2232_v48, 5  ;;  %v2246_v36 = vshll.u32 %v2174_v34, 16  ;;  %v2238_v10 = vshll.u32 %v7730_v37, 16  ;;  %v2252_v40 = vshll.u32 %v7732_v39, 16 }
 0x162   : > { %v2245_v46 = vrot.slane %v2243_v27, 4  ;;  %v2257_v47 = vshrl.u32 %v2176_v41, 16  ;;  %v1254_v15 = vsel %vm7396_vm14, %v1249_v51, %v1253_v45  ;;  %v1263_v12 = vrot.slane %v1262_v63, 4  ;;  %v2182_v51 = vld [vmem:[#allocation2 + $0x40] sm:$0xf] }
 0x163   : > { %v2235_v13 = vor.u32 %v2234_v8, %v2231_v60  ;;  %v2248_v19 = vrot.slane %v2246_v36, 5  ;;  %v2260_v49 = vshll.u32 %v2176_v41, 16  ;;  %v2266_v20 = vshll.u32 %v7735_v61, 16  ;;  %v7751_v41 = vld [vmem:[#allocation2 + $0x3c] sm:$0x1] }
 0x164   : > { %v2259_v22 = vrot.slane %v2257_v47, 4  ;;  %v2271_v25 = vshrl.u32 %v2178_v4, 16  ;;  %v1268_v29 = vsel %vm7396_vm14, %v1263_v12, %v1267_v1  ;;  %v2274_v31 = vshll.u32 %v2178_v4, 16  ;;  %v7758_v1 = vld [vmem:[#allocation2 + $0x44] sm:$0x1]  ;;  %v6950_v47 = vld [vmem:[%s9061_s3 + $0xd0] sm:$0xff]  }
 0x165   : > { %v2236_v30 = vrot.slane %v2235_v13, 4  ;;  %v2249_v50 = vor.u32 %v2248_v19, %v2245_v46  ;;  %v5802_v57 = vcombine.low %v1254_v15, %v1268_v29  ;;  %v2240_v33 = vrot.slane %v2238_v10, 5  ;;  %v2184_v36 = vld [vmem:[#allocation2 + $0x48] sm:$0xf]  ;;  %v7763_v19 = vld [vmem:[#allocation2 + $0x4c] sm:$0x1] }
 0x166   : > { %v2262_v34 = vrot.slane %v2260_v49, 5  ;;  %v2273_v9 = vrot.slane %v2271_v25, 4  ;;  %v2254_v3 = vrot.slane %v2252_v40, 5  ;;  %v2276_v43 = vrot.slane %v2274_v31, 5  ;;  %v2186_v49 = vld [vmem:[#allocation2 + $0x50] sm:$0xf] }
 0x167   : > { %v2250_v26 = vrot.slane %v2249_v50, 4  ;;  %v2280_v56 = vshll.u32 %v7742_v53, 16  ;;  %6537 = vmatmul.mubr.msk.bf16.gmra.mxu1 %vm1326_vm5, %v5802_v57  ;;  %v2241_v45 = vsel %vm7396_vm14, %v2236_v30, %v2240_v33  ;;  %v2268_v48 = vrot.slane %v2266_v20, 5  ;;  %v7772_v31 = vld [vmem:[#allocation2 + $0x54] sm:$0x1] }
 0x168   : > { %v2263_v23 = vor.u32 %v2262_v34, %v2259_v22  ;;  %v2285_v59 = vshrl.u32 %v2180_v32, 16  ;;  %6548 = vmatprep.mubr.msk.bf16.mxu1 %vm1326_vm5, %v5815_v44  ;;  %v2277_v27 = vor.u32 %v2276_v43, %v2273_v9  ;;  %v5816_v63 = vcombine.low %v7512_v38, %v7518_v55  ;;  %v6946_v9 = vld [vmem:[%s9061_s3 + $0x70] sm:$0xff]  }
 0x169   : > { %v2255_v60 = vsel %vm7396_vm14, %v2250_v26, %v2254_v3  ;;  %v2288_v8 = vshll.u32 %v2180_v32, 16  ;;  %v2282_v46 = vrot.slane %v2280_v56, 5  ;;  %v2299_v12 = vshrl.u32 %v2182_v51, 16 }
 0x16a   : > { %v5916_v4 = vcombine.low %v2241_v45, %v2255_v60  ;;  %v2264_v10 = vrot.slane %v2263_v23, 4  ;;  %v2287_v40 = vrot.slane %v2285_v59, 4  ;;  %v2278_v44 = vrot.slane %v2277_v27, 4 }
 0x16b   : > { %v2290_v15 = vrot.slane %v2288_v8, 5  ;;  %v2302_v13 = vshll.u32 %v2182_v51, 16  ;;  %v2294_v55 = vshll.u32 %v7751_v41, 16  ;;  %v2308_v22 = vshll.u32 %v7758_v1, 16  ;;  %v2190_v8 = vld [vmem:[#allocation2 + $0x60] sm:$0xf] }
 0x16c   : > { %6621 = vmatmul.mubr.msk.bf16.vlgmr.msra.gmra.mxu0 %vm1326_vm5, %v5916_v4  ;;  %v2269_v38 = vsel %vm7396_vm14, %v2264_v10, %v2268_v48  ;;  %v2313_v20 = vshrl.u32 %v2184_v36, 16  ;;  %v2283_v25 = vsel %vm7396_vm14, %v2278_v44, %v2282_v46  ;;  %v2301_v30 = vrot.slane %v2299_v12, 4  ;;  %v2188_v48 = vld [vmem:[#allocation2 + $0x58] sm:$0xf]  ;;  %v7793_v46 = vld [vmem:[#allocation2 + $0x5c] sm:$0x1] }
 0x16d   : > { %v2291_v29 = vor.u32 %v2290_v15, %v2287_v40  ;;  %v2304_v50 = vrot.slane %v2302_v13, 5  ;;  %6661 = vmatpush3.bf16.msra.mxu0 %v7573_v42  ;;  %v5917_v32 = vcombine.low %v2269_v38, %v2283_v25  ;;  %v5817_v57 = vcombine.low %v7535_v6, %v7556_v17  ;;  %v6954_v42 = vld [vmem:[%s9061_s3 + $0xc8] sm:$0xff]  }
 0x16e   : > { %v2315_v33 = vrot.slane %v2313_v20, 4  ;;  %v2316_v34 = vshll.u32 %v2184_v36, 16  ;;  %6662 = vmatprep.subr.bf16.mxu0 %v6950_v47  ;;  %v2322_v43 = vshll.u32 %v7763_v19, 16  ;;  %v2327_v56 = vshrl.u32 %v2186_v49, 16 }
 0x16f   : > { %v2292_v26 = vrot.slane %v2291_v29, 4  ;;  %v2305_v3 = vor.u32 %v2304_v50, %v2301_v30  ;;  %6624 = vmatprep.mubr.msk.bf16.mxu0 %vm1326_vm5, %v5917_v32  ;;  %6549 = vmatmul.mubr.msk.bf16.vlgmr.msra.gmra.mxu1 %vm1326_vm5, %v5816_v63  ;;  %v2296_v6 = vrot.slane %v2294_v55, 5  ;;  %v2330_v45 = vshll.u32 %v2186_v49, 16  ;;  %v6956_v49 = vld [vmem:[%s9061_s3 + $0xc0] sm:$0xff]   ;;  %v2194_v30 = vld [vmem:[#allocation2 + $0x70] sm:$0xf] }
 0x170   : > { %v2318_v17 = vrot.slane %v2316_v34, 5  ;;  %v2336_v23 = vshll.u32 %v7772_v31, 16  ;;  %6589 = vmatpush3.bf16.msra.mxu1 %v7642_v0  ;;  %6552 = vmatprep.mubr.msk.bf16.mxu1 %vm1326_vm5, %v5817_v57  ;;  %v2310_v59 = vrot.slane %v2308_v22, 5  ;;  %v2329_v60 = vrot.slane %v2327_v56, 4  ;;  %v6951_v0 = vld [vmem:[%s9061_s3 + $0x68] sm:$0xff]   ;;  %v6957_v34 = vld [vmem:[%s9061_s3 + $0x60] sm:$0xff]  }
 0x171   : > { %v2306_v51 = vrot.slane %v2305_v3, 4  ;;  %v5818_v27 = vcombine.low %v7584_v58, %v7593_v2  ;;  %v2297_v63 = vsel %vm7396_vm14, %v2292_v26, %v2296_v6  ;;  %v2324_v4 = vrot.slane %v2322_v43, 5  ;;  %6590 = vmatprep.subr.bf16.mxu1 %v6946_v9  ;;  %6663 = vmatpush3.bf16.msra.mxu0 %v6950_v47  ;;  %v7800_v58 = vld [vmem:[#allocation2 + $0x64] sm:$0x1]  ;;  %v2192_v22 = vld [vmem:[#allocation2 + $0x68] sm:$0xf] }
 0x172   : > { %v2319_v36 = vor.u32 %v2318_v17, %v2315_v33  ;;  %v2332_v10 = vrot.slane %v2330_v45, 5  ;;  %v2338_v44 = vrot.slane %v2336_v23, 5  ;;  %v2341_v2 = vshrl.u32 %v2188_v48, 16  ;;  %6664 = vmatprep.subr.bf16.mxu0 %v6954_v42  ;;  %v7818_v56 = vld [vmem:[#allocation2 + $0x6c] sm:$0x1]  ;;  %v7823_v17 = vld [vmem:[%s9061_s3 + $0x118] sm:$0xff]  }
 0x173   : > { %v2311_v40 = vsel %vm7396_vm14, %v2306_v51, %v2310_v59  ;;  %v2344_v15 = vshll.u32 %v2188_v48, 16  ;;  %v2355_v55 = vshrl.u32 %v2190_v8, 16  ;;  %v5819_v47 = vcombine.low %v7614_v28, %v7620_v7  ;;  %v7826_v48 = vld [vmem:[#allocation2 + $0x74] sm:$0x1]  ;;  %v2196_v59 = vld [vmem:[#allocation2 + $0x78] sm:$0xf] }
 0x174   : > { %v5918_v12 = vcombine.low %v2297_v63, %v2311_v40  ;;  %v2320_v13 = vrot.slane %v2319_v36, 4  ;;  %v2333_v38 = vor.u32 %v2332_v10, %v2329_v60  ;;  %6591 = vmatpush3.bf16.msra.mxu1 %v6946_v9  ;;  %v2343_v20 = vrot.slane %v2341_v2, 4  ;;  %v7831_v63 = vld [vmem:[%s9061_s3 + $0xb8] sm:$0xff]  }
 0x175   : > { %v2346_v25 = vrot.slane %v2344_v15, 5  ;;  %v2358_v29 = vshll.u32 %v2190_v8, 16  ;;  %v2350_v32 = vshll.u32 %v7793_v46, 16  ;;  %v2357_v57 = vrot.slane %v2355_v55, 4  ;;  %6592 = vmatprep.subr.bf16.mxu1 %v6951_v0  ;;  %6665 = vmatpush3.bf16.msra.mxu0 %v6954_v42  ;;  %v2198_v15 = vld [vmem:[#allocation2 + $0x80] sm:$0xf] }
 0x176   : > { %6625 = vmatmul.mubr.msk.bf16.gmra.mxu0 %vm1326_vm5, %v5918_v12  ;;  %v2334_v50 = vrot.slane %v2333_v38, 4  ;;  %v2364_v33 = vshll.u32 %v7800_v58, 16  ;;  %v2369_v28 = vshrl.u32 %v2192_v22, 16  ;;  %v2372_v7 = vshll.u32 %v2192_v22, 16  ;;  %6666 = vmatprep.subr.bf16.mxu0 %v6956_v49  ;;  %v7843_v22 = vld [vmem:[#allocation2 + $0x7c] sm:$0x1] }
 0x177   : > { %v2347_v9 = vor.u32 %v2346_v25, %v2343_v20  ;;  %v2360_v26 = vrot.slane %v2358_v29, 5  ;;  %v2325_v3 = vsel %vm7396_vm14, %v2320_v13, %v2324_v4  ;;  %6553 = vmatmul.mubr.msk.bf16.gmra.mxu1 %vm1326_vm5, %v5818_v27  ;;  %v2383_v6 = vshrl.u32 %v2194_v30, 16  ;;  %v7845_v29 = vld [vmem:[#allocation2 + $0x84] sm:$0x1] }
 0x178   : > { %v2339_v43 = vsel %vm7396_vm14, %v2334_v50, %v2338_v44  ;;  %6556 = vmatprep.mubr.msk.bf16.mxu1 %vm1326_vm5, %v5819_v47  ;;  %v2371_v51 = vrot.slane %v2369_v28, 4  ;;  %6593 = vmatpush3.bf16.msra.mxu1 %v6951_v0  ;;  %v2374_v60 = vrot.slane %v2372_v7, 5  ;;  %v2386_v8 = vshll.u32 %v2194_v30, 16 }
 0x179   : > { %v5919_v45 = vcombine.low %v2325_v3, %v2339_v43  ;;  %v2348_v42 = vrot.slane %v2347_v9, 4  ;;  %v2361_v23 = vor.u32 %v2360_v26, %v2357_v57  ;;  %v2385_v27 = vrot.slane %v2383_v6, 4  ;;  %6594 = vmatprep.subr.bf16.mxu1 %v6957_v34  ;;  %6667 = vmatpush3.bf16.msra.mxu0 %v6956_v49  ;;  %v2618_v26 = vld [vmem:[#allocation2 + $0x8] sm:$0xe] }
 0x17a   : > { %v2352_v36 = vrot.slane %v2350_v32, 5  ;;  %v2366_v10 = vrot.slane %v2364_v33, 5  ;;  %v2378_v40 = vshll.u32 %v7818_v56, 16  ;;  %v2375_v44 = vor.u32 %v2374_v60, %v2371_v51  ;;  %6708 = vmatprep.subr.bf16.mxu0 %v7823_v17 }
 0x17b   : > { %6628 = vmatprep.mubr.msk.bf16.mxu0 %vm1326_vm5, %v5919_v45  ;;  %v2362_v4 = vrot.slane %v2361_v23, 4  ;;  %v2388_v0 = vrot.slane %v2386_v8, 5  ;;  %v2392_v2 = vshll.u32 %v7826_v48, 16  ;;  %v2397_v12 = vshrl.u32 %v2196_v59, 16 }
 0x17c   : > { %v2353_v13 = vsel %vm7396_vm14, %v2348_v42, %v2352_v36  ;;  %v5820_v55 = vcombine.low %v7648_v5, %v7658_v18  ;;  %v2400_v49 = vshll.u32 %v2196_v59, 16  ;;  %6595 = vmatpush3.bf16.msra.mxu1 %v6957_v34  ;;  %v2376_v20 = vrot.slane %v2375_v44, 4 }
 0x17d   : > { %v2367_v38 = vsel %vm7396_vm14, %v2362_v4, %v2366_v10  ;;  %v2389_v25 = vor.u32 %v2388_v0, %v2385_v27  ;;  %v2399_v30 = vrot.slane %v2397_v12, 4  ;;  %6636 = vmatprep.subr.bf16.mxu1 %v7831_v63  ;;  %v5821_v50 = vcombine.low %v7692_v24, %v7700_v35  ;;  %v2619_v35 = vld [vmem:[#allocation2 + $0x10] sm:$0xe] }
 0x17e   : > { %v5920_v47 = vcombine.low %v2353_v13, %v2367_v38  ;;  %v2402_v32 = vrot.slane %v2400_v49, 5  ;;  %v2411_v57 = vshrl.u32 %v2198_v15, 16  ;;  %v2414_v33 = vshll.u32 %v2198_v15, 16  ;;  %v6959_v0 = vld [vmem:[#allocation2 + $0x8] ss:$8 sps:$4 sm:$0xff]  }
 0x17f   : > { %v2380_v5 = vrot.slane %v2378_v40, 5  ;;  %v2390_v18 = vrot.slane %v2389_v25, 4  ;;  %v2394_v9 = vrot.slane %v2392_v2, 5  ;;  %6557 = vmatmul.mubr.msk.bf16.gmra.mxu1 %vm1326_vm5, %v5820_v55  ;;  %v2406_v34 = vshll.u32 %v7843_v22, 16  ;;  %v2620_v15 = vld [vmem:[#allocation2 + $0x18] sm:$0xe] }
 0x180   : > { %6629 = vmatmul.mubr.msk.bf16.gmra.mxu0 %vm1326_vm5, %v5920_v47  ;;  %6560 = vmatprep.mubr.msk.bf16.mxu1 %vm1326_vm5, %v5821_v50  ;;  %v2403_v28 = vor.u32 %v2402_v32, %v2399_v30  ;;  %v2413_v7 = vrot.slane %v2411_v57, 4  ;;  %v2416_v3 = vrot.slane %v2414_v33, 5  ;;  %v2420_v24 = vshll.u32 %v7845_v29, 16  ;;  %v6955_v13 = vld [vmem:[#allocation2 + $0x10] ss:$8 sps:$4 sm:$0xff]  }
 0x181   : > { %v2381_v43 = vsel %vm7396_vm14, %v2376_v20, %v2380_v5  ;;  %v2395_v6 = vsel %vm7396_vm14, %v2390_v18, %v2394_v9  ;;  %v5935_v51 = vrot.slane %v2618_v26, 9  ;;  %v2668_v59 = vrot.slane %v7678_v52, 5  ;;  %v2623_v38 = vld [vmem:[#allocation2 + $0x30] sm:$0xe]  ;;  %v2625_v26 = vld [vmem:[#allocation2 + $0x40] sm:$0xe] }
 0x182   : > { %v5921_v45 = vcombine.low %v2381_v43, %v2395_v6  ;;  %v2404_v42 = vrot.slane %v2403_v28, 4  ;;  %v2417_v23 = vor.u32 %v2416_v3, %v2413_v7  ;;  %v5936_v60 = vrot.slane %v2619_v35, 9  ;;  %v6967_v5 = vld [vmem:[%s9061_s3 + $0xb0] sm:$0xff]   ;;  %v6960_v28 = vld [vmem:[#allocation2 + $0x20] ss:$8 sps:$4 sm:$0xff]  }
 0x183   : > { %v2408_v27 = vrot.slane %v2406_v34, 5  ;;  %v2422_v36 = vrot.slane %v2420_v24, 5  ;;  %v2672_v4 = vrot.slane %v7688_v16, 5  ;;  %v5822_v10 = vcombine.low %v7710_v54, %v7712_v62  ;;  %v2621_v16 = vld [vmem:[#allocation2 + $0x20] sm:$0xe]  ;;  %v6973_v7 = vld [vmem:[%s9061_s3 + $0x110] sm:$0xff]  }
 0x184   : > { %6632 = vmatprep.mubr.msk.bf16.mxu0 %vm1326_vm5, %v5921_v45  ;;  %v2418_v8 = vrot.slane %v2417_v23, 4  ;;  %v7870_v52 = vsel %vm7385_vm12, %v5935_v51, %v2668_v59  ;;  %v2622_v62 = vld [vmem:[#allocation2 + $0x28] sm:$0xe]  ;;  %v5937_v55 = vrot.slane %v2620_v15, 9  ;;  %v2676_v49 = vrot.slane %v7730_v37, 5 }
 0x185   : > { %v2409_v40 = vsel %vm7396_vm14, %v2404_v42, %v2408_v27  ;;  %v7874_v2 = vsel %vm7385_vm12, %v5936_v60, %v2672_v4  ;;  %v5938_v47 = vrot.slane %v2621_v16, 9  ;;  %v2680_v20 = vrot.slane %v7732_v39, 5  ;;  %v6963_v37 = vld [vmem:[#allocation2 + $0x18] ss:$8 sps:$4 sm:$0xff]   ;;  %v6964_v18 = vld [vmem:[#allocation2 + $0x28] ss:$8 sps:$4 sm:$0xff]  }
 0x186   : > { %v2423_v44 = vsel %vm7396_vm14, %v2418_v8, %v2422_v36  ;;  %v5959_v54 = vcombine.low %v7870_v52, %v7874_v2  ;;  %v5939_v25 = vrot.slane %v2622_v62, 9  ;;  %v2684_v30 = vrot.slane %v7735_v61, 5  ;;  %v2624_v61 = vld [vmem:[#allocation2 + $0x38] sm:$0xe]  ;;  %v2627_v24 = vld [vmem:[#allocation2 + $0x50] sm:$0xe] }
 0x187   : > { %v5922_v12 = vcombine.low %v2409_v40, %v2423_v44  ;;  %6561 = vmatmul.mubr.msk.bf16.gmra.mxu1 %vm1326_vm5, %v5822_v10  ;;  %v5940_v50 = vrot.slane %v2623_v38, 9  ;;  %v7887_v32 = vsel %vm7385_vm12, %v5937_v55, %v2676_v49  ;;  %v7891_v57 = vsel %vm7385_vm12, %v5938_v47, %v2680_v20  ;;  %v6961_v35 = vld [vmem:[#allocation2 + $0x30] ss:$8 sps:$4 sm:$0xff]   ;;  %v6974_v45 = vld [vmem:[%s9061_s3 + $0xa8] sm:$0xff]   ;;  %v6980_v36 = vld [vmem:[%s9061_s3 + $0xa0] sm:$0xff]  }
 0x188   : > { %6596 = vmatprep.mubr.msk.bf16.mxu1 %vm1326_vm5, %v6959_v0  ;;  %v2688_v33 = vrot.slane %v7742_v53, 5  ;;  %v5960_v39 = vcombine.low %v7887_v32, %v7891_v57  ;;  %v7901_v9 = vsel %vm7385_vm12, %v5939_v25, %v2684_v30  ;;  %v2626_v53 = vld [vmem:[#allocation2 + $0x48] sm:$0xe]  ;;  %v5941_v43 = vrot.slane %v2624_v61, 9  ;;  %v6968_v8 = vld [vmem:[#allocation2 + $0x38] ss:$8 sps:$4 sm:$0xff]  }
 0x189   : > { %6633 = vmatmul.mubr.msk.bf16.gmra.mxu0 %vm1326_vm5, %v5922_v12  ;;  %v2692_v6 = vrot.slane %v7751_v41, 5  ;;  %v5942_v42 = vrot.slane %v2625_v26, 9  ;;  %v2696_v23 = vrot.slane %v7758_v1, 5  ;;  %v5943_v51 = vrot.slane %v2626_v53, 9  ;;  %v6978_v41 = vld [vmem:[%s9061_s3 + $0x108] sm:$0xff]   ;;  %v6979_v44 = vld [vmem:[%s9061_s3 + $0x100] sm:$0xff]  }
 0x18a   : > { %6668 = vmatprep.mubr.msk.bf16.mxu0 %vm1326_vm5, %v6955_v13  ;;  %v7905_v34 = vsel %vm7385_vm12, %v5940_v50, %v2688_v33  ;;  %v5944_v59 = vrot.slane %v2627_v24, 9  ;;  %v2704_v27 = vrot.slane %v7772_v31, 5  ;;  %v2629_v31 = vld [vmem:[#allocation2 + $0x60] sm:$0xe]  ;;  %v6969_v40 = vld [vmem:[#allocation2 + $0x48] ss:$8 sps:$4 sm:$0xff]  }
 0x18b   : > { %v5961_v3 = vcombine.low %v7901_v9, %v7905_v34  ;;  %v7929_v60 = vsel %vm7385_vm12, %v5941_v43, %v2692_v6  ;;  %v7933_v1 = vsel %vm7385_vm12, %v5942_v42, %v2696_v23  ;;  %v6965_v15 = vld [vmem:[#allocation2 + $0x40] ss:$8 sps:$4 sm:$0xff]   ;;  %v2708_v12 = vrot.slane %v7793_v46, 5  ;;  %v395_v62 = vld [vmem:[#allocation2 + $0x8c] sm:$0x1]  ;;  %v7962_v49 = vld [vmem:[%s9061_s3 + $0xf8] sm:$0xff]  }
 0x18c   : > { %v7947_v10 = vsel %vm7385_vm12, %v5944_v59, %v2704_v27  ;;  %v6966_v13 = vld [vmem:[#allocation2 + $0x50] ss:$8 sps:$4 sm:$0xff]   ;;  %v5946_v38 = vrot.slane %v2629_v31, 9  ;;  %v2712_v55 = vrot.slane %v7800_v58, 5  ;;  %v2633_v20 = vld [vmem:[#allocation2 + $0x80] sm:$0xe] }
 0x18d   : > { %v2632_v47 = vld [vmem:[#allocation2 + $0x78] sm:$0xe]  ;;  %v396_v25 = vsel %vm7236_vm4, 0, %v395_v62  ;;  %v7978_v61 = vld [vmem:[#allocation2 + $0x14] sm:$0x1]  ;;  %v2728_v26 = vrot.slane %v7845_v29, 5 }
 0x18e   : > { %v7971_v58 = vsel %vm7385_vm12, %v5946_v38, %v2712_v55  ;;  %397 = vst [vmem:[#allocation2 + $0x8c] sm:$0x1] %v396_v25  ;;  %v6975_v50 = vld [vmem:[#allocation2 + $0x58] ss:$8 sps:$4 sm:$0xff]   ;;  %v5949_v33 = vrot.slane %v2632_v47, 9  ;;  %v3651_v43 = vrot.slane %v7978_v61, 5 }
 0x18f   : > { %6597 = vmatmul.mubr.msk.bf16.vlgmr.msra.gmra.mxu1 %vm1326_vm5, %v6963_v37  ;;  %v2724_v37 = vrot.slane %v7843_v22, 5  ;;  %v6970_v53 = vld [vmem:[#allocation2 + $0x60] ss:$8 sps:$4 sm:$0xff]   ;;  %v3605_v59 = vld [vmem:[#allocation2 + $0x30] sm:$0xe]  ;;  %vm399_vm3 = vcmask 1040384  }
 0x190   : > { %6637 = vmatpush3.bf16.msra.mxu1 %v7831_v63  ;;  %6600 = vmatprep.mubr.msk.bf16.mxu1 %vm1326_vm5, %v6964_v18  ;;  %v2700_v63 = vrot.slane %v7763_v19, 5  ;;  %v5962_v19 = vcombine.low %v7929_v60, %v7933_v1  ;;  %v3601_v18 = vld [vmem:[#allocation2 + $0x10] sm:$0xe]  ;;  %v3604_v42 = vld [vmem:[#allocation2 + $0x28] sm:$0xe]  ;;  %vm8232_vm4 = vmand %vm399_vm3, %vm286_vm1  ;;  %vm4139_vm1 = vcmask 1043456  }
 0x191   : > { %6669 = vmatmul.mubr.msk.bf16.vlgmr.msra.gmra.mxu0 %vm1326_vm5, %v6960_v28  ;;  %6638 = vmatprep.subr.bf16.mxu1 %v6967_v5  ;;  %v7983_v28 = vld [vmem:[#allocation2 + $0x1c] sm:$0x1]  ;;  %v7987_v24 = vsel %vm7385_vm12, %v5949_v33, %v2724_v37  ;;  %v6035_v29 = vrot.slane %v3601_v18, 9  ;;  %v8004_v27 = vld [vmem:[#allocation2 + $0x24] sm:$0x1]  ;;  %v6984_v9 = vld [vmem:[%s9061_s3 + $0xe8] sm:$0xff]  }
 0x192   : > { %6672 = vmatprep.mubr.msk.bf16.mxu0 %vm1326_vm5, %v6961_v35  ;;  %6709 = vmatpush3.bf16.msra.mxu0 %v7823_v17  ;;  %v2628_v17 = vld [vmem:[#allocation2 + $0x58] sm:$0xe]  ;;  %v7943_v4 = vsel %vm7385_vm12, %v5943_v51, %v2700_v63  ;;  %v3655_v51 = vrot.slane %v7983_v28, 5  ;;  %v8002_v63 = vld [vmem:[#allocation2 + $0x34] sm:$0x1]  ;;  %vm8624_vm11 = vmand %vm4139_vm1, %vm342_vm2 }
 0x193   : > { %6710 = vmatprep.subr.bf16.mxu0 %v6973_v7  ;;  %v5963_v0 = vcombine.low %v7943_v4, %v7947_v10  ;;  %v5945_v16 = vrot.slane %v2628_v17, 9  ;;  %v6972_v35 = vld [vmem:[#allocation2 + $0x70] ss:$8 sps:$4 sm:$0xff]   ;;  %v3652_v17 = vsel %vm7385_vm12, %v6035_v29, %v3651_v43  ;;  %v8012_v62 = vld [vmem:[#allocation2 + $0x44] sm:$0x1]  ;;  %v3193_v10 = vshll.u32 %v7978_v61, 16 }
 0x194   : > { %6639 = vmatpush3.bf16.msra.mxu1 %v6967_v5  ;;  %v5950_v5 = vrot.slane %v2633_v20, 9  ;;  %v3606_v31 = vld [vmem:[#allocation2 + $0x38] sm:$0xe]  ;;  %v8016_v38 = vld [vmem:[#allocation2 + $0x4c] sm:$0x1]  ;;  %v3249_v14 = vshll.u32 %v8002_v63, 16 }
 0x195   : > { %6640 = vmatprep.subr.bf16.mxu1 %v6974_v45  ;;  %v7967_v46 = vsel %vm7385_vm12, %v5945_v16, %v2708_v12  ;;  %v6039_v16 = vrot.slane %v3605_v59, 9  ;;  %v3667_v12 = vrot.slane %v8002_v63, 5  ;;  %v3607_v55 = vld [vmem:[#allocation2 + $0x40] sm:$0xe]  ;;  %v3608_v47 = vld [vmem:[#allocation2 + $0x48] sm:$0xe] }
 0x196   : > { %6711 = vmatpush3.bf16.msra.mxu0 %v6973_v7  ;;  %v5964_v30 = vcombine.low %v7967_v46, %v7971_v58  ;;  %v3602_v7 = vld [vmem:[#allocation2 + $0x18] sm:$0xe]  ;;  %v7991_v22 = vsel %vm7385_vm12, %v5950_v5, %v2728_v26  ;;  %v8019_v25 = vld [vmem:[#allocation2 + $0x54] sm:$0x1]  ;;  %v3609_v33 = vld [vmem:[#allocation2 + $0x50] sm:$0xe] }
 0x197   : > { %6601 = vmatmul.mubr.msk.bf16.gmra.mxu1 %vm1326_vm5, %v6968_v8  ;;  %6712 = vmatprep.subr.bf16.mxu0 %v6978_v41  ;;  %v5966_v6 = vcombine.low %v7987_v24, %v7991_v22  ;;  %v6036_v23 = vrot.slane %v3602_v7, 9  ;;  %v3603_v8 = vld [vmem:[#allocation2 + $0x20] sm:$0xe]  ;;  %v3659_v5 = vrot.slane %v8004_v27, 5  ;;  %v6040_v18 = vrot.slane %v3606_v31, 9 }
 0x198   : > { %6604 = vmatprep.mubr.msk.bf16.mxu1 %vm1326_vm5, %v6969_v40  ;;  %6641 = vmatpush3.bf16.msra.mxu1 %v6974_v45  ;;  %v7998_v45 = vld [vmem:[#allocation2 + $0x2c] sm:$0x1]  ;;  %v6977_v40 = vld [vmem:[#allocation2 + $0x80] ss:$8 sps:$4 sm:$0xff]   ;;  %v6037_v37 = vrot.slane %v3603_v8, 9  ;;  %v3668_v7 = vsel %vm7385_vm12, %v6039_v16, %v3667_v12  ;;  %v6041_v2 = vrot.slane %v3607_v55, 9 }
 0x199   : > { %6673 = vmatmul.mubr.msk.bf16.gmra.mxu0 %vm1326_vm5, %v6965_v15  ;;  %6642 = vmatprep.subr.bf16.mxu1 %v6980_v36  ;;  %v3663_v15 = vrot.slane %v7998_v45, 5  ;;  %v3612_v52 = vld [vmem:[#allocation2 + $0x68] sm:$0xe]  ;;  %v6042_v29 = vrot.slane %v3608_v47, 9  ;;  %v3679_v43 = vrot.slane %v8016_v38, 5 }
 0x19a   : > { %6676 = vmatprep.mubr.msk.bf16.mxu0 %vm1326_vm5, %v6966_v13  ;;  %6713 = vmatpush3.bf16.msra.mxu0 %v6978_v41  ;;  %v6981_v41 = vld [vmem:[#allocation2 + $0x78] ss:$8 sps:$4 sm:$0xff]   ;;  %v3656_v13 = vsel %vm7385_vm12, %v6036_v23, %v3655_v51  ;;  %v6043_v23 = vrot.slane %v3609_v33, 9  ;;  %v3683_v51 = vrot.slane %v8019_v25, 5  ;;  %v3660_v8 = vsel %vm7385_vm12, %v6037_v37, %v3659_v5  ;;  %v3151_v55 = vld [vmem:[#allocation2 + $0x10] sm:$0xf] }
 0x19b   : > { %6714 = vmatprep.subr.bf16.mxu0 %v6979_v44  ;;  %v6059_v20 = vcombine.low %v3652_v17, %v3656_v13  ;;  %v3613_v17 = vld [vmem:[#allocation2 + $0x70] sm:$0xe]  ;;  %v8052_v13 = vld [vmem:[#allocation2 + $0x7c] sm:$0x1]  ;;  %v3153_v47 = vld [vmem:[#allocation2 + $0x18] sm:$0xf] }
 0x19c   : > { %6643 = vmatpush3.bf16.msra.mxu1 %v6980_v36  ;;  %v8008_v36 = vld [vmem:[#allocation2 + $0x3c] sm:$0x1]  ;;  %v3614_v37 = vld [vmem:[#allocation2 + $0x78] sm:$0xe]  ;;  %v6047_v5 = vrot.slane %v3613_v17, 9  ;;  %v3184_v32 = vshrl.u32 %v3151_v55, 16 }
 0x19d   : > { %6684 = vmatprep.subr.bf16.mxu1 %v7962_v49  ;;  %v3671_v26 = vrot.slane %v8008_v36, 5  ;;  %v2631_v17 = vld [vmem:[#allocation2 + $0x70] sm:$0xe]  ;;  %v3187_v57 = vshll.u32 %v3151_v55, 16  ;;  %v3615_v55 = vld [vmem:[#allocation2 + $0x80] sm:$0xe] }
 0x19e   : > { %6715 = vmatpush3.bf16.msra.mxu0 %v6979_v44  ;;  %v6038_v44 = vrot.slane %v3604_v42, 9  ;;  %v8039_v42 = vld [vmem:[#allocation2 + $0x74] sm:$0x1]  ;;  %v3171_v24 = vld [vmem:[#allocation2 + $0x60] sm:$0xf] }
 0x19f   : > { %6605 = vmatmul.mubr.msk.bf16.gmra.mxu1 %vm1326_vm5, %v6975_v50  ;;  %v8021_v50 = vld [vmem:[#allocation2 + $0x5c] sm:$0x1]  ;;  %v3672_v31 = vsel %vm7385_vm12, %v6040_v18, %v3671_v26  ;;  %v3699_v18 = vrot.slane %v8039_v42, 5 }
 0x1a0   : > { %6608 = vmatprep.mubr.msk.bf16.mxu1 %vm1326_vm5, %v6976_v11  ;;  %v3610_v11 = vld [vmem:[#allocation2 + $0x58] sm:$0xe]  ;;  %v6061_v12 = vcombine.low %v3668_v7, %v3672_v31  ;;  %v2720_v31 = vrot.slane %v7826_v48, 5  ;;  %v6985_v48 = vld [vmem:[%s9061_s3 + $0xe0] sm:$0xff]  }
 0x1a1   : > { %6677 = vmatmul.mubr.msk.bf16.gmra.mxu0 %vm1326_vm5, %v6970_v53  ;;  %v3664_v53 = vsel %vm7385_vm12, %v6038_v44, %v3663_v15  ;;  %v6044_v59 = vrot.slane %v3610_v11, 9  ;;  %v8050_v44 = vld [vmem:[#allocation2 + $0x64] sm:$0x1]  ;;  %v3611_v15 = vld [vmem:[#allocation2 + $0x60] sm:$0xe]  ;;  %v3680_v11 = vsel %vm7385_vm12, %v6042_v29, %v3679_v43 }
 0x1a2   : > { %6680 = vmatprep.mubr.msk.bf16.mxu0 %vm1326_vm5, %v6972_v35  ;;  %v8034_v35 = vld [vmem:[#allocation2 + $0x6c] sm:$0x1]  ;;  %v6060_v16 = vcombine.low %v3660_v8, %v3664_v53  ;;  %v8066_v53 = vsel %vm7385_vm12, %v6043_v23, %v3683_v51  ;;  %v6045_v29 = vrot.slane %v3611_v15, 9  ;;  %v3691_v43 = vrot.slane %v8050_v44, 5 }
 0x1a3   : > { %v3695_v33 = vrot.slane %v8034_v35, 5  ;;  %v6048_v23 = vrot.slane %v3614_v37, 9  ;;  %v3703_v51 = vrot.slane %v8052_v13, 5  ;;  %v5948_v8 = vrot.slane %v2631_v17, 9 }
 0x1a7   : > { %6609 = vmatmul.mubr.msk.bf16.gmra.mxu1 %vm1326_vm5, %v6981_v41  ;;  %v3687_v41 = vrot.slane %v8021_v50, 5 }
 0x1a8   : > { %6644 = vmatprep.mubr.msk.bf16.mxu1 %vm1326_vm5, %v5959_v54  ;;  %v3675_v54 = vrot.slane %v8012_v62, 5 }
 0x1a9   : > { %6681 = vmatmul.mubr.msk.bf16.gmra.mxu0 %vm1326_vm5, %v6977_v40  ;;  %v6983_v40 = vld [vmem:[%s9061_s3 + $0xf0] sm:$0xff]   ;;  %v8070_v7 = vsel %vm7385_vm12, %v6044_v59, %v3687_v41  ;;  %v2716_v59 = vrot.slane %v7818_v56, 5  ;;  %v3155_v41 = vld [vmem:[#allocation2 + $0x20] sm:$0xf]  ;;  %v8102_v56 = vld [vmem:[#allocation2 + $0x84] sm:$0x1] }
 0x1aa   : > { %6716 = vmatprep.mubr.msk.bf16.mxu0 %vm1326_vm5, %v6059_v20  ;;  %v6046_v20 = vrot.slane %v3612_v52, 9  ;;  %v3676_v26 = vsel %vm7385_vm12, %v6041_v2, %v3675_v54  ;;  %v2630_v52 = vld [vmem:[#allocation2 + $0x68] sm:$0xe]  ;;  %v3201_v2 = vshll.u32 %v3153_v47, 16  ;;  %v6063_v17 = vcombine.low %v8066_v53, %v8070_v7 }
 0x1ab   : > { %v3157_v54 = vld [vmem:[#allocation2 + $0x28] sm:$0xf]  ;;  %v2721_v53 = vsel %vm7385_vm12, %v5948_v8, %v2720_v31  ;;  %v3707_v60 = vrot.slane %v8102_v56, 5  ;;  %v3221_v8 = vshll.u32 %v8004_v27, 16 }
 0x1ac   : > { %v8086_v34 = vsel %vm7385_vm12, %v6046_v20, %v3695_v33  ;;  %v3226_v15 = vshrl.u32 %v3157_v54, 16  ;;  %v3203_v20 = vrot.slane %v3201_v2, 5  ;;  %v8096_v33 = vsel %vm7385_vm12, %v6045_v29, %v3691_v43  ;;  %v3161_v29 = vld [vmem:[#allocation2 + $0x38] sm:$0xf]  ;;  %v3616_v7 = vld [vmem:[#allocation2 + $0x88] sm:$0xe] }
 0x1ad   : > { %v8127_v43 = vld [vmem:[#allocation2 + $0x8c] sm:$0x1] }
 0x1af   : > { %6645 = vmatmul.mubr.msk.bf16.vlgmr.msra.gmra.mxu1 %vm1326_vm5, %v5960_v39  ;;  %v3198_v39 = vshrl.u32 %v3153_v47, 16  ;;  %v3189_v47 = vrot.slane %v3187_v57, 5 }
 0x1b0   : > { %6685 = vmatpush3.bf16.msra.mxu1 %v7962_v49  ;;  %6648 = vmatprep.mubr.msk.bf16.mxu1 %vm1326_vm5, %v5961_v3  ;;  %v8090_v3 = vsel %vm7385_vm12, %v6047_v5, %v3699_v18  ;;  %v5947_v49 = vrot.slane %v2630_v52, 9  ;;  %v8100_v5 = vsel %vm7385_vm12, %v6048_v23, %v3703_v51  ;;  %v3215_v18 = vshll.u32 %v3155_v41, 16 }
 0x1b1   : > { %6717 = vmatmul.mubr.msk.bf16.vlgmr.msra.gmra.mxu0 %vm1326_vm5, %v6060_v16  ;;  %6686 = vmatprep.subr.bf16.mxu1 %v6983_v40  ;;  %v3229_v16 = vshll.u32 %v3157_v54, 16  ;;  %v3200_v37 = vrot.slane %v3198_v39, 4  ;;  %v6062_v52 = vcombine.low %v3676_v26, %v3680_v11  ;;  %v6065_v57 = vcombine.low %v8090_v3, %v8100_v5  ;;  %v3159_v39 = vld [vmem:[#allocation2 + $0x30] sm:$0xf] }
 0x1b2   : > { %6720 = vmatprep.mubr.msk.bf16.mxu0 %vm1326_vm5, %v6061_v12  ;;  %v3186_v12 = vrot.slane %v3184_v32, 4  ;;  %v6064_v32 = vcombine.low %v8096_v33, %v8086_v34  ;;  %v2717_v2 = vsel %vm7385_vm12, %v5947_v49, %v2716_v59  ;;  %v6049_v54 = vrot.slane %v3615_v55, 9  ;;  %v3167_v33 = vld [vmem:[#allocation2 + $0x50] sm:$0xf] }
 0x1b3   : > { %v3228_v26 = vrot.slane %v3226_v15, 4  ;;  %v3231_v11 = vrot.slane %v3229_v16, 5  ;;  %v3217_v51 = vrot.slane %v3215_v18, 5  ;;  %v3240_v34 = vshrl.u32 %v3159_v39, 16 }
 0x1b4   : > { %6687 = vmatpush3.bf16.msra.mxu1 %v6983_v40  ;;  %v3212_v40 = vshrl.u32 %v3155_v41, 16  ;;  %v3190_v1 = vor.u32 %v3189_v47, %v3186_v12  ;;  %v3243_v4 = vshll.u32 %v3159_v39, 16  ;;  %v3257_v49 = vshll.u32 %v3161_v29, 16  ;;  %v3165_v47 = vld [vmem:[#allocation2 + $0x48] sm:$0xf] }
 0x1b5   : > { %6688 = vmatprep.subr.bf16.mxu1 %v6984_v9  ;;  %v5965_v59 = vcombine.low %v2717_v2, %v2721_v53  ;;  %v6050_v41 = vrot.slane %v3616_v7, 9  ;;  %v3232_v31 = vor.u32 %v3231_v11, %v3228_v26  ;;  %v8135_v15 = vsel %vm7385_vm12, %v6049_v54, %v3707_v60  ;;  %v3163_v39 = vld [vmem:[#allocation2 + $0x40] sm:$0xf]  ;;  %v3169_v7 = vld [vmem:[#allocation2 + $0x58] sm:$0xf] }
 0x1b6   : > { %v3214_v23 = vrot.slane %v3212_v40, 4  ;;  %v3711_v16 = vrot.slane %v8127_v43, 5  ;;  %v3191_v55 = vrot.slane %v3190_v1, 4  ;;  %v3195_v40 = vrot.slane %v3193_v10, 5 }
 0x1b7   : > { %6649 = vmatmul.mubr.msk.bf16.gmra.mxu1 %vm1326_vm5, %v5962_v19  ;;  %v3204_v19 = vor.u32 %v3203_v20, %v3200_v37  ;;  %v3242_v37 = vrot.slane %v3240_v34, 4  ;;  %v3245_v20 = vrot.slane %v3243_v4, 5  ;;  %v3282_v2 = vshrl.u32 %v3165_v47, 16 }
 0x1b8   : > { %6652 = vmatprep.mubr.msk.bf16.mxu1 %vm1326_vm5, %v5963_v0  ;;  %6689 = vmatpush3.bf16.msra.mxu1 %v6984_v9  ;;  %v3207_v0 = vshll.u32 %v7983_v28, 16  ;;  %v3254_v9 = vshrl.u32 %v3161_v29, 16  ;;  %v3218_v61 = vor.u32 %v3217_v51, %v3214_v23  ;;  %v3235_v28 = vshll.u32 %v7998_v45, 16 }
 0x1b9   : > { %6721 = vmatmul.mubr.msk.bf16.gmra.mxu0 %vm1326_vm5, %v6062_v52  ;;  %6690 = vmatprep.subr.bf16.mxu1 %v6985_v48  ;;  %v3205_v12 = vrot.slane %v3204_v19, 4  ;;  %v3259_v52 = vrot.slane %v3257_v49, 5  ;;  %v3285_v54 = vshll.u32 %v3165_v47, 16  ;;  %v3712_v45 = vsel %vm7385_vm12, %v6050_v41, %v3711_v16 }
 0x1ba   : > { %6724 = vmatprep.mubr.msk.bf16.mxu0 %vm1326_vm5, %v6063_v17  ;;  %v3209_v18 = vrot.slane %v3207_v0, 5  ;;  %v3256_v27 = vrot.slane %v3254_v9, 4  ;;  %v3223_v17 = vrot.slane %v3221_v8, 5  ;;  %v3196_v26 = vsel %vm7396_vm14, %v3191_v55, %v3195_v40  ;;  %v3173_v8 = vld [vmem:[#allocation2 + $0x68] sm:$0xf] }
 0x1bb   : > { %v3296_v11 = vshrl.u32 %v3167_v33, 16  ;;  %v3299_v29 = vshll.u32 %v3167_v33, 16  ;;  %v3219_v58 = vrot.slane %v3218_v61, 4  ;;  %v3246_v53 = vor.u32 %v3245_v20, %v3242_v37  ;;  %v3175_v37 = vld [vmem:[#allocation2 + $0x70] sm:$0xf] }
 0x1bc   : > { %6691 = vmatpush3.bf16.msra.mxu1 %v6985_v48  ;;  %v3233_v48 = vrot.slane %v3232_v31, 4  ;;  %v3210_v46 = vsel %vm7396_vm14, %v3205_v12, %v3209_v18  ;;  %v3260_v60 = vor.u32 %v3259_v52, %v3256_v27  ;;  %v3268_v1 = vshrl.u32 %v3163_v39, 16  ;;  %v3177_v27 = vld [vmem:[#allocation2 + $0x78] sm:$0xf] }
 0x1bd   : > { %v3271_v19 = vshll.u32 %v3163_v39, 16  ;;  %v3263_v23 = vshll.u32 %v8008_v36, 16  ;;  %v3284_v51 = vrot.slane %v3282_v2, 4  ;;  %v3287_v34 = vrot.slane %v3285_v54, 5 }
 0x1be   : > { %v3298_v4 = vrot.slane %v3296_v11, 4  ;;  %v3301_v10 = vrot.slane %v3299_v29, 5  ;;  %v3310_v0 = vshrl.u32 %v3169_v7, 16  ;;  %v3313_v9 = vshll.u32 %v3169_v7, 16  ;;  %v3179_v7 = vld [vmem:[#allocation2 + $0x80] sm:$0xf] }
 0x1bf   : > { %6653 = vmatmul.mubr.msk.bf16.gmra.mxu1 %vm1326_vm5, %v5964_v30  ;;  %v3237_v30 = vrot.slane %v3235_v28, 5  ;;  %v6015_v49 = vcombine.low %v3196_v26, %v3210_v46  ;;  %v3224_v3 = vsel %vm7396_vm14, %v3219_v58, %v3223_v17  ;;  %v3247_v5 = vrot.slane %v3246_v53, 4 }
 0x1c0   : > { %6656 = vmatprep.mubr.msk.bf16.mxu1 %vm1326_vm5, %v5965_v59  ;;  %v3261_v63 = vrot.slane %v3260_v60, 4  ;;  %v3273_v59 = vrot.slane %v3271_v19, 5  ;;  %v3291_v41 = vshll.u32 %v8016_v38, 16  ;;  %v6066_v31 = vcombine.low %v8135_v15, %v3712_v45 }
 0x1c1   : > { %6725 = vmatmul.mubr.msk.bf16.gmra.mxu0 %vm1326_vm5, %v6064_v32  ;;  %v3238_v32 = vsel %vm7396_vm14, %v3233_v48, %v3237_v30  ;;  %v3251_v16 = vrot.slane %v3249_v14, 5  ;;  %v3288_v55 = vor.u32 %v3287_v34, %v3284_v51  ;;  %v3265_v12 = vrot.slane %v3263_v23, 5 }
 0x1c2   : > { %6728 = vmatprep.mubr.msk.bf16.mxu0 %vm1326_vm5, %v6065_v57  ;;  %v3270_v57 = vrot.slane %v3268_v1, 4  ;;  %v6016_v36 = vcombine.low %v3224_v3, %v3238_v32  ;;  %v3302_v47 = vor.u32 %v3301_v10, %v3298_v4  ;;  %v3312_v61 = vrot.slane %v3310_v0, 4  ;;  %v3181_v1 = vld [vmem:[#allocation2 + $0x88] sm:$0xf] }
 0x1c3   : > { %v3315_v28 = vrot.slane %v3313_v9, 5  ;;  %v3252_v38 = vsel %vm7396_vm14, %v3247_v5, %v3251_v16  ;;  %v3277_v15 = vshll.u32 %v8012_v62, 16  ;;  %v3338_v22 = vshrl.u32 %v3173_v8, 16 }
 0x1c4   : > { %v3266_v20 = vsel %vm7396_vm14, %v3261_v63, %v3265_v12  ;;  %v3274_v33 = vor.u32 %v3273_v59, %v3270_v57  ;;  %v3293_v40 = vrot.slane %v3291_v41, 5  ;;  %v3305_v18 = vshll.u32 %v8019_v25, 16 }
 0x1c5   : > { %v3289_v52 = vrot.slane %v3288_v55, 4  ;;  %v3319_v17 = vshll.u32 %v8021_v50, 16  ;;  %v3352_v48 = vshrl.u32 %v3175_v37, 16  ;;  %v3355_v39 = vshll.u32 %v3175_v37, 16 }
 0x1c6   : > { %v3303_v2 = vrot.slane %v3302_v47, 4  ;;  %v3316_v54 = vor.u32 %v3315_v28, %v3312_v61  ;;  %v3324_v45 = vshrl.u32 %v3171_v24, 16  ;;  %v3327_v62 = vshll.u32 %v3171_v24, 16 }
 0x1c7   : > { %6657 = vmatmul.mubr.msk.bf16.gmra.mxu1 %vm1326_vm5, %v5966_v6  ;;  %v3341_v6 = vshll.u32 %v3173_v8, 16  ;;  %v3340_v26 = vrot.slane %v3338_v22, 4  ;;  %v3366_v29 = vshrl.u32 %v3177_v27, 16  ;;  %v3369_v46 = vshll.u32 %v3177_v27, 16 }
 0x1c8   : > { %6692 = vmatprep.mubr.msk.bf16.mxu1 %vm1326_vm5, %v6015_v49  ;;  %v6017_v58 = vcombine.low %v3252_v38, %v3266_v20  ;;  %v3275_v30 = vrot.slane %v3274_v33, 4  ;;  %v3279_v53 = vrot.slane %v3277_v15, 5  ;;  %v3294_v25 = vsel %vm7396_vm14, %v3289_v52, %v3293_v40 }
 0x1c9   : > { %6729 = vmatmul.mubr.msk.bf16.gmra.mxu0 %vm1326_vm5, %v6066_v31  ;;  %v3343_v11 = vrot.slane %v3341_v6, 5  ;;  %v3307_v50 = vrot.slane %v3305_v18, 5  ;;  %v3354_v14 = vrot.slane %v3352_v48, 4  ;;  %v3357_v60 = vrot.slane %v3355_v39, 5 }
 0x1ca   : > { %v3317_v19 = vrot.slane %v3316_v54, 4  ;;  %v3321_v32 = vrot.slane %v3319_v17, 5  ;;  %v3326_v23 = vrot.slane %v3324_v45, 4  ;;  %v3329_v51 = vrot.slane %v3327_v62, 5 }
 0x1cb   : > { %v3308_v34 = vsel %vm7396_vm14, %v3303_v2, %v3307_v50  ;;  %v3344_v4 = vor.u32 %v3343_v11, %v3340_v26  ;;  %v3368_v10 = vrot.slane %v3366_v29, 4  ;;  %v3371_v0 = vrot.slane %v3369_v46, 5 }
 0x1cc   : > { %v3380_v9 = vshrl.u32 %v3179_v7, 16  ;;  %v3383_v49 = vshll.u32 %v3179_v7, 16  ;;  %v3394_v3 = vshrl.u32 %v3181_v1, 16  ;;  %v3397_v5 = vshll.u32 %v3181_v1, 16 }
 0x1cd   : > { %v3280_v63 = vsel %vm7396_vm14, %v3275_v30, %v3279_v53  ;;  %v3333_v57 = vshll.u32 %v8050_v44, 16  ;;  %v3358_v59 = vor.u32 %v3357_v60, %v3354_v14  ;;  %v3322_v8 = vsel %vm7396_vm14, %v3317_v19, %v3321_v32 }
 0x1ce   : > { %v6018_v41 = vcombine.low %v3280_v63, %v3294_v25  ;;  %v3330_v31 = vor.u32 %v3329_v51, %v3326_v23  ;;  %v6019_v16 = vcombine.low %v3308_v34, %v3322_v8  ;;  %v3345_v55 = vrot.slane %v3344_v4, 4 }
 0x1cf   : > { %6693 = vmatmul.mubr.msk.bf16.vlgmr.msra.gmra.mxu1 %vm1326_vm5, %v6016_v36  ;;  %v3347_v36 = vshll.u32 %v8034_v35, 16  ;;  %v3361_v12 = vshll.u32 %v8039_v42, 16  ;;  %v3372_v47 = vor.u32 %v3371_v0, %v3368_v10  ;;  %v3382_v61 = vrot.slane %v3380_v9, 4  ;;  %v434_v10 = vld [vmem:[#allocation4 + $0x8] sm:$0x1] }
 0x1d0   : > { %6696 = vmatprep.mubr.msk.bf16.mxu1 %vm1326_vm5, %v6017_v58  ;;  %v3385_v28 = vrot.slane %v3383_v49, 5  ;;  %v3396_v37 = vrot.slane %v3394_v3, 4  ;;  %v3399_v38 = vrot.slane %v3397_v5, 5  ;;  %v3359_v44 = vrot.slane %v3358_v59, 4 }
 0x1d1   : > { %v3375_v15 = vshll.u32 %v8052_v13, 16  ;;  %v3331_v24 = vrot.slane %v3330_v31, 4  ;;  %v3349_v22 = vrot.slane %v3347_v36, 5  ;;  %v3335_v6 = vrot.slane %v3333_v57, 5 }
 0x1d2   : > { %v3363_v35 = vrot.slane %v3361_v12, 5  ;;  %v3373_v20 = vrot.slane %v3372_v47, 4  ;;  %v3386_v33 = vor.u32 %v3385_v28, %v3382_v61  ;;  %v3400_v40 = vor.u32 %v3399_v38, %v3396_v37  ;;  %v410_v12 = vld [vmem:[#allocation3 + $0x10] sm:$0x1]  ;;  %v407_v38 = vld [vmem:[#allocation3 + $0x8] sm:$0x1] }
 0x1d3   : > { %v3350_v42 = vsel %vm7396_vm14, %v3345_v55, %v3349_v22  ;;  %v3403_v18 = vshll.u32 %v8127_v43, 16  ;;  %v3377_v52 = vrot.slane %v3375_v15, 5  ;;  %v3336_v13 = vsel %vm7396_vm14, %v3331_v24, %v3335_v6 }
 0x1d4   : > { %v3364_v27 = vsel %vm7396_vm14, %v3359_v44, %v3363_v35  ;;  %v3389_v17 = vshll.u32 %v8102_v56, 16  ;;  %v6020_v48 = vcombine.low %v3336_v13, %v3350_v42  ;;  %v3387_v54 = vrot.slane %v3386_v33, 4  ;;  %v440_v35 = vld [vmem:[#allocation4 + $0x18] sm:$0x1] }
 0x1d5   : > { %v3378_v39 = vsel %vm7396_vm14, %v3373_v20, %v3377_v52  ;;  %v3401_v45 = vrot.slane %v3400_v40, 4  ;;  %v3405_v62 = vrot.slane %v3403_v18, 5  ;;  %v9082_v0 = vmov 0  ;;  %v437_v18 = vld [vmem:[#allocation4 + $0x10] sm:$0x1] }
 0x1d6   : > { %v6021_v2 = vcombine.low %v3364_v27, %v3378_v39  ;;  %v3391_v43 = vrot.slane %v3389_v17, 5  ;;  %v9083_v0 = vsel %vm8232_vm4, 4294967295, %v9082_v0  ;;  %v435_v9 = vsel %vm8232_vm4, 0, %v434_v10  ;;  %v416_v17 = vld [vmem:[#allocation3 + $0x20] sm:$0x1] }
 0x1d7   : > { %6697 = vmatmul.mubr.msk.bf16.gmra.mxu1 %vm1326_vm5, %v6018_v41  ;;  %v3406_v11 = vsel %vm7396_vm14, %v3401_v45, %v3405_v62  ;;  %9084 = vst [vmem:[#allocation8_spill] sm:$0xff] %v9083_v0  ;;  %436 = vst [vmem:[#allocation4 + $0x8] sm:$0x1] %v435_v9  ;;  %v411_v28 = vsel %vm8232_vm4, 0, %v410_v12  ;;  %v408_v44 = vsel %vm8232_vm4, 0, %v407_v38  ;;  %v441_v20 = vsel %vm8232_vm4, 0, %v440_v35 }
 0x1d8   : > { %6700 = vmatprep.mubr.msk.bf16.mxu1 %vm1326_vm5, %v6019_v16  ;;  %v3392_v26 = vsel %vm7396_vm14, %v3387_v54, %v3391_v43  ;;  %v431_v16 = vld [vmem:[#allocation4] sm:$0x1]  ;;  %412 = vst [vmem:[#allocation3 + $0x10] sm:$0x1] %v411_v28  ;;  %409 = vst [vmem:[#allocation3 + $0x8] sm:$0x1] %v408_v44 }
 0x1d9   : > { %v6022_v56 = vcombine.low %v3392_v26, %v3406_v11  ;;  %v432_v55 = vsel %vm8232_vm4, 0, %v431_v16  ;;  %442 = vst [vmem:[#allocation4 + $0x18] sm:$0x1] %v441_v20  ;;  %v438_v13 = vsel %vm8232_vm4, 0, %v437_v18  ;;  %v417_v39 = vsel %vm8232_vm4, 0, %v416_v17  ;;  %v6986_v9 = vld [vmem:[%s9063_s5 + $0x38] sm:$0xff]  }
 0x1da   : > { %433 = vst [vmem:[#allocation4] sm:$0x1] %v432_v55  ;;  %439 = vst [vmem:[#allocation4 + $0x10] sm:$0x1] %v438_v13  ;;  %v413_v55 = vld [vmem:[#allocation3 + $0x18] sm:$0x1]  ;;  %6756 = vmatprep.subr.bf16.mxu0 %v6986_v9 }
 0x1db   : > { %418 = vst [vmem:[#allocation3 + $0x20] sm:$0x1] %v417_v39  ;;  %6757 = vmatpush3.bf16.msra.mxu0 %v6986_v9  ;;  %v446_v44 = vld [vmem:[#allocation4 + $0x28] sm:$0x1] }
 0x1df   : > { %6701 = vmatmul.mubr.msk.bf16.gmra.mxu1 %vm1326_vm5, %v6020_v48 }
 0x1e0   : > { %6704 = vmatprep.mubr.msk.bf16.mxu1 %vm1326_vm5, %v6021_v2 }
 0x1e7   : > { %6705 = vmatmul.mubr.msk.bf16.gmra.mxu1 %vm1326_vm5, %v6022_v56 }
 0x1ef   : > { %v8209_v29 = vpop.f32.mrf.mxu0 }
 0x1f1   : > { %v8211_v46 = vpop.f32.mrf.mxu0 }
 0x1f3   : > { %v8213_v58 = vpop.f32.mrf.mxu0 }
 0x1f5   : > { %v8215_v30 = vpop.f32.mrf.mxu0 }
 0x1fb   : > { %v8217_v7 = vpop.f32.mrf.mxu0 }
 0x1fc   : > { %v6526_v53 = vpop.f32.mrf.mxu1 }
 0x1fd   : > { %v8219_v50 = vpop.f32.mrf.mxu0 }
 0x1fe   : > { %v1385_v25 = vpop.f32.mrf.mxu1 }
 0x1ff   : > { %v8221_v60 = vpop.f32.mrf.mxu0 }
 0x200   : > { %v6527_v14 = vpop.f32.mrf.mxu1 }
 0x201   : > { %v8223_v19 = vpop.f32.mrf.mxu0 }
 0x202   : > { %v1388_v1 = vpop.f32.mrf.mxu1 }
 0x207   : > { %v8225_v23 = vpop.f32.mrf.mxu0 }
 0x209   : > { %v8229_v4 = vpop.f32.mrf.mxu0 }
 0x20b   : > { %v6530_v32 = vpop.f32.mrf.mxu1  ;;  %v8240_v3 = vpop.f32.mrf.mxu0 }
 0x20d   : > { %v1401_v51 = vpop.f32.mrf.mxu1  ;;  %v8244_v63 = vpop.f32.mrf.mxu0 }
 0x20f   : > { %v8227_v34 = vpop.f32.mrf.mxu1 }
 0x211   : > { %v8238_v49 = vpop.f32.mrf.mxu1 }
 0x215   : > { %v8248_v59 = vpop.f32.mrf.mxu0 }
 0x216   : > { %v8242_v5 = vpop.f32.mrf.mxu1 }
 0x217   : > { %v8252_v8 = vpop.f32.mrf.mxu0 }
 0x218   : > { %v8246_v57 = vpop.f32.mrf.mxu1 }
 0x219   : > { %v8256_v36 = vpop.f32.mrf.mxu0 }
 0x21a   : > { %v8250_v41 = vpop.f32.mrf.mxu1 }
 0x21b   : > { %v8262_v61 = vpop.f32.mrf.mxu0 }
 0x21c   : > { %v8254_v31 = vpop.f32.mrf.mxu1 }
 0x227   : > { %v8260_v47 = vpop.f32.mrf.mxu1 }
 0x229   : > { %v8266_v37 = vpop.f32.mrf.mxu1 }
 0x22b   : > { %v8272_v24 = vpop.f32.mrf.mxu1 }
 0x22c   : > { %v8270_v15 = vpop.f32.mrf.mxu0 }
 0x22d   : > { %v8276_v6 = vpop.f32.mrf.mxu1 }
 0x22e   : > { %v8274_v22 = vpop.f32.mrf.mxu0 }
 0x22f   : > { %v6550_v33 = vpop.f32.mrf.mxu1 }
 0x230   : > { %v8280_v42 = vpop.f32.mrf.mxu0  ;;  %v8282_v40 = vadd.f32 %v6550_v33, %v6526_v53  ;;  %v447_v33 = vsel %vm8232_vm4, 0, %v446_v44 }
 0x231   : > { %v1570_v52 = vpop.f32.mrf.mxu1  ;;  %448 = vst [vmem:[#allocation4 + $0x28] sm:$0x1] %v447_v33 }
 0x232   : > { %v8284_v27 = vpop.f32.mrf.mxu0  ;;  %v8288_v48 = vadd.f32 %v1570_v52, %v1385_v25 }
 0x233   : > { %v6551_v2 = vpop.f32.mrf.mxu1 }
 0x234   : > { %v8292_v54 = vadd.f32 %v6551_v2, %v6527_v14  ;;  %v422_v2 = vld [vmem:[#allocation3 + $0x30] sm:$0x1] }
 0x235   : > { %v1573_v62 = vpop.f32.mrf.mxu1 }
 0x236   : > { %v8294_v45 = vpop.f32.mrf.mxu0  ;;  %v1574_v43 = vadd.f32 %v1573_v62, %v1388_v1  ;;  %v423_v62 = vsel %vm8232_vm4, 0, %v422_v2 }
 0x237   : > { %v6554_v11 = vpop.f32.mrf.mxu1  ;;  %424 = vst [vmem:[#allocation3 + $0x30] sm:$0x1] %v423_v62 }
 0x238   : > { %v8296_v26 = vpop.f32.mrf.mxu0  ;;  %v1595_v56 = vadd.f32 %v6554_v11, %v6530_v32  ;;  %v8299_v53 = vadd.f32 %v8215_v30, %v1574_v43  ;;  %v414_v30 = vsel %vm8232_vm4, 0, %v413_v55 }
 0x239   : > { %v1586_v10 = vpop.f32.mrf.mxu1  ;;  %415 = vst [vmem:[#allocation3 + $0x18] sm:$0x1] %v414_v30  ;;  %v419_v30 = vld [vmem:[#allocation3 + $0x28] sm:$0x1] }
 0x23a   : > { %v8301_v25 = vpop.f32.mrf.mxu0  ;;  %v1587_v14 = vadd.f32 %v1586_v10, %v1401_v51  ;;  %v8307_v16 = vadd.f32 %v8217_v7, %v1595_v56 }
 0x23b   : > { %v6555_v12 = vpop.f32.mrf.mxu1 }
 0x23c   : > { %v8309_v1 = vpop.f32.mrf.mxu0  ;;  %v1598_v32 = vadd.f32 %v6555_v12, %v8227_v34  ;;  %v8315_v28 = vadd.f32 %v8219_v50, %v1587_v14  ;;  %v6987_v50 = vld [vmem:[%s9063_s5 + $0x30] sm:$0xff]   ;;  %v443_v34 = vld [vmem:[#allocation4 + $0x20] sm:$0x1] }
 0x23d   : > { %v1589_v38 = vpop.f32.mrf.mxu1  ;;  %6758 = vmatprep.subr.bf16.mxu0 %v6987_v50 }
 0x23e   : > { %v1590_v51 = vadd.f32 %v1589_v38, %v8238_v49  ;;  %v8319_v7 = vadd.f32 %v8221_v60, %v1598_v32  ;;  %v444_v60 = vsel %vm8232_vm4, 0, %v443_v34  ;;  %6759 = vmatpush3.bf16.msra.mxu0 %v6987_v50 }
 0x23f   : > { %v6558_v20 = vpop.f32.mrf.mxu1  ;;  %445 = vst [vmem:[#allocation4 + $0x20] sm:$0x1] %v444_v60 }
 0x240   : > { %v8321_v35 = vpop.f32.mrf.mxu0  ;;  %v1611_v18 = vadd.f32 %v6558_v20, %v8242_v5  ;;  %v8330_v52 = vadd.f32 %v8223_v19, %v1590_v51 }
 0x241   : > { %v1602_v13 = vpop.f32.mrf.mxu1 }
 0x242   : > { %v8334_v49 = vpop.f32.mrf.mxu0  ;;  %v1603_v17 = vadd.f32 %v1602_v13, %v8246_v57  ;;  %v8338_v39 = vadd.f32 %v8225_v23, %v1611_v18  ;;  %v6990_v18 = vld [vmem:[%s9063_s5 + $0x20] sm:$0xff]   ;;  %v449_v13 = vld [vmem:[#allocation4 + $0x30] sm:$0x1] }
 0x243   : > { %v6559_v19 = vpop.f32.mrf.mxu1 }
 0x244   : > { %v8340_v5 = vpop.f32.mrf.mxu0  ;;  %v1614_v43 = vadd.f32 %v6559_v19, %v8250_v41  ;;  %v8346_v11 = vadd.f32 %v8229_v4, %v1603_v17  ;;  %v6988_v4 = vld [vmem:[%s9063_s5 + $0x28] sm:$0xff]  }
 0x245   : > { %v1605_v57 = vpop.f32.mrf.mxu1  ;;  %6760 = vmatprep.subr.bf16.mxu0 %v6988_v4 }
 0x246   : > { %v8348_v56 = vpop.f32.mrf.mxu0  ;;  %v1606_v23 = vadd.f32 %v1605_v57, %v8254_v31  ;;  %v8352_v10 = vadd.f32 %v8240_v3, %v1614_v43  ;;  %v6989_v31 = vld [vmem:[%s9063_s5 + $0x78] sm:$0xff]   ;;  %6761 = vmatpush3.bf16.msra.mxu0 %v6988_v4  ;;  %v428_v43 = vld [vmem:[#allocation3 + $0x40] sm:$0x1] }
 0x247   : > { %v6562_v9 = vpop.f32.mrf.mxu1  ;;  %6732 = vmatprep.subr.bf16.mxu1 %v6989_v31  ;;  %6762 = vmatprep.subr.bf16.mxu0 %v6990_v18  ;;  %v6992_v4 = vld [vmem:[%s9063_s5 + $0x18] sm:$0xff]  }
 0x248   : > { %v1627_v14 = vadd.f32 %v6562_v9, %v8260_v47  ;;  %v8356_v55 = vadd.f32 %v8244_v63, %v1606_v23  ;;  %v420_v63 = vsel %vm8232_vm4, 0, %v419_v30  ;;  %v452_v47 = vld [vmem:[#allocation4 + $0x38] sm:$0x1]  ;;  %6733 = vmatpush3.bf16.msra.mxu1 %v6989_v31  ;;  %v425_v31 = vld [vmem:[#allocation3 + $0x38] sm:$0x1] }
 0x249   : > { %v8361_v41 = vpop.f32.mrf.mxu0  ;;  %v1618_v12 = vpop.f32.mrf.mxu1  ;;  %421 = vst [vmem:[#allocation3 + $0x28] sm:$0x1] %v420_v63  ;;  %v453_v44 = vsel %vm8232_vm4, 0, %v452_v47  ;;  %v426_v63 = vsel %vm8232_vm4, 0, %v425_v31  ;;  %v6994_v47 = vld [vmem:[%s9063_s5 + $0x10] sm:$0xff]  }
 0x24a   : > { %v1619_v3 = vadd.f32 %v1618_v12, %v8266_v37  ;;  %v8368_v32 = vadd.f32 %v8248_v59, %v1627_v14  ;;  %454 = vst [vmem:[#allocation4 + $0x38] sm:$0x1] %v453_v44  ;;  %6763 = vmatpush3.bf16.msra.mxu0 %v6990_v18  ;;  %v6993_v12 = vld [vmem:[%s9063_s5 + $0x68] sm:$0xff]   ;;  %427 = vst [vmem:[#allocation3 + $0x38] sm:$0x1] %v426_v63  ;;  %v6997_v18 = vld [vmem:[%s9063_s5 + $0x58] sm:$0xff]  }
 0x24b   : > { %v8372_v38 = vpop.f32.mrf.mxu0  ;;  %v6563_v51 = vpop.f32.mrf.mxu1  ;;  %6764 = vmatprep.subr.bf16.mxu0 %v6992_v4  ;;  %v404_v44 = vld [vmem:[#allocation3] sm:$0x1] }
 0x24c   : > { %v1630_v20 = vadd.f32 %v6563_v51, %v8272_v24  ;;  %v8378_v37 = vadd.f32 %v8252_v8, %v1619_v3  ;;  %v6991_v24 = vld [vmem:[%s9063_s5 + $0x70] sm:$0xff]   ;;  %v6995_v51 = vld [vmem:[%s9063_s5 + $0x60] sm:$0xff]  }
 0x24d   : > { %v8380_v59 = vpop.f32.mrf.mxu0  ;;  %v1621_v33 = vpop.f32.mrf.mxu1  ;;  %6734 = vmatprep.subr.bf16.mxu1 %v6991_v24 }
 0x24e   : > { %v1622_v50 = vadd.f32 %v1621_v33, %v8276_v6  ;;  %v8384_v34 = vadd.f32 %v8256_v36, %v1630_v20  ;;  %v450_v36 = vsel %vm8232_vm4, 0, %v449_v13  ;;  %6735 = vmatpush3.bf16.msra.mxu1 %v6991_v24  ;;  %6765 = vmatpush3.bf16.msra.mxu0 %v6992_v4  ;;  %v405_v24 = vsel %vm8232_vm4, 0, %v404_v44  ;;  %v7000_v44 = vld [vmem:[%s9063_s5 + $0x50] sm:$0xff]  }
 0x24f   : > { %v8392_v8 = vpop.f32.mrf.mxu0  ;;  %v8394_v60 = vpop.f32.mrf.mxu1  ;;  %451 = vst [vmem:[#allocation4 + $0x30] sm:$0x1] %v450_v36  ;;  %6736 = vmatprep.subr.bf16.mxu1 %v6993_v12  ;;  %6766 = vmatprep.subr.bf16.mxu0 %v6994_v47  ;;  %406 = vst [vmem:[#allocation3] sm:$0x1] %v405_v24  ;;  %v401_v36 = vld [vmem:[#allocation3 + $0x4] sm:$0x1] }
 0x250   : > { %v8397_v17 = vadd.f32 %v8262_v61, %v1622_v50  ;;  %v429_v61 = vsel %vm8232_vm4, 0, %v428_v43  ;;  %v6996_v50 = vld [vmem:[%s9063_s5 + $0x8] sm:$0xff]   ;;  %v402_v4 = vsel %vm8232_vm4, 0, %v401_v36  ;;  %v8475_v36 = vld [vmem:[%s9063_s5 + $0xf8] sm:$0xff]  }
 0x251   : > { %v8401_v6 = vpop.f32.mrf.mxu0  ;;  %v8403_v2 = vpop.f32.mrf.mxu1  ;;  %430 = vst [vmem:[#allocation3 + $0x40] sm:$0x1] %v429_v61  ;;  %403 = vst [vmem:[#allocation3 + $0x4] sm:$0x1] %v402_v4 }
 0x252   : > { %6737 = vmatpush3.bf16.msra.mxu1 %v6993_v12  ;;  %6767 = vmatpush3.bf16.msra.mxu0 %v6994_v47  ;;  %9085 = vst [vmem:[#allocation9_spill] sm:$0xff] %v8475_v36 }
 0x253   : > { %v8405_v19 = vpop.f32.mrf.mxu0  ;;  %v8407_v62 = vpop.f32.mrf.mxu1  ;;  %6738 = vmatprep.subr.bf16.mxu1 %v6995_v51  ;;  %6768 = vmatprep.subr.bf16.mxu0 %v6996_v50 }
 0x255   : > { %v8411_v57 = vpop.f32.mrf.mxu0  ;;  %v8413_v23 = vpop.f32.mrf.mxu1 }
 0x256   : > { %6739 = vmatpush3.bf16.msra.mxu1 %v6995_v51  ;;  %6769 = vmatpush3.bf16.msra.mxu0 %v6996_v50 }
 0x257   : > { %v8415_v9 = vpop.f32.mrf.mxu0  ;;  %v8417_v14 = vpop.f32.mrf.mxu1  ;;  %6740 = vmatprep.subr.bf16.mxu1 %v6997_v18 }
 0x259   : > { %v8425_v30 = vpop.f32.mrf.mxu0  ;;  %v8427_v3 = vpop.f32.mrf.mxu1 }
 0x25a   : > { %6741 = vmatpush3.bf16.msra.mxu1 %v6997_v18 }
 0x25b   : > { %v8437_v20 = vpop.f32.mrf.mxu0  ;;  %v6603_v33 = vpop.f32.mrf.mxu1  ;;  %6742 = vmatprep.subr.bf16.mxu1 %v7000_v44 }
 0x25c   : > { %v2159_v13 = vadd.f32 %v6603_v33, %v8319_v7  ;;  %v6999_v7 = vld [vmem:[%s9063_s5] sm:$0xff]  }
 0x25d   : > { %v8448_v43 = vpop.f32.mrf.mxu0  ;;  %v2108_v61 = vpop.f32.mrf.mxu1  ;;  %6770 = vmatprep.subr.bf16.mxu0 %v6999_v7 }
 0x25e   : > { %v2157_v12 = vadd.f32 %v2108_v61, %v8330_v52  ;;  %v8454_v31 = vadd.f32 %v8301_v25, %v2159_v13  ;;  %6771 = vmatpush3.bf16.msra.mxu0 %v6999_v7  ;;  %6743 = vmatpush3.bf16.msra.mxu1 %v7000_v44 }
 0x25f   : > { %v6606_v63 = vpop.f32.mrf.mxu1  ;;  %v8462_v33 = vpop.f32.mrf.mxu0  ;;  %6804 = vmatprep.subr.bf16.mxu0 %v8475_v36 }
 0x260   : > { %v2162_v52 = vadd.f32 %v6606_v63, %v8338_v39  ;;  %v8466_v25 = vadd.f32 %v8309_v1, %v2157_v12  ;;  %v7002_v1 = vld [vmem:[%s9063_s5 + $0x48] sm:$0xff]   ;;  %v7005_v12 = vld [vmem:[%s9063_s5 + $0x40] sm:$0xff]  }
 0x261   : > { %v2121_v47 = vpop.f32.mrf.mxu1  ;;  %v8480_v39 = vpop.f32.mrf.mxu0  ;;  %6744 = vmatprep.subr.bf16.mxu1 %v7002_v1 }
 0x262   : > { %v2160_v51 = vadd.f32 %v2121_v47, %v8346_v11  ;;  %v8470_v24 = vadd.f32 %v8321_v35, %v2162_v52  ;;  %6745 = vmatpush3.bf16.msra.mxu1 %v7002_v1  ;;  %v7008_v52 = vld [vmem:[%s9063_s5 + $0xb8] sm:$0xff]  }
 0x263   : > { %v6607_v13 = vpop.f32.mrf.mxu1  ;;  %6746 = vmatprep.subr.bf16.mxu1 %v7005_v12 }
 0x264   : > { %v2163_v11 = vadd.f32 %v6607_v13, %v8352_v10  ;;  %v8484_v35 = vadd.f32 %v8334_v49, %v2160_v51  ;;  %v8494_v10 = vpop.f32.mrf.mxu0 }
 0x265   : > { %v2124_v50 = vpop.f32.mrf.mxu1  ;;  %9086 = vst [vmem:[#allocation10_spill] sm:$0xff] %v8494_v10 }
 0x266   : > { %v2161_v18 = vadd.f32 %v2124_v50, %v8356_v55  ;;  %v8488_v61 = vadd.f32 %v8340_v5, %v2163_v11  ;;  %v8507_v47 = vpop.f32.mrf.mxu0  ;;  %6747 = vmatpush3.bf16.msra.mxu1 %v7005_v12  ;;  %v8528_v12 = vld [vmem:[#allocation3] sm:$0xf] }
 0x267   : > { %v6610_v4 = vpop.f32.mrf.mxu1  ;;  %9087 = vst [vmem:[#allocation11_spill] sm:$0xff] %v8507_v47  ;;  %6780 = vmatprep.subr.bf16.mxu1 %v7008_v52  ;;  %9093 = vst [vmem:[#allocation17_spill] sm:$0xff] %v8528_v12  ;;  %v4334_v52 = vshrl.u32 %v8528_v12, 16  ;;  %v4325_v47 = vld [vmem:[#allocation3 + $0x4] sm:$0x1] }
 0x268   : > { %v2166_v49 = vadd.f32 %v6610_v4, %v8368_v32  ;;  %v8498_v63 = vadd.f32 %v8348_v56, %v2161_v18  ;;  %v8517_v1 = vpop.f32.mrf.mxu0 }
 0x269   : > { %v2137_v55 = vpop.f32.mrf.mxu1  ;;  %9088 = vst [vmem:[#allocation12_spill] sm:$0xff] %v8517_v1  ;;  %v4336_v0 = vrot.slane %v4334_v52, 4 }
 0x26a   : > { %v2164_v5 = vadd.f32 %v2137_v55, %v8378_v37  ;;  %v8502_v7 = vadd.f32 %v8361_v41, %v2166_v49 }
 0x26b   : > { %v6611_v44 = vpop.f32.mrf.mxu1 }
 0x26c   : > { %v2167_v32 = vadd.f32 %v6611_v44, %v8384_v34  ;;  %v8511_v56 = vadd.f32 %v8372_v38, %v2164_v5  ;;  %v8522_v34 = vpop.f32.mrf.mxu0 }
 0x26d   : > { %v2140_v51 = vpop.f32.mrf.mxu1  ;;  %9090 = vst [vmem:[#allocation14_spill] sm:$0xff] %v8522_v34 }
 0x26e   : > { %v2165_v37 = vadd.f32 %v2140_v51, %v8397_v17  ;;  %v8515_v41 = vadd.f32 %v8380_v59, %v2167_v32  ;;  %v8524_v49 = vpop.f32.mrf.mxu0 }
 0x26f   : > { %v6646_v13 = vpop.f32.mrf.mxu1  ;;  %9091 = vst [vmem:[#allocation15_spill] sm:$0xff] %v8524_v49 }
 0x270   : > { %v8520_v11 = vadd.f32 %v8392_v8, %v2165_v37  ;;  %v8526_v59 = vpop.f32.mrf.mxu0  ;;  %v4337_v8 = vshll.u32 %v8528_v12, 16  ;;  %v1928_v37 = vadd.f32 %v8209_v29, %v8282_v40  ;;  %v2153_v29 = vadd.f32 %v8413_v23, %v8299_v53 }
 0x271   : > { %v2845_v50 = vpop.f32.mrf.mxu1  ;;  %9092 = vst [vmem:[#allocation16_spill] sm:$0xff] %v8526_v59  ;;  %v1926_v59 = vadd.f32 %v8211_v46, %v8288_v48  ;;  %v2156_v46 = vadd.f32 %v8427_v3, %v8315_v28 }
 0x272   : > { %9089 = vst [vmem:[#allocation13_spill] sm:$0xff] %v8520_v11  ;;  %v8532_v32 = vpop.f32.mrf.mxu0  ;;  %v4339_v49 = vrot.slane %v4337_v8, 5  ;;  %v2154_v34 = vadd.f32 %v8394_v60, %v1928_v37  ;;  %v1929_v11 = vadd.f32 %v8213_v58, %v8292_v54  ;;  %v4343_v8 = vshll.u32 %v4325_v47, 16 }
 0x273   : > { %v6647_v18 = vpop.f32.mrf.mxu1  ;;  %9094 = vst [vmem:[#allocation18_spill] sm:$0xff] %v8532_v32  ;;  %v2152_v32 = vadd.f32 %v8403_v2, %v1926_v59  ;;  %v2158_v60 = vadd.f32 %v8417_v14, %v8307_v16  ;;  %v2603_v53 = vadd.f32 %v8284_v27, %v2153_v29  ;;  %v9096_v29 = vld [vmem:[#allocation11_spill] sm:$0xff] }
 0x274   : > { %v6718_v1 = vpop.f32.mrf.mxu0  ;;  %v2155_v10 = vadd.f32 %v8407_v62, %v1929_v11  ;;  %v4340_v52 = vor.u32 %v4339_v49, %v4336_v0  ;;  %v2604_v48 = vadd.f32 %v8270_v15, %v2154_v34  ;;  %v8555_v47 = vrot.slane %v4343_v8, 5  ;;  %v3980_v8 = vld [vmem:[%s7216_s23 + $0x10] sm:$0xff] }
 0x275   : > { %v2848_v38 = vpop.f32.mrf.mxu1  ;;  %v2602_v2 = vadd.f32 %v8274_v22, %v2152_v32  ;;  %v2608_v28 = vadd.f32 %v8294_v45, %v2158_v60  ;;  %v2606_v15 = vadd.f32 %v8296_v26, %v2156_v46 }
 0x276   : > { %v3828_v58 = vpop.f32.mrf.mxu0  ;;  %v2910_v37 = vadd.f32 %v6646_v13, %v2604_v48  ;;  %v2605_v62 = vadd.f32 %v8280_v42, %v2155_v10  ;;  %v8553_v0 = vrot.slane %v4340_v52, 4  ;;  %v2909_v3 = vadd.f32 %v2848_v38, %v2603_v53 }
 0x277   : > { %v6650_v4 = vpop.f32.mrf.mxu1  ;;  %v2908_v14 = vadd.f32 %v2845_v50, %v2602_v2  ;;  %v9100_v2 = vld [vmem:[#allocation15_spill] sm:$0xff] }
 0x278   : > { %v6719_v16 = vpop.f32.mrf.mxu0  ;;  %v2911_v11 = vadd.f32 %v6647_v18, %v2605_v62  ;;  %v2914_v34 = vadd.f32 %v6650_v4, %v2608_v28  ;;  %v3137_v42 = vadd.f32 %v8401_v6, %v2910_v37  ;;  %v4346_v50 = vsel %vm7396_vm14, %v8553_v0, %v8555_v47 }
 0x279   : > { %v2861_v17 = vpop.f32.mrf.mxu1  ;;  %v3135_v38 = vadd.f32 %v8405_v19, %v2908_v14  ;;  %v3136_v59 = vadd.f32 %v8415_v9, %v2909_v3  ;;  %v9098_v46 = vld [vmem:[#allocation13_spill] sm:$0xff] }
 0x27a   : > { %v2912_v22 = vadd.f32 %v2861_v17, %v2606_v15  ;;  %v3831_v18 = vpop.f32.mrf.mxu0  ;;  %v3138_v4 = vadd.f32 %v8411_v57, %v2911_v11  ;;  %v8575_v17 = vld [vmem:[%s9062_s4] ss:$0 sm:$0xff]  ;;  %v3141_v19 = vadd.f32 %v8425_v30, %v2914_v34  ;;  %v9101_v34 = vld [vmem:[#allocation16_spill] sm:$0xff] }
 0x27b   : > { %v6651_v55 = vpop.f32.mrf.mxu1  ;;  %v3978_v11 = vld [vmem:[%s7216_s23] sm:$0xff] }
 0x27c   : > { %v2915_v27 = vadd.f32 %v6651_v55, %v8454_v31  ;;  %v3139_v57 = vadd.f32 %v8437_v20, %v2912_v22 }
 0x27d   : > { %v2864_v5 = vpop.f32.mrf.mxu1 }
 0x27e   : > { %v2913_v10 = vadd.f32 %v2864_v5, %v8466_v25 }
 0x27f   : > { %v6654_v44 = vpop.f32.mrf.mxu1 }
 0x280   : > { %v2918_v45 = vadd.f32 %v6654_v44, %v8470_v24  ;;  %v6722_v44 = vpop.f32.mrf.mxu0 }
 0x281   : > { %v2877_v51 = vpop.f32.mrf.mxu1 }
 0x282   : > { %v2916_v6 = vadd.f32 %v2877_v51, %v8484_v35  ;;  %v8588_v30 = vadd.f32 %v8480_v39, %v2918_v45  ;;  %v3844_v53 = vpop.f32.mrf.mxu0 }
 0x283   : > { %v6655_v36 = vpop.f32.mrf.mxu1 }
 0x284   : > { %v2919_v31 = vadd.f32 %v6655_v36, %v8488_v61 }
 0x285   : > { %v2880_v12 = vpop.f32.mrf.mxu1 }
 0x286   : > { %v2917_v25 = vadd.f32 %v2880_v12, %v8498_v63  ;;  %v3142_v63 = vadd.f32 %v8448_v43, %v2915_v27  ;;  %v8584_v12 = vadd.f32 %v8462_v33, %v2913_v10  ;;  %v8595_v43 = vadd.f32 %v9096_v29, %v2919_v31  ;;  %v9097_v33 = vld [vmem:[#allocation12_spill] sm:$0xff]  ;;  %v6723_v31 = vpop.f32.mrf.mxu0 }
 0x287   : > { %v6658_v40 = vpop.f32.mrf.mxu1  ;;  %v3981_v10 = vld [vmem:[%s7216_s23 + $0x18] sm:$0xff] }
 0x288   : > { %v2922_v35 = vadd.f32 %v6658_v40, %v8502_v7  ;;  %v8598_v40 = vadd.f32 %v9097_v33, %v2917_v25 }
 0x289   : > { %v2893_v54 = vpop.f32.mrf.mxu1 }
 0x28a   : > { %v2920_v36 = vadd.f32 %v2893_v54, %v8511_v56  ;;  %v9095_v56 = vld [vmem:[#allocation10_spill] sm:$0xff] }
 0x28b   : > { %v6659_v23 = vpop.f32.mrf.mxu1  ;;  %v8592_v51 = vadd.f32 %v9095_v56, %v2916_v6  ;;  %v9099_v54 = vld [vmem:[#allocation14_spill] sm:$0xff] }
 0x28c   : > { %v2923_v20 = vadd.f32 %v6659_v23, %v8515_v41  ;;  %v8604_v37 = vadd.f32 %v9099_v54, %v2922_v35  ;;  %v8607_v62 = vadd.f32 %v9100_v2, %v2920_v36  ;;  %v3979_v56 = vld [vmem:[%s7216_s23 + $0x8] sm:$0xff]  ;;  %v3984_v2 = vld [vmem:[%s7216_s23 + $0x30] sm:$0xff] }
 0x28d   : > { %v2896_v13 = vpop.f32.mrf.mxu1 }
 0x28e   : > { %v8612_v22 = vadd.f32 %v9101_v34, %v2923_v20 }
 0x28f   : > { %v6694_v49 = vpop.f32.mrf.mxu1 }
 0x290   : > { %v3587_v26 = vadd.f32 %v6694_v49, %v3137_v42 }
 0x291   : > { %v3522_v55 = vpop.f32.mrf.mxu1 }
 0x292   : > { %v3893_v24 = vadd.f32 %v6718_v1, %v3587_v26  ;;  %v3585_v5 = vadd.f32 %v3522_v55, %v3135_v38 }
 0x293   : > { %v6695_v61 = vpop.f32.mrf.mxu1 }
 0x294   : > { %v3916_v9 = vadd.f32 %v8575_v17, %v3893_v24  ;;  %v3891_v1 = vadd.f32 %v3828_v58, %v3585_v5  ;;  %v3588_v32 = vadd.f32 %v6695_v61, %v3138_v4  ;;  %v2921_v58 = vadd.f32 %v2896_v13, %v9098_v46 }
 0x295   : > { %v3525_v7 = vpop.f32.mrf.mxu1 }
 0x296   : > { %vm3932_vm12 = vcmp.ge.f32.partialorder %v3916_v9, 0.0  ;;  %v3948_v52 = vmul.f32 0.1, %v3916_v9  ;;  %v3914_v39 = vadd.f32 %v8575_v17, %v3891_v1  ;;  %v3894_v60 = vadd.f32 %v6719_v16, %v3588_v32  ;;  %v4275_v32 = vld [vmem:[#allocation4 + $0x8] sm:$0xf] }
 0x297   : > { %v3586_v41 = vadd.f32 %v3525_v7, %v3136_v59  ;;  %v6698_v48 = vpop.f32.mrf.mxu1  ;;  %v9102_v59 = vld [vmem:[#allocation18_spill] sm:$0xff] }
 0x298   : > { %v3964_v23 = vsel %vm3932_vm12, %v3916_v9, %v3948_v52  ;;  %vm3930_vm0 = vcmp.ge.f32.partialorder %v3914_v39, 0.0  ;;  %v3946_v14 = vmul.f32 0.1, %v3914_v39  ;;  %v3917_v28 = vadd.f32 %v8575_v17, %v3894_v60  ;;  %v8628_v52 = vpop.f32.mrf.mxu0 }
 0x299   : > { %v3996_v15 = vadd.f32 %v3980_v8, %v3964_v23  ;;  %v3892_v16 = vadd.f32 %v3831_v18, %v3586_v41  ;;  %v3591_v3 = vadd.f32 %v6698_v48, %v3141_v19  ;;  %v3538_v13 = vpop.f32.mrf.mxu1  ;;  %v8617_v24 = vadd.f32 %v9102_v59, %v2921_v58  ;;  %v4278_v8 = vld [vmem:[#allocation4 + $0xc] sm:$0x1]  ;;  %v4272_v48 = vld [vmem:[#allocation4 + $0x4] sm:$0x1] }
 0x29a   : > { %v3962_v42 = vsel %vm3930_vm0, %v3914_v39, %v3946_v14  ;;  %vm3933_vm9 = vcmp.ge.f32.partialorder %v3917_v28, 0.0  ;;  %v3949_v27 = vmul.f32 0.1, %v3917_v28  ;;  %v3589_v49 = vadd.f32 %v3538_v13, %v3139_v57  ;;  %v7009_v13 = vld [vmem:[%s9063_s5 + $0xe0] sm:$0xff]  }
 0x29b   : > { %v6273_v45 = vpack.c.bf16 %v3996_v15, %v3996_v15  ;;  %v3994_v26 = vadd.f32 %v3978_v11, %v3962_v42  ;;  %v3915_v38 = vadd.f32 %v8575_v17, %v3892_v16  ;;  %v3897_v4 = vadd.f32 %v6722_v44, %v3591_v3  ;;  %v6699_v6 = vpop.f32.mrf.mxu1  ;;  %v3982_v15 = vld [vmem:[%s7216_s23 + $0x20] sm:$0xff] }
 0x29c   : > { %v3965_v25 = vsel %vm3933_vm9, %v3917_v28, %v3949_v27  ;;  %v3895_v55 = vadd.f32 %v3844_v53, %v3589_v49  ;;  %v3592_v18 = vadd.f32 %v6699_v6, %v3142_v63  ;;  %v4269_v53 = vld [vmem:[#allocation4] sm:$0xf] }
 0x29d   : > { %v4198_v5 = vshrl.u32 %v6273_v45, 16  ;;  %v4201_v19 = vshll.u32 %v6273_v45, 16  ;;  %v6271_v35 = vpack.c.bf16 %v3994_v26, %v3994_v26  ;;  %v3997_v36 = vadd.f32 %v3981_v10, %v3965_v25  ;;  %v3541_v61 = vpop.f32.mrf.mxu1  ;;  %v6726_v10 = vpop.f32.mrf.mxu0  ;;  %v4147_v25 = vld [vmem:[#allocation3 + $0x10] sm:$0xf] }
 0x29e   : > { %vm3931_vm10 = vcmp.ge.f32.partialorder %v3915_v38, 0.0  ;;  %v3947_v57 = vmul.f32 0.1, %v3915_v38  ;;  %v3920_v9 = vadd.f32 %v8575_v17, %v3897_v4  ;;  %v3918_v44 = vadd.f32 %v8575_v17, %v3895_v55  ;;  %v4150_v55 = vld [vmem:[#allocation3 + $0x14] sm:$0x1] }
 0x29f   : > { %v4200_v1 = vrot.slane %v4198_v5, 7  ;;  %v4190_v20 = vshrl.u32 %v6271_v35, 16  ;;  %v4193_v7 = vshll.u32 %v6271_v35, 16  ;;  %v6274_v63 = vpack.c.bf16 %v3997_v36, %v3997_v36  ;;  %v6702_v29 = vpop.f32.mrf.mxu1 }
 0x2a0   : > { %v3963_v39 = vsel %vm3931_vm10, %v3915_v38, %v3947_v57  ;;  %vm3936_vm13 = vcmp.ge.f32.partialorder %v3920_v9, 0.0  ;;  %v3952_v60 = vmul.f32 0.1, %v3920_v9  ;;  %vm3934_vm15 = vcmp.ge.f32.partialorder %v3918_v44, 0.0 }
 0x2a1   : > { %v4203_v46 = vor.u32 %v4201_v19, %v4200_v1  ;;  %v4204_v58 = vrot.slane %v4200_v1, 4  ;;  %v4192_v41 = vrot.slane %v4190_v20, 7  ;;  %v4067_v54 = vshrl.u32 %v6274_v63, 16  ;;  %v3554_v16 = vpop.f32.mrf.mxu1 }
 0x2a2   : > { %v4070_v23 = vshll.u32 %v6274_v63, 16  ;;  %v3995_v14 = vadd.f32 %v3979_v56, %v3963_v39  ;;  %v3968_v11 = vsel %vm3936_vm13, %v3920_v9, %v3952_v60  ;;  %v3950_v28 = vmul.f32 0.1, %v3918_v44  ;;  %v4144_v56 = vld [vmem:[#allocation3 + $0xc] sm:$0x1] }
 0x2a3   : > { %v4276_v3 = vsel %vm8624_vm11, %v4203_v46, %v4275_v32  ;;  %v4279_v34 = vsel %vm8232_vm4, %v4204_v58, %v4278_v8  ;;  %v4195_v42 = vor.u32 %v4193_v7, %v4192_v41  ;;  %v4196_v27 = vrot.slane %v4192_v41, 4  ;;  %v8641_v9 = vpop.f32.mrf.mxu1  ;;  %v3860_v7 = vpop.f32.mrf.mxu0  ;;  %v4141_v39 = vld [vmem:[#allocation3 + $0x8] sm:$0xf] }
 0x2a4   : > { %4277 = vst [vmem:[#allocation4 + $0x8] sm:$0xf] %v4276_v3  ;;  %4280 = vst [vmem:[#allocation4 + $0xc] sm:$0x1] %v4279_v34  ;;  %v4069_v49 = vrot.slane %v4067_v54, 7  ;;  %v6272_v45 = vpack.c.bf16 %v3995_v14, %v3995_v14  ;;  %v4000_v26 = vadd.f32 %v3984_v2, %v3968_v11  ;;  %v3966_v38 = vsel %vm3934_vm15, %v3918_v44, %v3950_v28  ;;  %v3985_v14 = vld [vmem:[%s7216_s23 + $0x38] sm:$0xff] }
 0x2a5   : > { %v4270_v4 = vsel %vm8624_vm11, %v4195_v42, %v4269_v53  ;;  %v4273_v6 = vsel %vm8232_vm4, %v4196_v27, %v4272_v48  ;;  %v3998_v59 = vadd.f32 %v3982_v15, %v3966_v38  ;;  %v3898_v5 = vadd.f32 %v6723_v31, %v3592_v18  ;;  %v3557_v54 = vpop.f32.mrf.mxu1  ;;  %v4290_v53 = vld [vmem:[#allocation4 + $0x1c] sm:$0x1]  ;;  %v4287_v3 = vld [vmem:[#allocation4 + $0x18] sm:$0xf]  ;;  %v4281_v34 = vld [vmem:[#allocation4 + $0x10] sm:$0xf] }
 0x2a6   : > { %4271 = vst [vmem:[#allocation4] sm:$0xf] %v4270_v4  ;;  %4274 = vst [vmem:[#allocation4 + $0x4] sm:$0x1] %v4273_v6  ;;  %v4072_v19 = vor.u32 %v4070_v23, %v4069_v49  ;;  %v4073_v35 = vrot.slane %v4069_v49, 4  ;;  %v4059_v36 = vshrl.u32 %v6272_v45, 16  ;;  %v6277_v1 = vpack.c.bf16 %v4000_v26, %v4000_v26 }
 0x2a7   : > { %v4062_v57 = vshll.u32 %v6272_v45, 16  ;;  %v6275_v44 = vpack.c.bf16 %v3998_v59, %v3998_v59  ;;  %v3921_v32 = vadd.f32 %v8575_v17, %v3898_v5  ;;  %v3590_v20 = vadd.f32 %v3541_v61, %v8584_v12  ;;  %v4284_v42 = vld [vmem:[#allocation4 + $0x14] sm:$0x1] }
 0x2a8   : > { %v4148_v63 = vsel %vm8624_vm11, %v4072_v19, %v4147_v25  ;;  %v4151_v31 = vsel %vm8232_vm4, %v4073_v35, %v4150_v55  ;;  %v4061_v18 = vrot.slane %v4059_v36, 7  ;;  %v3595_v8 = vadd.f32 %v6702_v29, %v8588_v30  ;;  %v6727_v29 = vpop.f32.mrf.mxu0  ;;  %v6706_v55 = vpop.f32.mrf.mxu1 }
 0x2a9   : > { %4149 = vst [vmem:[#allocation3 + $0x10] sm:$0xf] %v4148_v63  ;;  %4152 = vst [vmem:[#allocation3 + $0x14] sm:$0x1] %v4151_v31  ;;  %v4214_v60 = vshrl.u32 %v6277_v1, 16  ;;  %v4217_v46 = vshll.u32 %v6277_v1, 16  ;;  %v3896_v11 = vadd.f32 %v8628_v52, %v3590_v20  ;;  %v3593_v49 = vadd.f32 %v3554_v16, %v8592_v51 }
 0x2aa   : > { %v4206_v58 = vshrl.u32 %v6275_v44, 16  ;;  %v4209_v41 = vshll.u32 %v6275_v44, 16  ;;  %v4064_v12 = vor.u32 %v4062_v57, %v4061_v18  ;;  %v4065_v61 = vrot.slane %v4061_v18, 4  ;;  %v3863_v19 = vpop.f32.mrf.mxu0  ;;  %v3983_v57 = vld [vmem:[%s7216_s23 + $0x28] sm:$0xff]  ;;  %v3988_v44 = vld [vmem:[%s7216_s23 + $0x50] sm:$0xff] }
 0x2ab   : > { %vm3937_vm2 = vcmp.ge.f32.partialorder %v3921_v32, 0.0  ;;  %v3953_v48 = vmul.f32 0.1, %v3921_v32  ;;  %v4216_v2 = vrot.slane %v4214_v60, 7  ;;  %v3901_v30 = vadd.f32 %v6726_v10, %v3595_v8  ;;  %v3570_v8 = vpop.f32.mrf.mxu1 }
 0x2ac   : > { %v4208_v23 = vrot.slane %v4206_v58, 7  ;;  %v4142_v28 = vsel %vm8624_vm11, %v4064_v12, %v4141_v39  ;;  %v4145_v15 = vsel %vm8232_vm4, %v4065_v61, %v4144_v56  ;;  %v3919_v4 = vadd.f32 %v8575_v17, %v3896_v11  ;;  %v3986_v58 = vld [vmem:[%s7216_s23 + $0x40] sm:$0xff] }
 0x2ad   : > { %v3969_v27 = vsel %vm3937_vm2, %v3921_v32, %v3953_v48  ;;  %4143 = vst [vmem:[#allocation3 + $0x8] sm:$0xf] %v4142_v28  ;;  %4146 = vst [vmem:[#allocation3 + $0xc] sm:$0x1] %v4145_v15  ;;  %v4219_v45 = vor.u32 %v4217_v46, %v4216_v2  ;;  %v4220_v26 = vrot.slane %v4216_v2, 4  ;;  %v3924_v6 = vadd.f32 %v8575_v17, %v3901_v30 }
 0x2ae   : > { %v4211_v38 = vor.u32 %v4209_v41, %v4208_v23  ;;  %v4212_v52 = vrot.slane %v4208_v23, 4  ;;  %v4001_v10 = vadd.f32 %v3985_v14, %v3969_v27  ;;  %v3899_v25 = vadd.f32 %v3860_v7, %v3593_v49  ;;  %v6730_v41 = vpop.f32.mrf.mxu0  ;;  %v4156_v27 = vld [vmem:[#allocation3 + $0x1c] sm:$0x1] }
 0x2af   : > { %v4288_v59 = vsel %vm8624_vm11, %v4219_v45, %v4287_v3  ;;  %v4291_v51 = vsel %vm8232_vm4, %v4220_v26, %v4290_v53  ;;  %vm3935_vm6 = vcmp.ge.f32.partialorder %v3919_v4, 0.0  ;;  %v3951_v36 = vmul.f32 0.1, %v3919_v4  ;;  %v4159_v53 = vld [vmem:[#allocation3 + $0x20] sm:$0xf] }
 0x2b0   : > { %v4282_v16 = vsel %vm8624_vm11, %v4211_v38, %v4281_v34  ;;  %v4285_v5 = vsel %vm8232_vm4, %v4212_v52, %v4284_v42  ;;  %4289 = vst [vmem:[#allocation4 + $0x18] sm:$0xf] %v4288_v59  ;;  %4292 = vst [vmem:[#allocation4 + $0x1c] sm:$0x1] %v4291_v51  ;;  %v6278_v35 = vpack.c.bf16 %v4001_v10, %v4001_v10  ;;  %vm3940_vm5 = vcmp.ge.f32.partialorder %v3924_v6, 0.0  ;;  %v3989_v10 = vld [vmem:[%s7216_s23 + $0x58] sm:$0xff] }
 0x2b1   : > { %4283 = vst [vmem:[#allocation4 + $0x10] sm:$0xf] %v4282_v16  ;;  %4286 = vst [vmem:[#allocation4 + $0x14] sm:$0x1] %v4285_v5  ;;  %v3956_v1 = vmul.f32 0.1, %v3924_v6  ;;  %v3922_v32 = vadd.f32 %v8575_v17, %v3899_v25  ;;  %v3596_v20 = vadd.f32 %v8641_v9, %v8595_v43  ;;  %v3594_v7 = vadd.f32 %v3557_v54, %v8598_v40 }
 0x2b2   : > { %v4083_v63 = vshrl.u32 %v6278_v35, 16  ;;  %v4086_v31 = vshll.u32 %v6278_v35, 16  ;;  %v3967_v18 = vsel %vm3935_vm6, %v3919_v4, %v3951_v36  ;;  %v3599_v56 = vadd.f32 %v6706_v55, %v8604_v37  ;;  %v4162_v43 = vld [vmem:[#allocation3 + $0x24] sm:$0x1]  ;;  %v4302_v26 = vld [vmem:[#allocation4 + $0x2c] sm:$0x1]  ;;  %v6707_v4 = vpop.f32.mrf.mxu1 }
 0x2b3   : > { %v3999_v39 = vadd.f32 %v3983_v57, %v3967_v18  ;;  %v3972_v60 = vsel %vm3940_vm5, %v3924_v6, %v3956_v1  ;;  %vm3938_vm7 = vcmp.ge.f32.partialorder %v3922_v32, 0.0  ;;  %v3954_v46 = vmul.f32 0.1, %v3922_v32  ;;  %v3876_v6 = vpop.f32.mrf.mxu0  ;;  %v4153_v25 = vld [vmem:[#allocation3 + $0x18] sm:$0xf] }
 0x2b4   : > { %v4085_v12 = vrot.slane %v4083_v63, 7  ;;  %v4004_v61 = vadd.f32 %v3988_v44, %v3972_v60  ;;  %v3902_v48 = vadd.f32 %v6727_v29, %v3596_v20  ;;  %v3900_v2 = vadd.f32 %v3863_v19, %v3594_v7  ;;  %v4299_v19 = vld [vmem:[#allocation4 + $0x28] sm:$0xf]  ;;  %v3987_v57 = vld [vmem:[%s7216_s23 + $0x48] sm:$0xff] }
 0x2b5   : > { %v6276_v9 = vpack.c.bf16 %v3999_v39, %v3999_v39  ;;  %v3970_v40 = vsel %vm3938_vm7, %v3922_v32, %v3954_v46  ;;  %v3905_v54 = vadd.f32 %v6730_v41, %v3599_v56  ;;  %v3597_v23 = vadd.f32 %v3570_v8, %v8607_v62  ;;  %v3573_v56 = vpop.f32.mrf.mxu1  ;;  %v6731_v8 = vpop.f32.mrf.mxu0  ;;  %v4293_v46 = vld [vmem:[#allocation4 + $0x20] sm:$0xf] }
 0x2b6   : > { %v4088_v14 = vor.u32 %v4086_v31, %v4085_v12  ;;  %v4089_v37 = vrot.slane %v4085_v12, 4  ;;  %v6281_v11 = vpack.c.bf16 %v4004_v61, %v4004_v61  ;;  %v4002_v30 = vadd.f32 %v3986_v58, %v3970_v40  ;;  %v4296_v58 = vld [vmem:[#allocation4 + $0x24] sm:$0x1] }
 0x2b7   : > { %v4075_v28 = vshrl.u32 %v6276_v9, 16  ;;  %v4078_v15 = vshll.u32 %v6276_v9, 16  ;;  %v3925_v3 = vadd.f32 %v8575_v17, %v3902_v48  ;;  %v3923_v34 = vadd.f32 %v8575_v17, %v3900_v2 }
 0x2b8   : > { %v4160_v29 = vsel %vm8624_vm11, %v4088_v14, %v4159_v53  ;;  %v4163_v42 = vsel %vm8232_vm4, %v4089_v37, %v4162_v43  ;;  %v4230_v49 = vshrl.u32 %v6281_v11, 16  ;;  %v4233_v62 = vshll.u32 %v6281_v11, 16  ;;  %v3992_v43 = vld [vmem:[%s7216_s23 + $0x70] sm:$0xff] }
 0x2b9   : > { %4161 = vst [vmem:[#allocation3 + $0x20] sm:$0xf] %v4160_v29  ;;  %4164 = vst [vmem:[#allocation3 + $0x24] sm:$0x1] %v4163_v42  ;;  %v4077_v45 = vrot.slane %v4075_v28, 7  ;;  %v6279_v38 = vpack.c.bf16 %v4002_v30, %v4002_v30  ;;  %vm3941_vm8 = vcmp.ge.f32.partialorder %v3925_v3, 0.0  ;;  %v3928_v51 = vadd.f32 %v8575_v17, %v3905_v54 }
 0x2ba   : > { %v3957_v52 = vmul.f32 0.1, %v3925_v3  ;;  %v4232_v55 = vrot.slane %v4230_v49, 7  ;;  %vm3939_vm3 = vcmp.ge.f32.partialorder %v3923_v34, 0.0  ;;  %v3955_v59 = vmul.f32 0.1, %v3923_v34 }
 0x2bb   : > { %v4080_v16 = vor.u32 %v4078_v15, %v4077_v45  ;;  %v4081_v5 = vrot.slane %v4077_v45, 4  ;;  %v4222_v35 = vshrl.u32 %v6279_v38, 16  ;;  %v4225_v36 = vshll.u32 %v6279_v38, 16  ;;  %v8701_v28 = vld [vmem:[#allocation3 + $0x8] sm:$0xf]  ;;  %v3879_v15 = vpop.f32.mrf.mxu0 }
 0x2bc   : > { %v4235_v1 = vor.u32 %v4233_v62, %v4232_v55  ;;  %v4236_v44 = vrot.slane %v4232_v55, 4  ;;  %v3973_v32 = vsel %vm3941_vm8, %v3925_v3, %v3957_v52  ;;  %v3971_v20 = vsel %vm3939_vm3, %v3923_v34, %v3955_v59  ;;  %v4171_v29 = vld [vmem:[#allocation3 + $0x30] sm:$0xf]  ;;  %v4174_v42 = vld [vmem:[#allocation3 + $0x34] sm:$0x1] }
 0x2bd   : > { %v4154_v7 = vsel %vm8624_vm11, %v4080_v16, %v4153_v25  ;;  %v4157_v63 = vsel %vm8232_vm4, %v4081_v5, %v4156_v27  ;;  %v4224_v31 = vrot.slane %v4222_v35, 7  ;;  %v4005_v18 = vadd.f32 %v3989_v10, %v3973_v32  ;;  %v3990_v55 = vld [vmem:[%s7216_s23 + $0x60] sm:$0xff] }
 0x2be   : > { %4155 = vst [vmem:[#allocation3 + $0x18] sm:$0xf] %v4154_v7  ;;  %4158 = vst [vmem:[#allocation3 + $0x1c] sm:$0x1] %v4157_v63  ;;  %v4300_v39 = vsel %vm8624_vm11, %v4235_v1, %v4299_v19  ;;  %v4303_v60 = vsel %vm8232_vm4, %v4236_v44, %v4302_v26  ;;  %v4003_v41 = vadd.f32 %v3987_v57, %v3971_v20  ;;  %vm3944_vm1 = vcmp.ge.f32.partialorder %v3928_v51, 0.0  ;;  %v3991_v63 = vld [vmem:[%s7216_s23 + $0x68] sm:$0xff] }
 0x2bf   : > { %4301 = vst [vmem:[#allocation4 + $0x28] sm:$0xf] %v4300_v39  ;;  %4304 = vst [vmem:[#allocation4 + $0x2c] sm:$0x1] %v4303_v60  ;;  %v4227_v12 = vor.u32 %v4225_v36, %v4224_v31  ;;  %v4228_v61 = vrot.slane %v4224_v31, 4  ;;  %v6282_v48 = vpack.c.bf16 %v4005_v18, %v4005_v18  ;;  %v3903_v9 = vadd.f32 %v3876_v6, %v3597_v23 }
 0x2c0   : > { %v3960_v2 = vmul.f32 0.1, %v3928_v51  ;;  %v6280_v53 = vpack.c.bf16 %v4003_v41, %v4003_v41  ;;  %v3600_v40 = vadd.f32 %v6707_v4, %v8612_v22  ;;  %v3598_v54 = vadd.f32 %v3573_v56, %v8617_v24  ;;  %v4165_v4 = vld [vmem:[#allocation3 + $0x28] sm:$0xf]  ;;  %v4168_v6 = vld [vmem:[#allocation3 + $0x2c] sm:$0x1] }
 0x2c1   : > { %v4294_v14 = vsel %vm8624_vm11, %v4227_v12, %v4293_v46  ;;  %v4297_v37 = vsel %vm8232_vm4, %v4228_v61, %v4296_v58  ;;  %v4099_v11 = vshrl.u32 %v6282_v48, 16  ;;  %v4102_v30 = vshll.u32 %v6282_v48, 16  ;;  %v4314_v20 = vld [vmem:[#allocation4 + $0x3c] sm:$0x1]  ;;  %v9106_v58 = vld [vmem:[#allocation17_spill] sm:$0xff] }
 0x2c2   : > { %4295 = vst [vmem:[#allocation4 + $0x20] sm:$0xf] %v4294_v14  ;;  %4298 = vst [vmem:[#allocation4 + $0x24] sm:$0x1] %v4297_v37  ;;  %v4091_v3 = vshrl.u32 %v6280_v53, 16  ;;  %v4094_v34 = vshll.u32 %v6280_v53, 16  ;;  %v3976_v23 = vsel %vm3944_vm1, %v3928_v51, %v3960_v2  ;;  %v3926_v22 = vadd.f32 %v8575_v17, %v3903_v9 }
 0x2c3   : > { %v4101_v24 = vrot.slane %v4099_v11, 7  ;;  %v4008_v27 = vadd.f32 %v3992_v43, %v3976_v23  ;;  %v3906_v49 = vadd.f32 %v6731_v8, %v3600_v40  ;;  %v3904_v62 = vadd.f32 %v3879_v15, %v3598_v54  ;;  %v4311_v8 = vld [vmem:[#allocation4 + $0x38] sm:$0xf]  ;;  %v4319_v12 = vld [vmem:[#allocation3 + $0x10] sm:$0xf] }
 0x2c4   : > { %v4093_v45 = vrot.slane %v4091_v3, 7  ;;  %vm3942_vm12 = vcmp.ge.f32.partialorder %v3926_v22, 0.0  ;;  %v3958_v26 = vmul.f32 0.1, %v3926_v22  ;;  %v4348_v38 = vshrl.u32 %v8701_v28, 16 }
 0x2c5   : > { %v4104_v52 = vor.u32 %v4102_v30, %v4101_v24  ;;  %v4105_v10 = vrot.slane %v4101_v24, 4  ;;  %v6285_v25 = vpack.c.bf16 %v4008_v27, %v4008_v27  ;;  %v3929_v59 = vadd.f32 %v8575_v17, %v3906_v49  ;;  %v4320_v14 = vld [vmem:[#allocation3 + $0x18] sm:$0xf] }
 0x2c6   : > { %v4096_v51 = vor.u32 %v4094_v34, %v4093_v45  ;;  %v4097_v16 = vrot.slane %v4093_v45, 4  ;;  %v3974_v5 = vsel %vm3942_vm12, %v3926_v22, %v3958_v26  ;;  %v3927_v19 = vadd.f32 %v8575_v17, %v3904_v62  ;;  %v3993_v17 = vld [vmem:[%s7216_s23 + $0x78] sm:$0xff]  ;;  %v4305_v3 = vld [vmem:[#allocation4 + $0x30] sm:$0xf]  ;;  %v4308_v34 = vld [vmem:[#allocation4 + $0x34] sm:$0x1] }
 0x2c7   : > { %v4172_v35 = vsel %vm8624_vm11, %v4104_v52, %v4171_v29  ;;  %v4175_v36 = vsel %vm8232_vm4, %v4105_v10, %v4174_v42  ;;  %v4246_v57 = vshrl.u32 %v6285_v25, 16  ;;  %v4249_v1 = vshll.u32 %v6285_v25, 16  ;;  %v4326_v62 = vld [vmem:[#allocation3 + $0xc] sm:$0x1]  ;;  %v7004_v45 = vld [vmem:[%s9063_s5 + $0xf0] sm:$0xff]  }
 0x2c8   : > { %4173 = vst [vmem:[#allocation3 + $0x30] sm:$0xf] %v4172_v35  ;;  %4176 = vst [vmem:[#allocation3 + $0x34] sm:$0x1] %v4175_v36  ;;  %v4166_v44 = vsel %vm8624_vm11, %v4096_v51, %v4165_v4  ;;  %v4169_v32 = vsel %vm8232_vm4, %v4097_v16, %v4168_v6  ;;  %v4006_v7 = vadd.f32 %v3990_v55, %v3974_v5  ;;  %vm3945_vm0 = vcmp.ge.f32.partialorder %v3929_v59, 0.0 }
 0x2c9   : > { %4167 = vst [vmem:[#allocation3 + $0x28] sm:$0xf] %v4166_v44  ;;  %4170 = vst [vmem:[#allocation3 + $0x2c] sm:$0x1] %v4169_v32  ;;  %v4248_v31 = vrot.slane %v4246_v57, 7  ;;  %vm3943_vm9 = vcmp.ge.f32.partialorder %v3927_v19, 0.0  ;;  %v6124_v41 = vcombine.low %v9106_v58, %v8701_v28  ;;  %v6125_v49 = vcombine.low %v4319_v12, %v4320_v14 }
 0x2ca   : > { %v3961_v18 = vmul.f32 0.1, %v3929_v59  ;;  %v3959_v56 = vmul.f32 0.1, %v3927_v19  ;;  %v6283_v39 = vpack.c.bf16 %v4006_v7, %v4006_v7  ;;  %v8719_v60 = vrot.slane %v4348_v38, 4 }
 0x2cb   : > { %v4351_v46 = vshll.u32 %v8701_v28, 16  ;;  %v4251_v61 = vor.u32 %v4249_v1, %v4248_v31  ;;  %v4252_v48 = vrot.slane %v4248_v31, 4  ;;  %6772 = vmatprep.mubr.bf16.mxu0 %v6124_v41  ;;  %v4362_v28 = vshrl.u32 %v4319_v12, 16  ;;  %v4321_v4 = vld [vmem:[#allocation3 + $0x20] sm:$0xf]  ;;  %v9107_v1 = vld [vmem:[#allocation9_spill] sm:$0xff] }
 0x2cc   : > { %v3977_v2 = vsel %vm3945_vm0, %v3929_v59, %v3961_v18  ;;  %v3975_v53 = vsel %vm3943_vm9, %v3927_v19, %v3959_v56  ;;  %v4238_v43 = vshrl.u32 %v6283_v39, 16  ;;  %v4241_v9 = vshll.u32 %v6283_v39, 16  ;;  %6773 = vmatmul.mubr.bf16.vlgmr.msra.gmra.mxu0 %v6125_v49  ;;  %v4186_v35 = vld [vmem:[#allocation3 + $0x44] sm:$0x1]  ;;  %v4180_v36 = vld [vmem:[#allocation3 + $0x3c] sm:$0x1] }
 0x2cd   : > { %v4009_v40 = vadd.f32 %v3993_v17, %v3977_v2  ;;  %v4007_v54 = vadd.f32 %v3991_v63, %v3975_v53  ;;  %v4312_v37 = vsel %vm8624_vm11, %v4251_v61, %v4311_v8  ;;  %v4315_v11 = vsel %vm8232_vm4, %v4252_v48, %v4314_v20  ;;  %6805 = vmatpush3.bf16.msra.mxu0 %v9107_v1  ;;  %v4183_v44 = vld [vmem:[#allocation3 + $0x40] sm:$0xf]  ;;  %v7006_v17 = vld [vmem:[%s9063_s5 + $0xe8] sm:$0xff]   ;;  %v4327_v61 = vld [vmem:[#allocation3 + $0x14] sm:$0x1] }
 0x2ce   : > { %v4353_v30 = vrot.slane %v4351_v46, 5  ;;  %4313 = vst [vmem:[#allocation4 + $0x38] sm:$0xf] %v4312_v37  ;;  %4316 = vst [vmem:[#allocation4 + $0x3c] sm:$0x1] %v4315_v11  ;;  %v4240_v15 = vrot.slane %v4238_v43, 7  ;;  %6806 = vmatprep.subr.bf16.mxu0 %v7004_v45 }
 0x2cf   : > { %v6286_v23 = vpack.c.bf16 %v4009_v40, %v4009_v40  ;;  %v6284_v22 = vpack.c.bf16 %v4007_v54, %v4007_v54  ;;  %v4365_v24 = vshll.u32 %v4319_v12, 16  ;;  %v8729_v29 = vrot.slane %v4362_v28, 4  ;;  %v4177_v56 = vld [vmem:[#allocation3 + $0x38] sm:$0xf]  ;;  %v4328_v43 = vld [vmem:[#allocation3 + $0x1c] sm:$0x1] }
 0x2d0   : > { %v4376_v42 = vshrl.u32 %v4320_v14, 16  ;;  %v4379_v27 = vshll.u32 %v4320_v14, 16  ;;  %v4243_v26 = vor.u32 %v4241_v9, %v4240_v15  ;;  %v4244_v38 = vrot.slane %v4240_v15, 4  ;;  %v4322_v51 = vld [vmem:[#allocation3 + $0x28] sm:$0xf] }
 0x2d1   : > { %v4115_v52 = vshrl.u32 %v6286_v23, 16  ;;  %v4118_v10 = vshll.u32 %v6286_v23, 16  ;;  %v4107_v6 = vshrl.u32 %v6284_v22, 16  ;;  %v4110_v25 = vshll.u32 %v6284_v22, 16  ;;  %6807 = vmatpush3.bf16.msra.mxu0 %v7004_v45  ;;  %v8749_v9 = vld [vmem:[#allocation3 + $0x30] sm:$0xf] }
 0x2d2   : > { %v4367_v55 = vrot.slane %v4365_v24, 5  ;;  %v8734_v59 = vrot.slane %v4376_v42, 4  ;;  %v4306_v16 = vsel %vm8624_vm11, %v4243_v26, %v4305_v3  ;;  %v4309_v5 = vsel %vm8232_vm4, %v4244_v38, %v4308_v34  ;;  %6808 = vmatprep.subr.bf16.mxu0 %v7006_v17  ;;  %v8766_v15 = vld [vmem:[#allocation4] sm:$0xf]  ;;  %v4329_v24 = vld [vmem:[#allocation3 + $0x24] sm:$0x1] }
 0x2d3   : > { %v4117_v19 = vrot.slane %v4115_v52, 7  ;;  %v4381_v57 = vrot.slane %v4379_v27, 5  ;;  %4307 = vst [vmem:[#allocation4 + $0x30] sm:$0xf] %v4306_v16  ;;  %4310 = vst [vmem:[#allocation4 + $0x34] sm:$0x1] %v4309_v5  ;;  %v4354_v20 = vor.u32 %v4353_v30, %v8719_v60  ;;  %v6126_v28 = vcombine.low %v4321_v4, %v4322_v51 }
 0x2d4   : > { %v4109_v32 = vrot.slane %v4107_v6, 7  ;;  %v4357_v7 = vshll.u32 %v4326_v62, 16  ;;  %v4390_v63 = vshrl.u32 %v4321_v4, 16  ;;  %v4393_v8 = vshll.u32 %v4321_v4, 16  ;;  %v7011_v45 = vld [vmem:[%s9063_s5 + $0xd8] sm:$0xff]   ;;  %v7010_v5 = vld [vmem:[%s9063_s5 + $0xb0] sm:$0xff]  }
 0x2d5   : > { %v4120_v31 = vor.u32 %v4118_v10, %v4117_v19  ;;  %v4121_v18 = vrot.slane %v4117_v19, 4  ;;  %v4404_v39 = vshrl.u32 %v4322_v51, 16  ;;  %v4355_v41 = vrot.slane %v4354_v20, 4  ;;  %6776 = vmatprep.mubr.bf16.mxu0 %v6126_v28  ;;  %6809 = vmatpush3.bf16.msra.mxu0 %v7006_v17  ;;  %v8774_v4 = vld [vmem:[#allocation4 + $0x8] sm:$0xf]  ;;  %v7016_v28 = vld [vmem:[%s9063_s5 + $0xc8] sm:$0xff]  }
 0x2d6   : > { %v4112_v46 = vor.u32 %v4110_v25, %v4109_v32  ;;  %v4113_v58 = vrot.slane %v4109_v32, 4  ;;  %v4359_v12 = vrot.slane %v4357_v7, 5  ;;  %v4392_v2 = vrot.slane %v4390_v63, 4  ;;  %6810 = vmatprep.subr.bf16.mxu0 %v7009_v13 }
 0x2d7   : > { %v4184_v60 = vsel %vm8624_vm11, %v4120_v31, %v4183_v44  ;;  %v4187_v48 = vsel %vm8232_vm4, %v4121_v18, %v4186_v35  ;;  %v4395_v53 = vrot.slane %v4393_v8, 5  ;;  %v4406_v37 = vrot.slane %v4404_v39, 4  ;;  %v4331_v8 = vld [vmem:[#allocation3 + $0x34] sm:$0x1]  ;;  %v7047_v39 = vld [vmem:[%s9063_s5 + $0xb8] sm:$0xff]  }
 0x2d8   : > { %4185 = vst [vmem:[#allocation3 + $0x40] sm:$0xf] %v4184_v60  ;;  %4188 = vst [vmem:[#allocation3 + $0x44] sm:$0x1] %v4187_v48  ;;  %v4178_v40 = vsel %vm8624_vm11, %v4112_v46, %v4177_v56  ;;  %v4181_v54 = vsel %vm8232_vm4, %v4113_v58, %v4180_v36  ;;  %v4360_v14 = vsel %vm7396_vm14, %v4355_v41, %v4359_v12  ;;  %v4407_v30 = vshll.u32 %v4322_v51, 16  ;;  %v7014_v56 = vld [vmem:[%s9063_s5 + $0xd0] sm:$0xff]  }
 0x2d9   : > { %4179 = vst [vmem:[#allocation3 + $0x38] sm:$0xf] %v4178_v40  ;;  %4182 = vst [vmem:[#allocation3 + $0x3c] sm:$0x1] %v4181_v54  ;;  %v6112_v11 = vcombine.low %v4346_v50, %v4360_v14  ;;  %v4368_v33 = vor.u32 %v4367_v55, %v8729_v29  ;;  %v4371_v3 = vshll.u32 %v4327_v61, 16  ;;  %v4382_v34 = vor.u32 %v4381_v57, %v8734_v59 }
 0x2da   : > { %v4385_v23 = vshll.u32 %v4328_v43, 16  ;;  %v4418_v22 = vshrl.u32 %v8749_v9, 16  ;;  %v4409_v0 = vrot.slane %v4407_v30, 5  ;;  %v4421_v50 = vshll.u32 %v8749_v9, 16  ;;  %v4330_v29 = vld [vmem:[#allocation3 + $0x2c] sm:$0x1]  ;;  %6811 = vmatpush3.bf16.msra.mxu0 %v7009_v13 }
 0x2db   : > { %6748 = vmatprep.mubr.bf16.mxu1 %v6112_v11  ;;  %v4369_v47 = vrot.slane %v4368_v33, 4  ;;  %v4396_v42 = vor.u32 %v4395_v53, %v4392_v2  ;;  %v4373_v27 = vrot.slane %v4371_v3, 5  ;;  %v4383_v49 = vrot.slane %v4382_v34, 4  ;;  %v4752_v59 = vld [vmem:[#allocation4 + $0x4] sm:$0x1]  ;;  %6812 = vmatprep.subr.bf16.mxu0 %v7011_v45  ;;  %v7013_v2 = vld [vmem:[%s9063_s5 + $0xa8] sm:$0xff]  }
 0x2dc   : > { %v4387_v62 = vrot.slane %v4385_v23, 5  ;;  %v4420_v26 = vrot.slane %v4418_v22, 4  ;;  %v4399_v52 = vshll.u32 %v4329_v24, 16  ;;  %v4410_v10 = vor.u32 %v4409_v0, %v4406_v37  ;;  %v4753_v36 = vld [vmem:[#allocation4 + $0xc] sm:$0x1] }
 0x2dd   : > { %v4397_v38 = vrot.slane %v4396_v42, 4  ;;  %v4374_v6 = vsel %vm7396_vm14, %v4369_v47, %v4373_v27  ;;  %v4413_v55 = vshll.u32 %v4330_v29, 16  ;;  %v4761_v51 = vshrl.u32 %v8766_v15, 16  ;;  %v8801_v37 = vld [vmem:[#allocation4 + $0x10] sm:$0xf] }
 0x2de   : > { %v4388_v25 = vsel %vm7396_vm14, %v4383_v49, %v4387_v62  ;;  %v4423_v19 = vrot.slane %v4421_v50, 5  ;;  %v4411_v35 = vrot.slane %v4410_v10, 4  ;;  %v4764_v57 = vshll.u32 %v8766_v15, 16  ;;  %6813 = vmatpush3.bf16.msra.mxu0 %v7011_v45  ;;  %v4754_v3 = vld [vmem:[#allocation4 + $0x14] sm:$0x1]  ;;  %v7015_v50 = vld [vmem:[%s9063_s5 + $0xa0] sm:$0xff]  }
 0x2df   : > { %v6113_v16 = vcombine.low %v4374_v6, %v4388_v25  ;;  %v4401_v44 = vrot.slane %v4399_v52, 5  ;;  %v4415_v32 = vrot.slane %v4413_v55, 5  ;;  %v4763_v20 = vrot.slane %v4761_v51, 4  ;;  %6814 = vmatprep.subr.bf16.mxu0 %v7014_v56  ;;  %v8806_v0 = vld [vmem:[#allocation4 + $0x18] sm:$0xf]  ;;  %v7019_v25 = vld [vmem:[%s9063_s5 + $0xc0] sm:$0xff]  }
 0x2e0   : > { %v4324_v1 = vld [vmem:[#allocation3 + $0x38] sm:$0xf]  ;;  %v4775_v7 = vshrl.u32 %v8774_v4, 16  ;;  %v4770_v18 = vshll.u32 %v4752_v59, 16  ;;  %v4766_v41 = vrot.slane %v4764_v57, 5  ;;  %v4778_v43 = vshll.u32 %v8774_v4, 16 }
 0x2e1   : > { %6749 = vmatmul.mubr.bf16.vlgmr.msra.gmra.mxu1 %v6113_v16  ;;  %v4432_v17 = vshrl.u32 %v4324_v1, 16  ;;  %v4435_v63 = vshll.u32 %v4324_v1, 16  ;;  %v6127_v31 = vcombine.low %v8749_v9, %v4324_v1  ;;  %v4402_v46 = vsel %vm7396_vm14, %v4397_v38, %v4401_v44  ;;  %v4332_v61 = vld [vmem:[#allocation3 + $0x3c] sm:$0x1]  ;;  %v4755_v45 = vld [vmem:[#allocation4 + $0x1c] sm:$0x1] }
 0x2e2   : > { %6781 = vmatpush3.bf16.msra.mxu1 %v7047_v39  ;;  %v4416_v58 = vsel %vm7396_vm14, %v4411_v35, %v4415_v32  ;;  %v4777_v12 = vrot.slane %v4775_v7, 4  ;;  %v4767_v9 = vor.u32 %v4766_v41, %v4763_v20  ;;  %v4784_v40 = vshll.u32 %v4753_v36, 16  ;;  %6815 = vmatpush3.bf16.msra.mxu0 %v7014_v56  ;;  %v8817_v52 = vld [vmem:[#allocation4 + $0x20] sm:$0xf]  ;;  %v8828_v35 = vld [vmem:[#allocation4 + $0x28] sm:$0xf] }
 0x2e3   : > { %6782 = vmatprep.subr.bf16.mxu1 %v7010_v5  ;;  %v4434_v60 = vrot.slane %v4432_v17, 4  ;;  %v4437_v48 = vrot.slane %v4435_v63, 5  ;;  %6777 = vmatmul.mubr.bf16.gmra.mxu0 %v6127_v31  ;;  %v6114_v53 = vcombine.low %v4402_v46, %v4416_v58  ;;  %v4424_v54 = vor.u32 %v4423_v19, %v4420_v26  ;;  %v4756_v36 = vld [vmem:[#allocation4 + $0x24] sm:$0x1]  ;;  %v4757_v17 = vld [vmem:[#allocation4 + $0x2c] sm:$0x1] }
 0x2e4   : > { %v4427_v14 = vshll.u32 %v4331_v8, 16  ;;  %v4772_v11 = vrot.slane %v4770_v18, 5  ;;  %v4780_v30 = vrot.slane %v4778_v43, 5  ;;  %v4441_v13 = vshll.u32 %v4332_v61, 16  ;;  %6816 = vmatprep.subr.bf16.mxu0 %v7016_v28  ;;  %v7017_v1 = vld [vmem:[%s9063_s5 + $0x98] sm:$0xff]   ;;  %v7020_v58 = vld [vmem:[%s9063_s5 + $0x90] sm:$0xff]  }
 0x2e5   : > { %6752 = vmatprep.mubr.bf16.mxu1 %v6114_v53  ;;  %v4438_v33 = vor.u32 %v4437_v48, %v4434_v60  ;;  %v4768_v34 = vrot.slane %v4767_v9, 4  ;;  %v4786_v23 = vrot.slane %v4784_v40, 5  ;;  %v4425_v22 = vrot.slane %v4424_v54, 4  ;;  %v8837_v31 = vld [vmem:[#allocation4 + $0x30] sm:$0xf]  ;;  %v7021_v56 = vld [vmem:[%s9063_s5 + $0x178] sm:$0xff]  }
 0x2e6   : > { %6783 = vmatpush3.bf16.msra.mxu1 %v7010_v5  ;;  %v4429_v24 = vrot.slane %v4427_v14, 5  ;;  %v4781_v47 = vor.u32 %v4780_v30, %v4777_v12  ;;  %v4443_v42 = vrot.slane %v4441_v13, 5  ;;  %v4789_v27 = vshrl.u32 %v8801_v37, 16  ;;  %6817 = vmatpush3.bf16.msra.mxu0 %v7016_v28  ;;  %v4758_v48 = vld [vmem:[#allocation4 + $0x34] sm:$0x1] }
 0x2e7   : > { %6784 = vmatprep.subr.bf16.mxu1 %v7013_v2  ;;  %v4439_v29 = vrot.slane %v4438_v33, 4  ;;  %v4773_v49 = vsel %vm7396_vm14, %v4768_v34, %v4772_v11  ;;  %v4792_v26 = vshll.u32 %v8801_v37, 16  ;;  %v4798_v38 = vshll.u32 %v4754_v3, 16  ;;  %6818 = vmatprep.subr.bf16.mxu0 %v7019_v25  ;;  %v8847_v9 = vld [vmem:[#allocation4 + $0x38] sm:$0xf] }
 0x2e8   : > { %v4430_v62 = vsel %vm7396_vm14, %v4425_v22, %v4429_v24  ;;  %v4782_v10 = vrot.slane %v4781_v47, 4  ;;  %v4791_v55 = vrot.slane %v4789_v27, 4  ;;  %v4803_v59 = vshrl.u32 %v8806_v0, 16  ;;  %v4759_v24 = vld [vmem:[#allocation4 + $0x3c] sm:$0x1] }
 0x2e9   : > { %v4444_v6 = vsel %vm7396_vm14, %v4439_v29, %v4443_v42  ;;  %v6152_v16 = vcombine.low %v8766_v15, %v8774_v4  ;;  %v4794_v5 = vrot.slane %v4792_v26, 5  ;;  %v4806_v19 = vshll.u32 %v8806_v0, 16  ;;  %v7022_v42 = vld [vmem:[%s9063_s5 + $0x88] sm:$0xff]   ;;  %v7023_v27 = vld [vmem:[%s9063_s5 + $0x170] sm:$0xff]  }
 0x2ea   : > { %6785 = vmatpush3.bf16.msra.mxu1 %v7013_v2  ;;  %v6115_v51 = vcombine.low %v4430_v62, %v4444_v6  ;;  %v4787_v57 = vsel %vm7396_vm14, %v4782_v10, %v4786_v23  ;;  %v4805_v44 = vrot.slane %v4803_v59, 4  ;;  %v4812_v32 = vshll.u32 %v4755_v45, 16  ;;  %6819 = vmatpush3.bf16.msra.mxu0 %v7019_v25  ;;  %v8867_v6 = vld [vmem:[#allocation3 + $0x10] sm:$0xf] }
 0x2eb   : > { %6786 = vmatprep.subr.bf16.mxu1 %v7015_v50  ;;  %v4817_v20 = vshrl.u32 %v8817_v52, 16  ;;  %v6180_v7 = vcombine.low %v4773_v49, %v4787_v57  ;;  %v4795_v15 = vor.u32 %v4794_v5, %v4791_v55  ;;  %v4808_v4 = vrot.slane %v4806_v19, 5  ;;  %6852 = vmatprep.subr.bf16.mxu0 %v7021_v56 }
 0x2ec   : > { %6753 = vmatmul.mubr.bf16.gmra.mxu1 %v6115_v51  ;;  %v4820_v63 = vshll.u32 %v8817_v52, 16  ;;  %v4800_v18 = vrot.slane %v4798_v38, 5  ;;  %v4826_v39 = vshll.u32 %v4756_v36, 16  ;;  %v4831_v46 = vshrl.u32 %v8828_v35, 16  ;;  %v5196_v51 = vld [vmem:[#allocation3 + $0xc] sm:$0x1] }
 0x2ed   : > { %6796 = vmatprep.mubr.bf16.mxu1 %v6152_v16  ;;  %v4819_v8 = vrot.slane %v4817_v20, 4  ;;  %6820 = vmatprep.mubr.bf16.mxu0 %v6180_v7  ;;  %v4796_v41 = vrot.slane %v4795_v15, 4  ;;  %v4809_v12 = vor.u32 %v4808_v4, %v4805_v44  ;;  %v4834_v60 = vshll.u32 %v8828_v35, 16  ;;  %v7025_v20 = vld [vmem:[%s9063_s5 + $0x168] sm:$0xff]   ;;  %v5197_v7 = vld [vmem:[#allocation3 + $0x14] sm:$0x1] }
 0x2ee   : > { %6787 = vmatpush3.bf16.msra.mxu1 %v7015_v50  ;;  %v4822_v61 = vrot.slane %v4820_v63, 5  ;;  %v4814_v2 = vrot.slane %v4812_v32, 5  ;;  %v4833_v53 = vrot.slane %v4831_v46, 4  ;;  %v4840_v43 = vshll.u32 %v4757_v17, 16  ;;  %v8856_v50 = vld [vmem:[#allocation3 + $0x8] sm:$0xf] }
 0x2ef   : > { %6788 = vmatprep.subr.bf16.mxu1 %v7017_v1  ;;  %v4845_v40 = vshrl.u32 %v8837_v31, 16  ;;  %v4801_v54 = vsel %vm7396_vm14, %v4796_v41, %v4800_v18  ;;  %v4810_v14 = vrot.slane %v4809_v12, 4  ;;  %v4836_v30 = vrot.slane %v4834_v60, 5  ;;  %v7027_v60 = vld [vmem:[%s9063_s5 + $0x138] sm:$0xff]  }
 0x2f0   : > { %v4823_v11 = vor.u32 %v4822_v61, %v4819_v8  ;;  %v4828_v28 = vrot.slane %v4826_v39, 5  ;;  %v4848_v13 = vshll.u32 %v8837_v31, 16  ;;  %v4854_v3 = vshll.u32 %v4758_v48, 16 }
 0x2f1   : > { %v4847_v33 = vrot.slane %v4845_v40, 4  ;;  %v4815_v34 = vsel %vm7396_vm14, %v4810_v14, %v4814_v2  ;;  %v4837_v22 = vor.u32 %v4836_v30, %v4833_v53  ;;  %v4859_v47 = vshrl.u32 %v8847_v9, 16  ;;  %v7029_v40 = vld [vmem:[%s9063_s5 + $0x160] sm:$0xff]  }
 0x2f2   : > { %6789 = vmatpush3.bf16.msra.mxu1 %v7017_v1  ;;  %v4824_v23 = vrot.slane %v4823_v11, 4  ;;  %v6181_v29 = vcombine.low %v4801_v54, %v4815_v34  ;;  %v4850_v49 = vrot.slane %v4848_v13, 5  ;;  %v4862_v62 = vshll.u32 %v8847_v9, 16  ;;  %v7024_v1 = vld [vmem:[%s9063_s5 + $0x80] sm:$0xff]   ;;  %v8904_v34 = vld [vmem:[#allocation3 + $0x28] sm:$0xf] }
 0x2f3   : > { %6790 = vmatprep.subr.bf16.mxu1 %v7020_v58  ;;  %v4838_v26 = vrot.slane %v4837_v22, 4  ;;  %v4842_v38 = vrot.slane %v4840_v43, 5  ;;  %v4861_v10 = vrot.slane %v4859_v47, 4  ;;  %v4868_v59 = vshll.u32 %v4759_v24, 16  ;;  %v8913_v47 = vld [vmem:[#allocation3 + $0x30] sm:$0xf] }
 0x2f4   : > { %v4829_v45 = vsel %vm7396_vm14, %v4824_v23, %v4828_v28  ;;  %6821 = vmatmul.mubr.bf16.vlgmr.msra.gmra.mxu0 %v6181_v29  ;;  %v4851_v25 = vor.u32 %v4850_v49, %v4847_v33  ;;  %v4864_v55 = vrot.slane %v4862_v62, 5  ;;  %v5205_v16 = vshrl.u32 %v8856_v50, 16  ;;  %v7030_v28 = vld [vmem:[%s9063_s5 + $0x130] sm:$0xff]   ;;  %v8898_v33 = vld [vmem:[#allocation3 + $0x18] sm:$0xf] }
 0x2f5   : > { %v4843_v5 = vsel %vm7396_vm14, %v4838_v26, %v4842_v38  ;;  %6853 = vmatpush3.bf16.msra.mxu0 %v7021_v56  ;;  %v4856_v19 = vrot.slane %v4854_v3, 5  ;;  %v5208_v36 = vshll.u32 %v8856_v50, 16  ;;  %v5214_v17 = vshll.u32 %v5196_v51, 16  ;;  %v7035_v49 = vld [vmem:[%s9063_s5 + $0x150] sm:$0xff]   ;;  %v8932_v51 = vld [vmem:[#allocation3 + $0x38] sm:$0xf] }
 0x2f6   : > { %6791 = vmatpush3.bf16.msra.mxu1 %v7020_v58  ;;  %v6182_v57 = vcombine.low %v4829_v45, %v4843_v5  ;;  %6854 = vmatprep.subr.bf16.mxu0 %v7023_v27  ;;  %v4852_v44 = vrot.slane %v4851_v25, 4  ;;  %v4865_v32 = vor.u32 %v4864_v55, %v4861_v10  ;;  %v5207_v15 = vrot.slane %v5205_v16, 4  ;;  %v7036_v25 = vld [vmem:[%s9063_s5 + $0x120] sm:$0xff]   ;;  %v7037_v5 = vld [vmem:[%s9063_s5 + $0x148] sm:$0xff]  }
 0x2f7   : > { %6792 = vmatprep.subr.bf16.mxu1 %v7022_v42  ;;  %v5210_v4 = vrot.slane %v5208_v36, 5  ;;  %v5219_v63 = vshrl.u32 %v8867_v6, 16  ;;  %v5222_v18 = vshll.u32 %v8867_v6, 16  ;;  %v4870_v39 = vrot.slane %v4868_v59, 5 }
 0x2f8   : > { %6824 = vmatprep.mubr.bf16.mxu0 %v6182_v57  ;;  %v4857_v56 = vsel %vm7396_vm14, %v4852_v44, %v4856_v19  ;;  %v4866_v8 = vrot.slane %v4865_v32, 4  ;;  %v5228_v12 = vshll.u32 %v5197_v7, 16  ;;  %v5216_v53 = vrot.slane %v5214_v17, 5  ;;  %v5200_v32 = vld [vmem:[#allocation3 + $0x2c] sm:$0x1] }
 0x2f9   : > { %6855 = vmatpush3.bf16.msra.mxu0 %v7023_v27  ;;  %v5211_v46 = vor.u32 %v5210_v4, %v5207_v15  ;;  %v5221_v58 = vrot.slane %v5219_v63, 4  ;;  %v5224_v41 = vrot.slane %v5222_v18, 5  ;;  %v6153_v30 = vcombine.low %v8801_v37, %v8806_v0  ;;  %v7031_v37 = vld [vmem:[%s9063_s5 + $0x158] sm:$0xff]   ;;  %v8909_v0 = vld [vmem:[#allocation3 + $0x20] sm:$0xf] }
 0x2fa   : > { %6793 = vmatpush3.bf16.msra.mxu1 %v7022_v42  ;;  %v4871_v61 = vsel %vm7396_vm14, %v4866_v8, %v4870_v39  ;;  %6856 = vmatprep.subr.bf16.mxu0 %v7025_v20  ;;  %v5230_v11 = vrot.slane %v5228_v12, 5  ;;  %v6154_v3 = vcombine.low %v8817_v52, %v8828_v35  ;;  %v5233_v22 = vshrl.u32 %v8898_v33, 16  ;;  %v7033_v52 = vld [vmem:[%s9063_s5 + $0x128] sm:$0xff]   ;;  %v5199_v7 = vld [vmem:[#allocation3 + $0x24] sm:$0x1]  ;;  %v7039_v8 = vld [vmem:[%s9063_s5 + $0x140] sm:$0xff]  }
 0x2fb   : > { %6794 = vmatprep.subr.bf16.mxu1 %v7024_v1  ;;  %v6183_v48 = vcombine.low %v4857_v56, %v4871_v61  ;;  %v5212_v2 = vrot.slane %v5211_v46, 4  ;;  %v5225_v43 = vor.u32 %v5224_v41, %v5221_v58  ;;  %v5236_v24 = vshll.u32 %v8898_v33, 16  ;;  %v5201_v63 = vld [vmem:[#allocation3 + $0x34] sm:$0x1] }
 0x2fc   : > { %v5261_v35 = vshrl.u32 %v8904_v34, 16  ;;  %v5264_v29 = vshll.u32 %v8904_v34, 16  ;;  %v5247_v42 = vshrl.u32 %v8909_v0, 16  ;;  %v5250_v27 = vshll.u32 %v8909_v0, 16 }
 0x2fd   : > { %6825 = vmatmul.mubr.bf16.gmra.mxu0 %v6183_v48  ;;  %v5217_v54 = vsel %vm7396_vm14, %v5212_v2, %v5216_v53  ;;  %v5226_v14 = vrot.slane %v5225_v43, 4  ;;  %v5275_v62 = vshrl.u32 %v8913_v47, 16  ;;  %v5278_v45 = vshll.u32 %v8913_v47, 16 }
 0x2fe   : > { %6795 = vmatpush3.bf16.msra.mxu1 %v7024_v1  ;;  %6857 = vmatpush3.bf16.msra.mxu0 %v7025_v20  ;;  %v5235_v26 = vrot.slane %v5233_v22, 4  ;;  %v5238_v38 = vrot.slane %v5236_v24, 5  ;;  %v6155_v10 = vcombine.low %v8837_v31, %v8847_v9  ;;  %v5263_v55 = vrot.slane %v5261_v35, 4  ;;  %v5198_v31 = vld [vmem:[#allocation3 + $0x1c] sm:$0x1] }
 0x2ff   : > { %6828 = vmatprep.subr.bf16.mxu1 %v7027_v60  ;;  %v5231_v13 = vsel %vm7396_vm14, %v5226_v14, %v5230_v11  ;;  %6858 = vmatprep.subr.bf16.mxu0 %v7029_v40  ;;  %v5266_v59 = vrot.slane %v5264_v29, 5  ;;  %v6208_v16 = vcombine.low %v8856_v50, %v8867_v6  ;;  %v5249_v19 = vrot.slane %v5247_v42, 4  ;;  %v8939_v1 = vld [vmem:[#allocation3 + $0x40] sm:$0xf]  ;;  %v7038_v6 = vld [vmem:[%s9063_s5 + $0x118] sm:$0xff]  }
 0x300   : > { %v6236_v23 = vcombine.low %v5217_v54, %v5231_v13  ;;  %v5252_v36 = vrot.slane %v5250_v27, 5  ;;  %v5277_v9 = vrot.slane %v5275_v62, 4  ;;  %v5280_v57 = vrot.slane %v5278_v45, 5  ;;  %v5203_v24 = vld [vmem:[#allocation3 + $0x44] sm:$0x1] }
 0x301   : > { %6797 = vmatmul.mubr.bf16.vlgmr.msra.gmra.mxu1 %v6153_v30  ;;  %v5239_v44 = vor.u32 %v5238_v38, %v5235_v26  ;;  %v5289_v20 = vshrl.u32 %v8932_v51, 16  ;;  %v5292_v50 = vshll.u32 %v8932_v51, 16  ;;  %v5267_v15 = vor.u32 %v5266_v59, %v5263_v55  ;;  %v5202_v30 = vld [vmem:[#allocation3 + $0x3c] sm:$0x1]  ;;  %v7042_v26 = vld [vmem:[%s9063_s5 + $0x100] sm:$0xff]  }
 0x302   : > { %6800 = vmatprep.mubr.bf16.mxu1 %v6154_v3  ;;  %6829 = vmatpush3.bf16.msra.mxu1 %v7027_v60  ;;  %v5242_v4 = vshll.u32 %v5198_v31, 16  ;;  %v5253_v17 = vor.u32 %v5252_v36, %v5249_v19  ;;  %v5303_v18 = vshrl.u32 %v8939_v1, 16  ;;  %v5306_v56 = vshll.u32 %v8939_v1, 16  ;;  %v7040_v60 = vld [vmem:[%s9063_s5 + $0x110] sm:$0xff]  }
 0x303   : > { %6868 = vmatprep.mubr.bf16.mxu0 %v6236_v23  ;;  %6830 = vmatprep.subr.bf16.mxu1 %v7030_v28  ;;  %v5270_v39 = vshll.u32 %v5200_v32, 16  ;;  %v5281_v46 = vor.u32 %v5280_v57, %v5277_v9  ;;  %v5240_v58 = vrot.slane %v5239_v44, 4  ;;  %v5256_v41 = vshll.u32 %v5199_v7, 16  ;;  %v7041_v23 = vld [vmem:[%s9063_s5 + $0x108] sm:$0xff]  }
 0x304   : > { %6859 = vmatpush3.bf16.msra.mxu0 %v7029_v40  ;;  %v5291_v12 = vrot.slane %v5289_v20, 4  ;;  %v5294_v61 = vrot.slane %v5292_v50, 5  ;;  %v5268_v48 = vrot.slane %v5267_v15, 4  ;;  %v5284_v2 = vshll.u32 %v5201_v63, 16 }
 0x305   : > { %6860 = vmatprep.subr.bf16.mxu0 %v7031_v37  ;;  %v5244_v53 = vrot.slane %v5242_v4, 5  ;;  %v5254_v43 = vrot.slane %v5253_v17, 4  ;;  %v5305_v40 = vrot.slane %v5303_v18, 4  ;;  %v5308_v54 = vrot.slane %v5306_v56, 5 }
 0x306   : > { %6831 = vmatpush3.bf16.msra.mxu1 %v7030_v28  ;;  %v5272_v14 = vrot.slane %v5270_v39, 5  ;;  %v5282_v11 = vrot.slane %v5281_v46, 4  ;;  %v5258_v13 = vrot.slane %v5256_v41, 5  ;;  %v5295_v3 = vor.u32 %v5294_v61, %v5291_v12 }
 0x307   : > { %6832 = vmatprep.subr.bf16.mxu1 %v7033_v52  ;;  %v5245_v28 = vsel %vm7396_vm14, %v5240_v58, %v5244_v53  ;;  %v5286_v22 = vrot.slane %v5284_v2, 5  ;;  %v5298_v35 = vshll.u32 %v5202_v30, 16  ;;  %v5309_v29 = vor.u32 %v5308_v54, %v5305_v40 }
 0x308   : > { %6861 = vmatpush3.bf16.msra.mxu0 %v7031_v37  ;;  %v5273_v37 = vsel %vm7396_vm14, %v5268_v48, %v5272_v14  ;;  %v5296_v62 = vrot.slane %v5295_v3, 4  ;;  %v5312_v45 = vshll.u32 %v5203_v24, 16  ;;  %v6210_v19 = vcombine.low %v8904_v34, %v8913_v47 }
 0x309   : > { %6801 = vmatmul.mubr.bf16.gmra.mxu1 %v6155_v10  ;;  %6862 = vmatprep.subr.bf16.mxu0 %v7035_v49  ;;  %v5287_v27 = vsel %vm7396_vm14, %v5282_v11, %v5286_v22  ;;  %v5300_v38 = vrot.slane %v5298_v35, 5  ;;  %v5310_v10 = vrot.slane %v5309_v29, 4  ;;  %v6211_v36 = vcombine.low %v8932_v51, %v8939_v1 }
 0x30a   : > { %6833 = vmatpush3.bf16.msra.mxu1 %v7033_v52  ;;  %6844 = vmatprep.mubr.bf16.mxu1 %v6208_v16  ;;  %v5259_v52 = vsel %vm7396_vm14, %v5254_v43, %v5258_v13  ;;  %v5314_v55 = vrot.slane %v5312_v45, 5 }
 0x30b   : > { %6834 = vmatprep.subr.bf16.mxu1 %v7036_v25  ;;  %v6237_v42 = vcombine.low %v5245_v28, %v5259_v52 }
 0x30c   : > { %6863 = vmatpush3.bf16.msra.mxu0 %v7035_v49  ;;  %v6238_v49 = vcombine.low %v5273_v37, %v5287_v27  ;;  %v5315_v59 = vsel %vm7396_vm14, %v5310_v10, %v5314_v55  ;;  %v8984_v27 = vld [vmem:[%s9064_s6] ss:$0 sm:$0xff] }
 0x30d   : > { %6864 = vmatprep.subr.bf16.mxu0 %v7037_v5 }
 0x30e   : > { %6835 = vmatpush3.bf16.msra.mxu1 %v7036_v25  ;;  %v5301_v25 = vsel %vm7396_vm14, %v5296_v62, %v5300_v38 }
 0x30f   : > { %6836 = vmatprep.subr.bf16.mxu1 %v7038_v6  ;;  %v6239_v16 = vcombine.low %v5301_v25, %v5315_v59 }
 0x310   : > { %6865 = vmatpush3.bf16.msra.mxu0 %v7037_v5  ;;  %v6209_v5 = vcombine.low %v8898_v33, %v8909_v0 }
 0x311   : > { %6866 = vmatprep.subr.bf16.mxu0 %v7039_v8 }
 0x312   : > { %6837 = vmatpush3.bf16.msra.mxu1 %v7038_v6 }
 0x313   : > { %6838 = vmatprep.subr.bf16.mxu1 %v7040_v60 }
 0x314   : > { %6867 = vmatpush3.bf16.msra.mxu0 %v7039_v8 }
 0x316   : > { %6839 = vmatpush3.bf16.msra.mxu1 %v7040_v60 }
 0x317   : > { %6869 = vmatmul.mubr.bf16.vlgmr.msra.gmra.mxu0 %v6237_v42  ;;  %6840 = vmatprep.subr.bf16.mxu1 %v7041_v23 }
 0x318   : > { %6872 = vmatprep.mubr.bf16.mxu0 %v6238_v49 }
 0x31a   : > { %6841 = vmatpush3.bf16.msra.mxu1 %v7041_v23 }
 0x31b   : > { %6842 = vmatprep.subr.bf16.mxu1 %v7042_v26 }
 0x31e   : > { %6843 = vmatpush3.bf16.msra.mxu1 %v7042_v26 }
 0x31f   : > { %6873 = vmatmul.mubr.bf16.gmra.mxu0 %v6239_v16 }
 0x321   : > { %6845 = vmatmul.mubr.bf16.vlgmr.msra.gmra.mxu1 %v6209_v5 }
 0x322   : > { %6848 = vmatprep.mubr.bf16.mxu1 %v6210_v19 }
 0x329   : > { %6849 = vmatmul.mubr.bf16.gmra.mxu1 %v6211_v36 }
 0x38c   : > { %v6774_v31 = vpop.f32.mrf.mxu0 }
 0x38e   : > { %v4713_v9 = vpop.f32.mrf.mxu0 }
 0x390   : > { %v6775_v57 = vpop.f32.mrf.mxu0 }
 0x392   : > { %v4716_v44 = vpop.f32.mrf.mxu0 }
 0x3a1   : > { %v6750_v21 = vpop.f32.mrf.mxu1 }
 0x3a2   : > { %v4722_v53 = vadd.f32 %v6774_v31, %v6750_v21 }
 0x3a3   : > { %v4576_v32 = vpop.f32.mrf.mxu1  ;;  %v6778_v20 = vpop.f32.mrf.mxu0 }
 0x3a4   : > { %v4714_v40 = vadd.f32 %v4713_v9, %v4576_v32 }
 0x3a5   : > { %v6751_v50 = vpop.f32.mrf.mxu1  ;;  %v4729_v6 = vpop.f32.mrf.mxu0 }
 0x3a6   : > { %v4725_v11 = vadd.f32 %v6775_v57, %v6751_v50 }
 0x3a7   : > { %v4579_v7 = vpop.f32.mrf.mxu1  ;;  %v6779_v33 = vpop.f32.mrf.mxu0 }
 0x3a8   : > { %v4717_v23 = vadd.f32 %v4716_v44, %v4579_v7 }
 0x3a9   : > { %v4732_v15 = vpop.f32.mrf.mxu0 }
 0x3ac   : > { %v6754_v0 = vpop.f32.mrf.mxu1 }
 0x3ad   : > { %v4738_v35 = vadd.f32 %v6778_v20, %v6754_v0 }
 0x3ae   : > { %v4592_v34 = vpop.f32.mrf.mxu1 }
 0x3af   : > { %v4730_v29 = vadd.f32 %v4729_v6, %v4592_v34 }
 0x3b0   : > { %v6755_v4 = vpop.f32.mrf.mxu1 }
 0x3b1   : > { %v4741_v38 = vadd.f32 %v6779_v33, %v6755_v4 }
 0x3b2   : > { %v4595_v63 = vpop.f32.mrf.mxu1 }
 0x3b3   : > { %v4733_v36 = vadd.f32 %v4732_v15, %v4595_v63 }
 0x3b4   : > { %v6822_v47 = vpop.f32.mrf.mxu0 }
 0x3b6   : > { %v5149_v17 = vpop.f32.mrf.mxu0 }
 0x3b8   : > { %v6823_v51 = vpop.f32.mrf.mxu0 }
 0x3ba   : > { %v5152_v18 = vpop.f32.mrf.mxu0 }
 0x3bd   : > { %v6826_v8 = vpop.f32.mrf.mxu0 }
 0x3bf   : > { %v5165_v46 = vpop.f32.mrf.mxu0 }
 0x3c1   : > { %v6798_v1 = vpop.f32.mrf.mxu1  ;;  %v6827_v41 = vpop.f32.mrf.mxu0 }
 0x3c2   : > { %v5028_v54 = vadd.f32 %v6798_v1, %v4722_v53 }
 0x3c3   : > { %v4995_v56 = vpop.f32.mrf.mxu1  ;;  %v8978_v61 = vpop.f32.mrf.mxu0 }
 0x3c4   : > { %v5026_v30 = vadd.f32 %v4995_v56, %v4714_v40  ;;  %v5182_v3 = vadd.f32 %v6822_v47, %v5028_v54 }
 0x3c5   : > { %v6799_v39 = vpop.f32.mrf.mxu1 }
 0x3c6   : > { %v5029_v13 = vadd.f32 %v6799_v39, %v4725_v11  ;;  %v5180_v52 = vadd.f32 %v5149_v17, %v5026_v30 }
 0x3c7   : > { %v4998_v58 = vpop.f32.mrf.mxu1 }
 0x3c8   : > { %v5027_v42 = vadd.f32 %v4998_v58, %v4717_v23  ;;  %v5183_v26 = vadd.f32 %v6823_v51, %v5029_v13 }
 0x3c9   : > { %v6802_v12 = vpop.f32.mrf.mxu1 }
 0x3ca   : > { %v5032_v10 = vadd.f32 %v6802_v12, %v4738_v35  ;;  %v5181_v9 = vadd.f32 %v5152_v18, %v5027_v42 }
 0x3cb   : > { %v5011_v60 = vpop.f32.mrf.mxu1 }
 0x3cc   : > { %v5030_v25 = vadd.f32 %v5011_v60, %v4730_v29  ;;  %v5186_v7 = vadd.f32 %v6826_v8, %v5032_v10 }
 0x3cd   : > { %v6803_v43 = vpop.f32.mrf.mxu1 }
 0x3ce   : > { %v5033_v31 = vadd.f32 %v6803_v43, %v4741_v38  ;;  %v5184_v0 = vadd.f32 %v5165_v46, %v5030_v25 }
 0x3cf   : > { %v5014_v28 = vpop.f32.mrf.mxu1 }
 0x3d0   : > { %v5031_v20 = vadd.f32 %v5014_v28, %v4733_v36  ;;  %v5187_v51 = vadd.f32 %v6827_v41, %v5033_v31 }
 0x3d7   : > { %v6870_v48 = vpop.f32.mrf.mxu0 }
 0x3d9   : > { %v5593_v2 = vpop.f32.mrf.mxu0 }
 0x3db   : > { %v6871_v14 = vpop.f32.mrf.mxu0 }
 0x3dd   : > { %v5596_v37 = vpop.f32.mrf.mxu0 }
 0x3df   : > { %v6874_v55 = vpop.f32.mrf.mxu0 }
 0x3e1   : > { %v6846_v22 = vpop.f32.mrf.mxu1  ;;  %v5609_v50 = vpop.f32.mrf.mxu0 }
 0x3e2   : > { %v5472_v24 = vadd.f32 %v6846_v22, %v5182_v3 }
 0x3e3   : > { %v5439_v49 = vpop.f32.mrf.mxu1  ;;  %v6875_v8 = vpop.f32.mrf.mxu0 }
 0x3e4   : > { %v5626_v62 = vadd.f32 %v6870_v48, %v5472_v24  ;;  %v5470_v45 = vadd.f32 %v5439_v49, %v5180_v52 }
 0x3e5   : > { %v6847_v59 = vpop.f32.mrf.mxu1  ;;  %v5612_v11 = vpop.f32.mrf.mxu0 }
 0x3e6   : > { %v5641_v16 = vadd.f32 %v8984_v27, %v5626_v62  ;;  %v5624_v5 = vadd.f32 %v5593_v2, %v5470_v45  ;;  %v5473_v19 = vadd.f32 %v6847_v59, %v5183_v26  ;;  %v5185_v2 = vadd.f32 %v8978_v61, %v5031_v20 }
 0x3e7   : > { %v5442_v57 = vpop.f32.mrf.mxu1 }
 0x3e8   : > { %vm5649_vm14 = vcmp.ge.f32.partialorder %v5641_v16, 0.0  ;;  %v5657_v21 = vmul.f32 0.1, %v5641_v16  ;;  %v5639_v44 = vadd.f32 %v8984_v27, %v5624_v5  ;;  %v5627_v32 = vadd.f32 %v6871_v14, %v5473_v19 }
 0x3e9   : > { %v5471_v6 = vadd.f32 %v5442_v57, %v5181_v9  ;;  %v6850_v33 = vpop.f32.mrf.mxu1 }
 0x3ea   : > { %v5665_v34 = vsel %vm5649_vm14, %v5641_v16, %v5657_v21  ;;  %vm5647_vm4 = vcmp.ge.f32.partialorder %v5639_v44, 0.0  ;;  %v5655_v47 = vmul.f32 0.1, %v5639_v44  ;;  %v5642_v4 = vadd.f32 %v8984_v27, %v5627_v32 }
 0x3eb   : > { %5673 = vst [vmem:[%s8991_s8 + $0x10] sm:$0xff] %v5665_v34  ;;  %v5625_v15 = vadd.f32 %v5596_v37, %v5471_v6  ;;  %v5476_v17 = vadd.f32 %v6850_v33, %v5186_v7  ;;  %v5455_v63 = vpop.f32.mrf.mxu1 }
 0x3ec   : > { %v5663_v1 = vsel %vm5647_vm4, %v5639_v44, %v5655_v47  ;;  %vm5650_vm10 = vcmp.ge.f32.partialorder %v5642_v4, 0.0  ;;  %v5658_v18 = vmul.f32 0.1, %v5642_v4  ;;  %v5474_v56 = vadd.f32 %v5455_v63, %v5184_v0 }
 0x3ed   : > { %5671 = vst [vmem:[%s8991_s8] sm:$0xff] %v5663_v1  ;;  %v5640_v39 = vadd.f32 %v8984_v27, %v5625_v15  ;;  %v5630_v46 = vadd.f32 %v6874_v55, %v5476_v17  ;;  %v6851_v58 = vpop.f32.mrf.mxu1 }
 0x3ee   : > { %v5666_v12 = vsel %vm5650_vm10, %v5642_v4, %v5658_v18  ;;  %v5628_v60 = vadd.f32 %v5609_v50, %v5474_v56  ;;  %v5477_v48 = vadd.f32 %v6851_v58, %v5187_v51 }
 0x3ef   : > { %5674 = vst [vmem:[%s8991_s8 + $0x18] sm:$0xff] %v5666_v12  ;;  %vm5648_vm11 = vcmp.ge.f32.partialorder %v5640_v39, 0.0  ;;  %v5656_v53 = vmul.f32 0.1, %v5640_v39  ;;  %v5645_v41 = vadd.f32 %v8984_v27, %v5630_v46  ;;  %v5458_v43 = vpop.f32.mrf.mxu1 }
 0x3f0   : > { %v5643_v40 = vadd.f32 %v8984_v27, %v5628_v60  ;;  %v5631_v54 = vadd.f32 %v6875_v8, %v5477_v48  ;;  %v5475_v14 = vadd.f32 %v5458_v43, %v5185_v2 }
 0x3f1   : > { %v5664_v30 = vsel %vm5648_vm11, %v5640_v39, %v5656_v53  ;;  %vm5653_vm13 = vcmp.ge.f32.partialorder %v5645_v41, 0.0  ;;  %v5661_v28 = vmul.f32 0.1, %v5645_v41 }
 0x3f2   : > { %5672 = vst [vmem:[%s8991_s8 + $0x8] sm:$0xff] %v5664_v30  ;;  %vm5651_vm15 = vcmp.ge.f32.partialorder %v5643_v40, 0.0  ;;  %v5659_v61 = vmul.f32 0.1, %v5643_v40  ;;  %v5646_v13 = vadd.f32 %v8984_v27, %v5631_v54  ;;  %v5629_v3 = vadd.f32 %v5612_v11, %v5475_v14 }
 0x3f3   : > { %v5669_v23 = vsel %vm5653_vm13, %v5645_v41, %v5661_v28 }
 0x3f4   : > { %5677 = vst [vmem:[%s8991_s8 + $0x30] sm:$0xff] %v5669_v23  ;;  %v5667_v37 = vsel %vm5651_vm15, %v5643_v40, %v5659_v61  ;;  %vm5654_vm2 = vcmp.ge.f32.partialorder %v5646_v13, 0.0  ;;  %v5662_v22 = vmul.f32 0.1, %v5646_v13  ;;  %v5644_v24 = vadd.f32 %v8984_v27, %v5629_v3 }
 0x3f5   : > { %5675 = vst [vmem:[%s8991_s8 + $0x20] sm:$0xff] %v5667_v37 }
 0x3f6   : > { %v5670_v52 = vsel %vm5654_vm2, %v5646_v13, %v5662_v22  ;;  %vm5652_vm6 = vcmp.ge.f32.partialorder %v5644_v24, 0.0  ;;  %v5660_v35 = vmul.f32 0.1, %v5644_v24 }
 0x3f7   : > { %5678 = vst [vmem:[%s8991_s8 + $0x38] sm:$0xff] %v5670_v52 }
 0x3f8   : > { %v5668_v29 = vsel %vm5652_vm6, %v5644_v24, %v5660_v35 }
 0x3f9   : > { %5676 = vst [vmem:[%s8991_s8 + $0x28] sm:$0xff] %v5668_v29 }
 0x3fa   : > { %7061 = shalt.err (!%p7058_p3)
}
 0x3fb   : > { %s7062_s20 = scalar_lea.hbm %s9010_s15, 1024  ;;  %s7066_s29 = scalar_lea.hbm %s9065_s7, 2048 }
 0x3fc   : > { %p7063_p4 = scmp.ne.s32.totalorder %s9010_s15, %s7062_s20  ;;  %p7067_p9 = scmp.lt.s32.totalorder %s9010_s15, %s9065_s7 }
 0x3fd   : > { %p7068_p10 = scmp.lt.s32.totalorder %s7066_s29, %s7062_s20 }
 0x3fe   : > { %p7064_p7 = pnand %p7063_p4, %p7192_p5 }
 0x3ff   : > { %p7069_p11 = por %p7068_p10, %p7067_p9 }
 0x400   : > { %p7065_p8 = pneg %p7064_p7 }
 0x402   : > { %p7070_p12 = pnand %p7069_p11, %p7065_p8 }
 0x404   : > { %7073 = shalt.err (!%p7070_p12)
}
 0x405   : > { %s7112_s14 = smov 128   ;;  %s7113_s23 = smov 8  }
 0x406   : > { %6876 = dma.vmem_to_hbm [thread:$0]  (%p7192_p5), %s9012_s13, 1024, %s9010_s15, %s9018_s28, %s7112_s14, %s7112_s14, %s7113_s23  }
 0x407 PF: > { %p6882_p13 = scmp.ge.s32.totalorder %s7108_s27, 2  ;;  %s5708_s16 = sand.u32 1, %s7096_s24  }
 0x408   : > { %s5709_s17 = scalar_lea.sflag [#allocation6], %s5708_s16 }
 0x409   : > { %p6879_p0 = pnand %p6882_p13, %p7196_p6 }
 0x40b   : > { %p6880_p1 = pneg %p6879_p0 }
 0x40d   : > { %7091 = dma.done.wait (%p6880_p1), %s5709_s17, 1024  }
 0x40e   : > { %7093 = vsyncadd (%p6880_p1), %s5709_s17, 4294966272  ;;  %p17_p2 = scmp.ge.s32.totalorder %s7179_s30, 4   ;;  %s9108_s24 = smov %s7100_s25 }
 0x40f   : > { %s9109_s25 = smov %s7104_s26  ;;  %s9110_s26 = smov %s7190_s10 }
 0x410   : > { %s9111_s27 = smov %s7179_s30  ;;  %19 = sbr.rel (!%p17_p2) target bundleno = 3 (0x3), region = 100 }
 0x415   :  { %5714 = vsyncpa [#allocation6], 1 }
 0x416   :  { %5716 = vsyncpa [#allocation6 + $0x1], 1 }

</bundles_post_ra>
